<compile_context>
chip_gen: v7x
topology: tpu7x:2x2x1
jax: 0.10.0
libtpu: 0.0.40
codegen_flags: <defaults>
</compile_context>

<pallas_src>
import jax
import jax.numpy as jnp
from jax.experimental import pallas as pl
from jax.experimental.pallas import tpu as pltpu


def _leaky_relu(v):
    # slope 0.1 < 1  =>  LeakyReLU(v) == max(v, 0.1*v)   (single VPU max)
    return jnp.maximum(v, 0.1 * v)


def _im2col_3x3(xa, H, W, C):
    """Build the im2col patch matrix for a 3x3 conv with zero padding=1.

    xa: (H, W, C) activation (bf16).  Returns (H*W, 9*C) where column
    (dy*3 + dx)*C + cin  holds xp[i+dy, j+dx, cin]  (xp = zero-padded xa),
    matching w_hwio.reshape(9*C, Cout).
    """
    dt = xa.dtype
    # Zero-pad W (second-minor dim) then H (leading dim) -- pure value ops,
    # nothing touches HBM.
    zc = jnp.zeros((H, 1, C), dt)
    xw = jnp.concatenate([zc, xa, zc], axis=1)              # (H, W+2, C)
    zr = jnp.zeros((1, W + 2, C), dt)
    xp = jnp.concatenate([zr, xw, zr], axis=0)              # (H+2, W+2, C)
    # dx-shifted columns stacked along channels (3 second-minor-offset slices).
    cols = jnp.concatenate([xp[:, dx:dx + W, :] for dx in range(3)],
                           axis=-1)                          # (H+2, W, 3C)
    # dy-shifted row strips are leading-dim slices (cheap); W % 8 == 0 keeps
    # the (H, W, 3C) -> (H*W, 3C) reshape layout-trivial.
    strips = [cols[dy:dy + H].reshape(H * W, 3 * C) for dy in range(3)]
    return jnp.concatenate(strips, axis=-1)                  # (H*W, 9C)


def _rcab_kernel(x_ref, w1_ref, b1_ref, w2_ref, b2_ref, o_ref):
    # x_ref : (1, H, W, Cin)  f32      current batch element
    # w1_ref: (9*Cin, Cmid)   bf16     conv1 weight, im2col layout
    # b1_ref: (1, Cmid)       f32
    # w2_ref: (9*Cmid, Cout)  bf16     conv2 weight, im2col layout
    # b2_ref: (1, Cout)       f32
    _, H, W, Cin = x_ref.shape
    Cmid = w1_ref.shape[1]

    x = x_ref[0]                                             # (H, W, Cin) f32

    # LeakyReLU(0.1) -> bf16 for the MXU (relayouts done at half width).
    a1 = _leaky_relu(x).astype(w1_ref.dtype)
    p1 = _im2col_3x3(a1, H, W, Cin)                          # (H*W, 9*Cin)
    h = jnp.dot(p1, w1_ref[...],
                preferred_element_type=jnp.float32) + b1_ref[...]

    a2 = _leaky_relu(h).astype(w2_ref.dtype)
    p2 = _im2col_3x3(a2.reshape(H, W, Cmid), H, W, Cmid)     # (H*W, 9*Cmid)
    y = jnp.dot(p2, w2_ref[...],
                preferred_element_type=jnp.float32) + b2_ref[...]

    # Residual add in f32, single store of the output tile.
    o_ref[0] = (y.reshape(H, W, -1) + x).astype(o_ref.dtype)


def rcab_pallas(x_nhwc, w1_hwio, b1, w2_hwio, b2):
    """x_nhwc: (B,H,W,Cin) f32; weights in HWIO (3,3,Cin,Cout); biases (Cout,)."""
    B, H, W, Cin = x_nhwc.shape
    kh, kw, _, Cmid = w1_hwio.shape
    Cout = w2_hwio.shape[-1]
    assert Cin == Cout, "RCAB residual requires in_channels == out_channels"
    assert W % 8 == 0, "W should be a multiple of 8 for layout-trivial reshapes"

    # Parameter prep (outside the kernel): im2col weight layout + bf16 cast.
    w1m = w1_hwio.reshape(kh * kw * Cin, Cmid).astype(jnp.bfloat16)
    w2m = w2_hwio.reshape(kh * kw * Cmid, Cout).astype(jnp.bfloat16)
    b1r = b1.reshape(1, Cmid).astype(jnp.float32)
    b2r = b2.reshape(1, Cout).astype(jnp.float32)

    zero2 = lambda b: (0, 0)
    return pl.pallas_call(
        _rcab_kernel,
        out_shape=jax.ShapeDtypeStruct((B, H, W, Cout), x_nhwc.dtype),
        grid_spec=pltpu.PrefetchScalarGridSpec(
            num_scalar_prefetch=0,
            grid=(B,),
            in_specs=[
                pl.BlockSpec((1, H, W, Cin), lambda b: (b, 0, 0, 0)),
                pl.BlockSpec((kh * kw * Cin, Cmid), zero2),
                pl.BlockSpec((1, Cmid), zero2),
                pl.BlockSpec((kh * kw * Cmid, Cout), zero2),
                pl.BlockSpec((1, Cout), zero2),
            ],
            out_specs=pl.BlockSpec((1, H, W, Cout), lambda b: (b, 0, 0, 0)),
        ),
        compiler_params=pltpu.CompilerParams(
            dimension_semantics=("parallel",)),
    )(x_nhwc, w1m, b1r, w2m, b2r)


def reference_jax(x_nhwc, w1_hwio, b1, w2_hwio, b2):
    """Pure-JAX reference with the same bf16-operand / f32-accumulate numerics."""
    lrelu = lambda v: jnp.where(v >= 0, v, 0.1 * v)

    def conv(a, w):
        return jax.lax.conv_general_dilated(
            a.astype(jnp.bfloat16), w.astype(jnp.bfloat16),
            window_strides=(1, 1), padding=((1, 1), (1, 1)),
            dimension_numbers=('NHWC', 'HWIO', 'NHWC'),
            preferred_element_type=jnp.float32)

    h = conv(lrelu(x_nhwc), w1_hwio) + b1
    y = conv(lrelu(h), w2_hwio) + b2
    return y + x_nhwc


if __name__ == "__main__":
    # Small shapes consistent with RCAB: hidden channels are fixed to 64 by the
    # module; the residual requires in_channels == out_channels.
    B, H, W, C = 2, 16, 16, 64
    CMID = 64

    key = jax.random.PRNGKey(0)
    kx, k1, kb1, k2, kb2 = jax.random.split(key, 5)

    # NHWC end-to-end (TPU native).
    x = jax.random.normal(kx, (B, H, W, C), jnp.float32)
    w1 = 0.1 * jax.random.normal(k1, (3, 3, C, CMID), jnp.float32)   # HWIO
    b1 = 0.1 * jax.random.normal(kb1, (CMID,), jnp.float32)
    w2 = 0.1 * jax.random.normal(k2, (3, 3, CMID, C), jnp.float32)   # HWIO
    b2 = 0.1 * jax.random.normal(kb2, (C,), jnp.float32)

    out = rcab_pallas(x, w1, b1, w2, b2)
    out = jax.block_until_ready(out)

    ref = reference_jax(x, w1, b1, w2, b2)
    assert out.shape == (B, H, W, C)
    # bf16 MXU operands -> compare against a bf16-operand reference with a
    # correspondingly relaxed tolerance.
    assert jnp.allclose(out, ref, atol=1e-2, rtol=1e-2), (
        f"mismatch vs reference: max abs err = {jnp.max(jnp.abs(out - ref))}")

    print("KERNEL_OK")
</pallas_src>

<mosaic_0001>
module attributes {stable_mosaic.version = 11 : i64} {
  func.func @_rcab_kernel(%arg0: i32, %arg1: memref<1x16x16x64xf32, #tpu.memory_space<vmem>>, %arg2: memref<576x64xbf16, #tpu.memory_space<vmem>>, %arg3: memref<1x64xf32, #tpu.memory_space<vmem>>, %arg4: memref<576x64xbf16, #tpu.memory_space<vmem>>, %arg5: memref<1x64xf32, #tpu.memory_space<vmem>>, %arg6: memref<1x16x16x64xf32, #tpu.memory_space<vmem>>) attributes {dimension_semantics = [#tpu.dimension_semantics<parallel>], iteration_bounds = array<i64: 2>, scalar_prefetch = 0 : i64, scratch_operands = 0 : i64, tpu.core_type = #tpu.core_type<tc>, window_params = [{transform_indices = @transform_0, window_bounds = array<i64: 1, 16, 16, 64>}, {pipeline_mode = #tpu.pipeline_mode<synchronous>, transform_indices = @transform_1, window_bounds = array<i64: 576, 64>}, {pipeline_mode = #tpu.pipeline_mode<synchronous>, transform_indices = @transform_2, window_bounds = array<i64: 1, 64>}, {pipeline_mode = #tpu.pipeline_mode<synchronous>, transform_indices = @transform_3, window_bounds = array<i64: 576, 64>}, {pipeline_mode = #tpu.pipeline_mode<synchronous>, transform_indices = @transform_4, window_bounds = array<i64: 1, 64>}, {transform_indices = @transform_5, window_bounds = array<i64: 1, 16, 16, 64>}]} {
    %c0 = arith.constant 0 : index
    %c0_0 = arith.constant 0 : index
    %c0_1 = arith.constant 0 : index
    %c0_2 = arith.constant 0 : index
    %0 = vector.load %arg1[%c0, %c0_0, %c0_1, %c0_2] : memref<1x16x16x64xf32, #tpu.memory_space<vmem>>, vector<1x16x16x64xf32>
    %1 = vector.shape_cast %0 : vector<1x16x16x64xf32> to vector<16x16x64xf32>
    %cst = arith.constant 1.000000e-01 : f32
    %2 = vector.broadcast %cst : f32 to vector<16x16x64xf32>
    %3 = arith.mulf %2, %1 : vector<16x16x64xf32>
    %4 = arith.maximumf %1, %3 : vector<16x16x64xf32>
    %5 = arith.truncf %4 : vector<16x16x64xf32> to vector<16x16x64xbf16>
    %cst_3 = arith.constant 0.000000e+00 : bf16
    %6 = vector.broadcast %cst_3 : bf16 to vector<16x1x64xbf16>
    %7 = tpu.concatenate %6, %5, %6 in 1 : vector<16x1x64xbf16>, vector<16x16x64xbf16>, vector<16x1x64xbf16> -> vector<16x18x64xbf16>
    %cst_4 = arith.constant 0.000000e+00 : bf16
    %8 = vector.broadcast %cst_4 : bf16 to vector<1x18x64xbf16>
    %9 = tpu.concatenate %8, %7, %8 in 0 : vector<1x18x64xbf16>, vector<16x18x64xbf16>, vector<1x18x64xbf16> -> vector<18x18x64xbf16>
    %10 = vector.extract_strided_slice %9 {offsets = [0, 0, 0], sizes = [18, 16, 64], strides = [1, 1, 1]} : vector<18x18x64xbf16> to vector<18x16x64xbf16>
    %11 = vector.extract_strided_slice %9 {offsets = [0, 1, 0], sizes = [18, 16, 64], strides = [1, 1, 1]} : vector<18x18x64xbf16> to vector<18x16x64xbf16>
    %12 = vector.extract_strided_slice %9 {offsets = [0, 2, 0], sizes = [18, 16, 64], strides = [1, 1, 1]} : vector<18x18x64xbf16> to vector<18x16x64xbf16>
    %13 = tpu.concatenate %10, %11, %12 in 2 : vector<18x16x64xbf16>, vector<18x16x64xbf16>, vector<18x16x64xbf16> -> vector<18x16x192xbf16>
    %14 = vector.extract_strided_slice %13 {offsets = [0, 0, 0], sizes = [16, 16, 192], strides = [1, 1, 1]} : vector<18x16x192xbf16> to vector<16x16x192xbf16>
    %15 = vector.shape_cast %14 : vector<16x16x192xbf16> to vector<256x192xbf16>
    %16 = vector.extract_strided_slice %13 {offsets = [1, 0, 0], sizes = [16, 16, 192], strides = [1, 1, 1]} : vector<18x16x192xbf16> to vector<16x16x192xbf16>
    %17 = vector.shape_cast %16 : vector<16x16x192xbf16> to vector<256x192xbf16>
    %18 = vector.extract_strided_slice %13 {offsets = [2, 0, 0], sizes = [16, 16, 192], strides = [1, 1, 1]} : vector<18x16x192xbf16> to vector<16x16x192xbf16>
    %19 = vector.shape_cast %18 : vector<16x16x192xbf16> to vector<256x192xbf16>
    %20 = tpu.concatenate %15, %17, %19 in 1 : vector<256x192xbf16>, vector<256x192xbf16>, vector<256x192xbf16> -> vector<256x576xbf16>
    %c0_5 = arith.constant 0 : index
    %c0_6 = arith.constant 0 : index
    %21 = vector.load %arg2[%c0_5, %c0_6] : memref<576x64xbf16, #tpu.memory_space<vmem>>, vector<576x64xbf16>
    %cst_7 = arith.constant dense<0.000000e+00> : vector<256x64xf32>
    %22 = tpu.matmul %20, %21, %cst_7 {dimension_numbers = #tpu.dot_dimension_numbers<[1], [0], [0], [1], [0, 0, 1, 1], [], []>} : vector<256x576xbf16>, vector<576x64xbf16>, vector<256x64xf32> -> vector<256x64xf32>
    %c0_8 = arith.constant 0 : index
    %c0_9 = arith.constant 0 : index
    %23 = vector.load %arg3[%c0_8, %c0_9] : memref<1x64xf32, #tpu.memory_space<vmem>>, vector<1x64xf32>
    %24 = vector.broadcast %23 : vector<1x64xf32> to vector<256x64xf32>
    %25 = arith.addf %22, %24 : vector<256x64xf32>
    %cst_10 = arith.constant 1.000000e-01 : f32
    %26 = vector.broadcast %cst_10 : f32 to vector<256x64xf32>
    %27 = arith.mulf %26, %25 : vector<256x64xf32>
    %28 = arith.maximumf %25, %27 : vector<256x64xf32>
    %29 = arith.truncf %28 : vector<256x64xf32> to vector<256x64xbf16>
    %30 = vector.shape_cast %29 : vector<256x64xbf16> to vector<16x16x64xbf16>
    %cst_11 = arith.constant 0.000000e+00 : bf16
    %31 = vector.broadcast %cst_11 : bf16 to vector<16x1x64xbf16>
    %32 = tpu.concatenate %31, %30, %31 in 1 : vector<16x1x64xbf16>, vector<16x16x64xbf16>, vector<16x1x64xbf16> -> vector<16x18x64xbf16>
    %cst_12 = arith.constant 0.000000e+00 : bf16
    %33 = vector.broadcast %cst_12 : bf16 to vector<1x18x64xbf16>
    %34 = tpu.concatenate %33, %32, %33 in 0 : vector<1x18x64xbf16>, vector<16x18x64xbf16>, vector<1x18x64xbf16> -> vector<18x18x64xbf16>
    %35 = vector.extract_strided_slice %34 {offsets = [0, 0, 0], sizes = [18, 16, 64], strides = [1, 1, 1]} : vector<18x18x64xbf16> to vector<18x16x64xbf16>
    %36 = vector.extract_strided_slice %34 {offsets = [0, 1, 0], sizes = [18, 16, 64], strides = [1, 1, 1]} : vector<18x18x64xbf16> to vector<18x16x64xbf16>
    %37 = vector.extract_strided_slice %34 {offsets = [0, 2, 0], sizes = [18, 16, 64], strides = [1, 1, 1]} : vector<18x18x64xbf16> to vector<18x16x64xbf16>
    %38 = tpu.concatenate %35, %36, %37 in 2 : vector<18x16x64xbf16>, vector<18x16x64xbf16>, vector<18x16x64xbf16> -> vector<18x16x192xbf16>
    %39 = vector.extract_strided_slice %38 {offsets = [0, 0, 0], sizes = [16, 16, 192], strides = [1, 1, 1]} : vector<18x16x192xbf16> to vector<16x16x192xbf16>
    %40 = vector.shape_cast %39 : vector<16x16x192xbf16> to vector<256x192xbf16>
    %41 = vector.extract_strided_slice %38 {offsets = [1, 0, 0], sizes = [16, 16, 192], strides = [1, 1, 1]} : vector<18x16x192xbf16> to vector<16x16x192xbf16>
    %42 = vector.shape_cast %41 : vector<16x16x192xbf16> to vector<256x192xbf16>
    %43 = vector.extract_strided_slice %38 {offsets = [2, 0, 0], sizes = [16, 16, 192], strides = [1, 1, 1]} : vector<18x16x192xbf16> to vector<16x16x192xbf16>
    %44 = vector.shape_cast %43 : vector<16x16x192xbf16> to vector<256x192xbf16>
    %45 = tpu.concatenate %40, %42, %44 in 1 : vector<256x192xbf16>, vector<256x192xbf16>, vector<256x192xbf16> -> vector<256x576xbf16>
    %c0_13 = arith.constant 0 : index
    %c0_14 = arith.constant 0 : index
    %46 = vector.load %arg4[%c0_13, %c0_14] : memref<576x64xbf16, #tpu.memory_space<vmem>>, vector<576x64xbf16>
    %cst_15 = arith.constant dense<0.000000e+00> : vector<256x64xf32>
    %47 = tpu.matmul %45, %46, %cst_15 {dimension_numbers = #tpu.dot_dimension_numbers<[1], [0], [0], [1], [0, 0, 1, 1], [], []>} : vector<256x576xbf16>, vector<576x64xbf16>, vector<256x64xf32> -> vector<256x64xf32>
    %c0_16 = arith.constant 0 : index
    %c0_17 = arith.constant 0 : index
    %48 = vector.load %arg5[%c0_16, %c0_17] : memref<1x64xf32, #tpu.memory_space<vmem>>, vector<1x64xf32>
    %49 = vector.broadcast %48 : vector<1x64xf32> to vector<256x64xf32>
    %50 = arith.addf %47, %49 : vector<256x64xf32>
    %51 = vector.shape_cast %50 : vector<256x64xf32> to vector<16x16x64xf32>
    %52 = arith.addf %51, %1 : vector<16x16x64xf32>
    %c0_18 = arith.constant 0 : index
    %c0_19 = arith.constant 0 : index
    %c0_20 = arith.constant 0 : index
    %c0_21 = arith.constant 0 : index
    %53 = vector.load %arg6[%c0_18, %c0_19, %c0_20, %c0_21] : memref<1x16x16x64xf32, #tpu.memory_space<vmem>>, vector<1x16x16x64xf32>
    %54 = vector.shape_cast %53 : vector<1x16x16x64xf32> to vector<16x16x64xf32>
    %55 = vector.shape_cast %52 : vector<16x16x64xf32> to vector<1x16x16x64xf32>
    tpu.vector_store %arg6[%c0_18, %c0_19, %c0_20, %c0_21], %55 {strides = array<i32>} : memref<1x16x16x64xf32, #tpu.memory_space<vmem>>, vector<1x16x16x64xf32>,
    return
  }
  func.func @transform_0(%arg0: i32) -> (i32, i32, i32, i32) {
    %c0_i32 = arith.constant 0 : i32
    %c0_i32_0 = arith.constant 0 : i32
    %c0_i32_1 = arith.constant 0 : i32
    %c0_i32_2 = arith.constant 0 : i32
    return %arg0, %c0_i32, %c0_i32_0, %c0_i32_1 : i32, i32, i32, i32
  }
  func.func @transform_1(%arg0: i32) -> (i32, i32) {
    %c0_i32 = arith.constant 0 : i32
    %c0_i32_0 = arith.constant 0 : i32
    %c0_i32_1 = arith.constant 0 : i32
    return %c0_i32, %c0_i32_0 : i32, i32
  }
  func.func @transform_2(%arg0: i32) -> (i32, i32) {
    %c0_i32 = arith.constant 0 : i32
    %c0_i32_0 = arith.constant 0 : i32
    %c0_i32_1 = arith.constant 0 : i32
    return %c0_i32, %c0_i32_0 : i32, i32
  }
  func.func @transform_3(%arg0: i32) -> (i32, i32) {
    %c0_i32 = arith.constant 0 : i32
    %c0_i32_0 = arith.constant 0 : i32
    %c0_i32_1 = arith.constant 0 : i32
    return %c0_i32, %c0_i32_0 : i32, i32
  }
  func.func @transform_4(%arg0: i32) -> (i32, i32) {
    %c0_i32 = arith.constant 0 : i32
    %c0_i32_0 = arith.constant 0 : i32
    %c0_i32_1 = arith.constant 0 : i32
    return %c0_i32, %c0_i32_0 : i32, i32
  }
  func.func @transform_5(%arg0: i32) -> (i32, i32, i32, i32) {
    %c0_i32 = arith.constant 0 : i32
    %c0_i32_0 = arith.constant 0 : i32
    %c0_i32_1 = arith.constant 0 : i32
    %c0_i32_2 = arith.constant 0 : i32
    return %arg0, %c0_i32, %c0_i32_0, %c0_i32_1 : i32, i32, i32, i32
  }
}

</mosaic_0001>

<bundles_post_ra>
// kernel: tpu_custom_call.1
= control target key start
LH: loop header
LB: loop body
LE: loop exit
PB: predicated region body
PF: predicated region fallthrough
CT: control target
= control target key end

     0   :  { %10 = vsyncpa [#allocation3], 0  ;;  %s6640_s0 = inlined_call_operand.vmem [shape: f32[2,16,16,64], index: 0, kind: input, shape index: {}]   ;;  %s6641_s1 = inlined_call_operand.vmem [shape: bf16[576,64], index: 1, kind: input, shape index: {}]   ;;  %s6642_s2 = inlined_call_operand.vmem [shape: f32[1,64], index: 2, kind: input, shape index: {}]   ;;  %s6643_s3 = inlined_call_operand.vmem [shape: bf16[576,64], index: 3, kind: input, shape index: {}]   ;;  %s6644_s4 = inlined_call_operand.vmem [shape: f32[1,64], index: 4, kind: input, shape index: {}]   ;;  %s6645_s5 = inlined_call_operand.hbm [shape: f32[2,16,16,64], index: 5, kind: output, shape index: {}]  }
   0x1   :  { %12 = vsyncpa [#allocation3 + $0x1], 0  ;;  %s4548_s18 = smov 0   ;;  %s4550_s19 = smov 0  }
   0x2   :  { %s4552_s20 = smov 0   ;;  %s4554_s21 = smov 0  }
   0x3 LB: > { %s4569_s22 = sadd.s32 4294967295, %s4511_s21   ;;  %s3606_s23 = sadd.s32 4294967294, %s4511_s21   ;;  %s4511_s21 = sphi %s4554_s21, %s6673_s21   ;;  %s4507_s20 = sphi %s4552_s20, %s6672_s20   ;;  %s4503_s19 = sphi %s4550_s19, %s6671_s19   ;;  %s4499_s18 = sphi %s4548_s18, %s6670_s18  }
   0x4   : > { %s4573_s24 = sadd.s32 1, %s4511_s21   ;;  %s135_s25 = sadd.s32 1, %s4507_s20 }
   0x5   : > { %s132_s26 = ssub.s32 %s4511_s21, %s4573_s24  ;;  %p145_p0 = scmp.ne.s32.totalorder %s4507_s20, %s4503_s19 }
   0x6   : > { %p133_p1 = scmp.eq.s32.totalorder %s132_s26, 0  ;;  %p146_p2 = scmp.eq.s32.totalorder %s4569_s22, 1 }
   0x7   : > { %p151_p3 = scmp.ne.s32.totalorder %s4503_s19, %s4499_s18  ;;  %p152_p4 = scmp.eq.s32.totalorder %s3606_s23, 1 }
   0x8   : > { %s4584_s27 = scalar_select %p133_p1, %s4507_s20, %s135_s25  }
   0x9   : > { %p4586_p5 = por %p146_p2, %p145_p0  ;;  %p4590_p6 = por %p152_p4, %p151_p3 }
   0xa   : > { %p3609_p7 = scmp.ge.s32.totalorder %s4511_s21, 1  ;;  %p190_p8 = scmp.lt.s32.totalorder %s4511_s21, 3 }
   0xc   : > { %p191_p9 = pnand %p3609_p7, %p190_p8 }
   0xe   : > { %194 = sbr.rel (%p191_p9) target bundleno = 1364 (0x554), region = 40 }
  0x15   : > { %p218_p10 = scmp.lt.s32.totalorder %s4569_s22, 1  ;;  %vm480_vm0 = vcmask 1040384   ;;  %vm481_vm1 = vsmask.f32 256  ;;  %vm515_vm3 = vsmask.f32 7424 }
  0x16   : > { %vm4621_vm2 = vmand %vm480_vm0, %vm481_vm1  ;;  %s4513_s10 = smov 64   ;;  %vm834_vm4 = vcmask 523264   ;;  %vm783_vm5 = vcmask 1046528   ;;  %v4395_v43 = vld [vmem:[%s6643_s3 + $0x78] sm:$0xff]   ;;  %s215_s23 = sand.u32 1, %s4503_s19  }
  0x17   : > { %s219_s30 = scalar_select %p218_p10, %s4569_s22, 1  ;;  %vm4992_vm6 = vmneg %vm834_vm4 }
  0x18   : > { %s3610_s25 = sshll.u32 %s215_s23, 8  ;;  %s6599_s11 = scalar_lea.sflag [#allocation3], %s215_s23 }
  0x19   : > { %s3732_s6 = sshll.u32 %s219_s30, 8  ;;  %s6436_s26 = scalar_lea.vmem [#allocation2], %s3610_s25 }
  0x1a   : > { %s4601_s9 = scalar_lea.vmem %s6640_s0, %s3732_s6  ;;  %s3733_s30 = sshll.u32 %s4569_s22, 12 }
  0x1b   : > { %v224_v0 = vld [vmem:[%s4601_s9] sm:$0xff]  ;;  %v225_v1 = vld [vmem:[%s4601_s9 + $0x8] sm:$0xff]  ;;  %v226_v2 = vld [vmem:[%s4601_s9 + $0x10] sm:$0xff]  ;;  %s3544_s6 = sshll.u32 %s6436_s26, 4  ;;  %s6586_s8 = scalar_lea.hbm %s6645_s5, %s3733_s30  ;;  %s6588_s6 = int_to_ptr.vmem [resolvable:$true] %s3544_s6 }
  0x1c   : > { %v256_v3 = vmul.f32 0.1, %v224_v0  ;;  %v257_v4 = vmul.f32 0.1, %v225_v1  ;;  %v227_v5 = vld [vmem:[%s4601_s9 + $0x18] sm:$0xff]  ;;  %v228_v6 = vld [vmem:[%s4601_s9 + $0x20] sm:$0xff] }
  0x1d   : > { %v258_v7 = vmul.f32 0.1, %v226_v2  ;;  %v259_v8 = vmul.f32 0.1, %v227_v5  ;;  %v229_v9 = vld [vmem:[%s4601_s9 + $0x28] sm:$0xff]  ;;  %v230_v10 = vld [vmem:[%s4601_s9 + $0x30] sm:$0xff] }
  0x1e   : > { %v288_v11 = vmax.f32 %v224_v0, %v256_v3  ;;  %v289_v12 = vmax.f32 %v225_v1, %v257_v4  ;;  %v260_v13 = vmul.f32 0.1, %v228_v6  ;;  %v261_v14 = vmul.f32 0.1, %v229_v9  ;;  %v231_v15 = vld [vmem:[%s4601_s9 + $0x38] sm:$0xff]  ;;  %v232_v16 = vld [vmem:[%s4601_s9 + $0x40] sm:$0xff] }
  0x1f   : > { %v290_v17 = vmax.f32 %v226_v2, %v258_v7  ;;  %v291_v18 = vmax.f32 %v227_v5, %v259_v8  ;;  %v262_v19 = vmul.f32 0.1, %v230_v10  ;;  %v263_v20 = vmul.f32 0.1, %v231_v15  ;;  %v233_v21 = vld [vmem:[%s4601_s9 + $0x48] sm:$0xff]  ;;  %v4614_v34 = vld [vmem:[%s4601_s9 + $0x50] sm:$0xff] }
  0x20   : > { %v320_v22 = vpack.c.bf16 %v289_v12, %v288_v11  ;;  %v292_v23 = vmax.f32 %v228_v6, %v260_v13  ;;  %v293_v24 = vmax.f32 %v229_v9, %v261_v14  ;;  %v264_v25 = vmul.f32 0.1, %v232_v16  ;;  %v4617_v42 = vld [vmem:[%s4601_s9 + $0x58] sm:$0xff]  ;;  %s4449_s12 = scalar_lea.vmem %s6588_s6, 4096 }
  0x21   : > { %v321_v26 = vpack.c.bf16 %v291_v18, %v290_v17  ;;  %v294_v27 = vmax.f32 %v230_v10, %v262_v19  ;;  %v295_v28 = vmax.f32 %v231_v15, %v263_v20  ;;  %v265_v29 = vmul.f32 0.1, %v233_v21  ;;  %v236_v15 = vld [vmem:[%s4601_s9 + $0x60] sm:$0xff]  ;;  %p4450_p11 = scmp.ne.s32.totalorder %s6588_s6, %s4449_s12 }
  0x22   : > { %v337_v30 = vshrl.u32 %v320_v22, 16  ;;  %v340_v31 = vshll.u32 %v320_v22, 16  ;;  %v322_v32 = vpack.c.bf16 %v293_v24, %v292_v23  ;;  %v296_v33 = vmax.f32 %v232_v16, %v264_v25  ;;  %v237_v24 = vld [vmem:[%s4601_s9 + $0x68] sm:$0xff]  ;;  %v238_v25 = vld [vmem:[%s4601_s9 + $0x70] sm:$0xff] }
  0x23   : > { %v344_v35 = vshrl.u32 %v321_v26, 16  ;;  %v347_v36 = vshll.u32 %v321_v26, 16  ;;  %v323_v37 = vpack.c.bf16 %v295_v28, %v294_v27  ;;  %v297_v38 = vmax.f32 %v233_v21, %v265_v29  ;;  %p4451_p12 = pnand %p4450_p11, %p4586_p5 }
  0x24   : > { %v339_v39 = vrot.slane %v337_v30, 7  ;;  %v351_v40 = vshrl.u32 %v322_v32, 16  ;;  %v354_v41 = vshll.u32 %v322_v32, 16  ;;  %v4626_v46 = vmul.f32 0.1, %v4614_v34 }
  0x25   : > { %v346_v44 = vrot.slane %v344_v35, 7  ;;  %v358_v45 = vshrl.u32 %v323_v37, 16  ;;  %v324_v50 = vpack.c.bf16 %v297_v38, %v296_v33  ;;  %v267_v54 = vmul.f32 0.1, %v4617_v42  ;;  %p4452_p13 = pneg %p4451_p12 }
  0x26   : > { %v342_v47 = vor.u32 %v340_v31, %v339_v39  ;;  %v4630_v48 = vsel %vm4621_vm2, %v339_v39, 0  ;;  %v353_v49 = vrot.slane %v351_v40, 7  ;;  %v361_v62 = vshll.u32 %v323_v37, 16 }
  0x27   : > { %v532_v51 = vshll.u32 %v4630_v48, 16  ;;  %v349_v52 = vor.u32 %v347_v36, %v346_v44  ;;  %v4635_v53 = vsel %vm4621_vm2, %v346_v44, 0  ;;  %v360_v9 = vrot.slane %v358_v45, 7 }
  0x28   : > { %v4640_v55 = vsel %vm4621_vm2, 0, %v342_v47  ;;  %v544_v56 = vshll.u32 %v4635_v53, 16  ;;  %v356_v57 = vor.u32 %v354_v41, %v353_v49  ;;  %v4645_v58 = vsel %vm4621_vm2, %v353_v49, 0 }
  0x29   : > { %v525_v59 = vshrl.u32 %v4640_v55, 16  ;;  %v527_v60 = vshll.u32 %v4640_v55, 16  ;;  %v4651_v61 = vsel %vm4621_vm2, 0, %v349_v52  ;;  %v534_v63 = vrot.slane %v532_v51, 1 }
  0x2a   : > { %v537_v0 = vshrl.u32 %v4651_v61, 16  ;;  %v539_v1 = vshll.u32 %v4651_v61, 16  ;;  %v4657_v2 = vsel %vm4621_vm2, 0, %v356_v57  ;;  %v556_v6 = vshll.u32 %v4645_v58, 16 }
  0x2b   : > { %v529_v3 = vrot.slane %v527_v60, 1  ;;  %v549_v4 = vshrl.u32 %v4657_v2, 16  ;;  %v551_v5 = vshll.u32 %v4657_v2, 16  ;;  %v546_v8 = vrot.slane %v544_v56, 1 }
  0x2c   : > { %v541_v7 = vrot.slane %v539_v1, 1  ;;  %v365_v10 = vshrl.u32 %v324_v50, 16  ;;  %v558_v13 = vrot.slane %v556_v6, 1  ;;  %v368_v14 = vshll.u32 %v324_v50, 16 }
  0x2d   : > { %v530_v11 = vor.u32 %v529_v3, %v525_v59  ;;  %v553_v12 = vrot.slane %v551_v5, 1  ;;  %v363_v17 = vor.u32 %v361_v62, %v360_v9  ;;  %v4665_v18 = vsel %vm4621_vm2, %v360_v9, 0 }
  0x2e   : > { %v542_v16 = vor.u32 %v541_v7, %v537_v0  ;;  %v367_v19 = vrot.slane %v365_v10, 7  ;;  %v568_v22 = vshll.u32 %v4665_v18, 16  ;;  %v298_v23 = vmax.f32 %v4614_v34, %v4626_v46  ;;  %v239_v34 = vld [vmem:[%s4601_s9 + $0x78] sm:$0xff] }
  0x2f   : > { %v535_v20 = vsel %vm515_vm3, %v530_v11, %v534_v63  ;;  %v554_v21 = vor.u32 %v553_v12, %v549_v4  ;;  %v4677_v27 = vsel %vm4621_vm2, 0, %v363_v17  ;;  %v299_v37 = vmax.f32 %v4617_v42, %v267_v54 }
  0x30   : > { %718 = vrot.lane.b32.xlu0 %v535_v20, %s4513_s10  ;;  %v547_v26 = vsel %vm515_vm3, %v542_v16, %v546_v8  ;;  %v370_v28 = vor.u32 %v368_v14, %v367_v19  ;;  %v4681_v29 = vsel %vm4621_vm2, %v367_v19, 0  ;;  %v561_v31 = vshrl.u32 %v4677_v27, 16 }
  0x31   : > { %v559_v30 = vsel %vm515_vm3, %v554_v21, %v558_v13  ;;  %v563_v32 = vshll.u32 %v4677_v27, 16  ;;  %v570_v33 = vrot.slane %v568_v22, 1  ;;  %v580_v36 = vshll.u32 %v4681_v29, 16 }
  0x32   : > { %722 = vrot.lane.b32.xlu1 %v559_v30, %s4513_s10  ;;  %v4690_v35 = vsel %vm4621_vm2, 0, %v370_v28  ;;  %v268_v38 = vmul.f32 0.1, %v236_v15  ;;  %v269_v44 = vmul.f32 0.1, %v237_v24  ;;  %v325_v46 = vpack.c.bf16 %v299_v37, %v298_v23 }
  0x33   : > { %v565_v39 = vrot.slane %v563_v32, 1  ;;  %v573_v40 = vshrl.u32 %v4690_v35, 16  ;;  %v575_v41 = vshll.u32 %v4690_v35, 16  ;;  %v582_v45 = vrot.slane %v580_v36, 1 }
  0x34   : > { %720 = vrot.lane.b32.xlu0 %v547_v26, %s4513_s10  ;;  %v300_v47 = vmax.f32 %v236_v15, %v268_v38  ;;  %v270_v49 = vmul.f32 0.1, %v238_v25  ;;  %v301_v52 = vmax.f32 %v237_v24, %v269_v44  ;;  %v271_v56 = vmul.f32 0.1, %v239_v34 }
  0x35   : > { %v566_v50 = vor.u32 %v565_v39, %v561_v31  ;;  %v577_v51 = vrot.slane %v575_v41, 1  ;;  %v372_v57 = vshrl.u32 %v325_v46, 16  ;;  %v375_v59 = vshll.u32 %v325_v46, 16  ;;  %v4345_v39 = vld [vmem:[%s6641_s1 + $0x40] sm:$0xff]   ;;  %v4347_v41 = vld [vmem:[%s6641_s1 + $0x48] sm:$0xff]  }
  0x36   : > { %v302_v42 = vmax.f32 %v238_v25, %v270_v49  ;;  %v326_v62 = vpack.c.bf16 %v301_v52, %v300_v47  ;;  %v303_v63 = vmax.f32 %v239_v34, %v271_v56  ;;  %3734 = vmatprep.subr.bf16.mxu0 %v4345_v39  ;;  %v4348_v49 = vld [vmem:[%s6641_s1 + $0x8] sm:$0xff]   ;;  %v4514_v52 = vmov 0  }
  0x37   : > { %v571_v54 = vsel %vm515_vm3, %v566_v50, %v570_v33  ;;  %v578_v60 = vor.u32 %v577_v51, %v573_v40  ;;  %v374_v0 = vrot.slane %v372_v57, 7  ;;  %v4346_v40 = vld [vmem:[%s6641_s1] sm:$0xff]   ;;  %v4349_v50 = vld [vmem:[%s6641_s1 + $0x50] sm:$0xff]   ;;  %v4755_v56 = vrot.slane %v4514_v52, 1 }
  0x38   : > { %724 = vrot.lane.b32.xlu1 %v571_v54, %s4513_s10  ;;  %v379_v3 = vshrl.u32 %v326_v62, 16  ;;  %v382_v4 = vshll.u32 %v326_v62, 16  ;;  %v327_v5 = vpack.c.bf16 %v303_v63, %v302_v42  ;;  %3735 = vmatpush3.bf16.msra.mxu0 %v4346_v40  ;;  %v4350_v57 = vld [vmem:[%s6641_s1 + $0x10] sm:$0xff]   ;;  %v4352_v42 = vld [vmem:[%s6641_s1 + $0x18] sm:$0xff]   ;;  %v4353_v54 = vld [vmem:[%s6641_s1 + $0x60] sm:$0xff]  }
  0x39   : > { %v583_v1 = vsel %vm515_vm3, %v578_v60, %v582_v45  ;;  %v377_v6 = vor.u32 %v375_v59, %v374_v0  ;;  %v4703_v7 = vsel %vm4621_vm2, %v374_v0, 0  ;;  %3736 = vmatprep.subr.bf16.mxu0 %v4347_v41  ;;  %6658 = vst [vmem:[#allocation5_spill] sm:$0xff] %v4755_v56  ;;  %v4351_v59 = vld [vmem:[%s6641_s1 + $0x58] sm:$0xff]   ;;  %v4354_v60 = vld [vmem:[%s6641_s1 + $0x20] sm:$0xff]   ;;  %v4355_v62 = vld [vmem:[%s6641_s1 + $0x68] sm:$0xff]  }
  0x3a   : > { %726 = vrot.lane.b32.xlu0 %v583_v1, %s4513_s10  ;;  %v592_v8 = vshll.u32 %v4703_v7, 16  ;;  %v381_v9 = vrot.slane %v379_v3, 7  ;;  %v386_v10 = vshrl.u32 %v327_v5, 16  ;;  %v389_v12 = vshll.u32 %v327_v5, 16  ;;  %v4356_v63 = vld [vmem:[%s6641_s1 + $0x28] sm:$0xff]   ;;  %v4357_v0 = vld [vmem:[%s6641_s1 + $0x70] sm:$0xff]  }
  0x3b   : > { %v4708_v11 = vsel %vm4621_vm2, 0, %v377_v6  ;;  %v4358_v1 = vld [vmem:[%s6641_s1 + $0x30] sm:$0xff]   ;;  %v4359_v3 = vld [vmem:[%s6641_s1 + $0x78] sm:$0xff]   ;;  %v240_v5 = vld [vmem:[%s4601_s9 + $0x80] sm:$0xff] }
  0x3c   : > { %v585_v13 = vshrl.u32 %v4708_v11, 16  ;;  %v587_v14 = vshll.u32 %v4708_v11, 16  ;;  %v384_v15 = vor.u32 %v382_v4, %v381_v9  ;;  %v4714_v16 = vsel %vm4621_vm2, %v381_v9, 0  ;;  %3737 = vmatpush3.bf16.msra.mxu0 %v4348_v49  ;;  %v4360_v4 = vld [vmem:[%s6641_s1 + $0x38] sm:$0xff]   ;;  %v241_v6 = vld [vmem:[%s4601_s9 + $0x88] sm:$0xff]  ;;  %v248_v40 = vld [vmem:[%s4601_s9 + $0xc0] sm:$0xff] }
  0x3d   : > { %v388_v17 = vrot.slane %v386_v10, 7  ;;  %v594_v20 = vrot.slane %v592_v8, 1  ;;  %v604_v22 = vshll.u32 %v4714_v16, 16  ;;  %3738 = vmatprep.subr.bf16.mxu0 %v4349_v50  ;;  %v272_v8 = vmul.f32 0.1, %v240_v5  ;;  %v242_v10 = vld [vmem:[%s4601_s9 + $0x90] sm:$0xff] }
  0x3e   : > { %v589_v19 = vrot.slane %v587_v14, 1  ;;  %v4718_v21 = vsel %vm4621_vm2, 0, %v384_v15  ;;  %v273_v9 = vmul.f32 0.1, %v241_v6  ;;  %v274_v15 = vmul.f32 0.1, %v242_v10 }
  0x3f   : > { %v597_v23 = vshrl.u32 %v4718_v21, 16  ;;  %v599_v24 = vshll.u32 %v4718_v21, 16  ;;  %v391_v25 = vor.u32 %v389_v12, %v388_v17  ;;  %v4725_v26 = vsel %vm4621_vm2, %v388_v17, 0  ;;  %v243_v12 = vld [vmem:[%s4601_s9 + $0x98] sm:$0xff]  ;;  %v249_v41 = vld [vmem:[%s4601_s9 + $0xc8] sm:$0xff] }
  0x40   : > { %v590_v28 = vor.u32 %v589_v19, %v585_v13  ;;  %v616_v30 = vshll.u32 %v4725_v26, 16  ;;  %v606_v32 = vrot.slane %v604_v22, 1  ;;  %3739 = vmatpush3.bf16.msra.mxu0 %v4350_v57  ;;  %v304_v13 = vmax.f32 %v240_v5, %v272_v8  ;;  %v244_v19 = vld [vmem:[%s4601_s9 + $0xa0] sm:$0xff]  ;;  %v250_v57 = vld [vmem:[%s4601_s9 + $0xd0] sm:$0xff] }
  0x41   : > { %v601_v31 = vrot.slane %v599_v24, 1  ;;  %v4730_v33 = vsel %vm4621_vm2, 0, %v391_v25  ;;  %3740 = vmatprep.subr.bf16.mxu0 %v4351_v59  ;;  %v305_v14 = vmax.f32 %v241_v6, %v273_v9  ;;  %v275_v17 = vmul.f32 0.1, %v243_v12  ;;  %v251_v59 = vld [vmem:[%s4601_s9 + $0xd8] sm:$0xff]  ;;  %v252_v5 = vld [vmem:[%s4601_s9 + $0xe0] sm:$0xff] }
  0x42   : > { %v595_v34 = vsel %vm515_vm3, %v590_v28, %v594_v20  ;;  %v609_v36 = vshrl.u32 %v4730_v33, 16  ;;  %v611_v37 = vshll.u32 %v4730_v33, 16  ;;  %v618_v45 = vrot.slane %v616_v30, 1  ;;  %v245_v20 = vld [vmem:[%s4601_s9 + $0xa8] sm:$0xff]  ;;  %v246_v30 = vld [vmem:[%s4601_s9 + $0xb0] sm:$0xff] }
  0x43   : > { %728 = vrot.lane.b32.xlu1 %v595_v34, %s4513_s10  ;;  %v602_v38 = vor.u32 %v601_v31, %v597_v23  ;;  %v328_v22 = vpack.c.bf16 %v305_v14, %v304_v13  ;;  %v306_v23 = vmax.f32 %v242_v10, %v274_v15  ;;  %v307_v24 = vmax.f32 %v243_v12, %v275_v17  ;;  %v247_v31 = vld [vmem:[%s4601_s9 + $0xb8] sm:$0xff]  ;;  %v253_v6 = vld [vmem:[%s4601_s9 + $0xe8] sm:$0xff] }
  0x44   : > { %v613_v44 = vrot.slane %v611_v37, 1  ;;  %3741 = vmatpush3.bf16.msra.mxu0 %v4352_v42  ;;  %v276_v25 = vmul.f32 0.1, %v244_v19  ;;  %v277_v28 = vmul.f32 0.1, %v245_v20 }
  0x45   : > { %v607_v46 = vsel %vm515_vm3, %v602_v38, %v606_v32  ;;  %3742 = vmatprep.subr.bf16.mxu0 %v4353_v54  ;;  %v393_v32 = vshrl.u32 %v328_v22, 16  ;;  %v329_v34 = vpack.c.bf16 %v307_v24, %v306_v23  ;;  %v278_v38 = vmul.f32 0.1, %v246_v30  ;;  %v255_v23 = vld [vmem:[%s4601_s9 + $0xf8] sm:$0xff] }
  0x46   : > { %730 = vrot.lane.b32.xlu0 %v607_v46, %s4513_s10  ;;  %v614_v47 = vor.u32 %v613_v44, %v609_v36  ;;  %v308_v36 = vmax.f32 %v244_v19, %v276_v25  ;;  %v309_v37 = vmax.f32 %v245_v20, %v277_v28  ;;  %v279_v39 = vmul.f32 0.1, %v247_v31 }
  0x47   : > { %v395_v44 = vrot.slane %v393_v32, 7  ;;  %v400_v46 = vshrl.u32 %v329_v34, 16  ;;  %v310_v49 = vmax.f32 %v246_v30, %v278_v38  ;;  %v281_v52 = vmul.f32 0.1, %v249_v41 }
  0x48   : > { %v619_v51 = vsel %vm515_vm3, %v614_v47, %v618_v45  ;;  %3743 = vmatpush3.bf16.msra.mxu0 %v4354_v60  ;;  %v396_v45 = vshll.u32 %v328_v22, 16  ;;  %v330_v47 = vpack.c.bf16 %v309_v37, %v308_v36  ;;  %v311_v50 = vmax.f32 %v247_v31, %v279_v39  ;;  %v254_v22 = vld [vmem:[%s4601_s9 + $0xf0] sm:$0xff] }
  0x49   : > { %732 = vrot.lane.b32.xlu1 %v619_v51, %s4513_s10  ;;  %3744 = vmatprep.subr.bf16.mxu0 %v4355_v62  ;;  %v280_v51 = vmul.f32 0.1, %v248_v40  ;;  %v403_v42 = vshll.u32 %v329_v34, 16  ;;  %v402_v60 = vrot.slane %v400_v46, 7  ;;  %v284_v19 = vmul.f32 0.1, %v252_v5 }
  0x4a   : > { %v398_v54 = vor.u32 %v396_v45, %v395_v44  ;;  %v407_v62 = vshrl.u32 %v330_v47, 16  ;;  %v410_v12 = vshll.u32 %v330_v47, 16  ;;  %v285_v20 = vmul.f32 0.1, %v253_v6 }
  0x4b   : > { %v405_v9 = vor.u32 %v403_v42, %v402_v60  ;;  %v4814_v24 = vsel %vm4621_vm2, %v395_v44, 0  ;;  %v316_v37 = vmax.f32 %v252_v5, %v284_v19  ;;  %v286_v39 = vmul.f32 0.1, %v254_v22 }
  0x4c   : > { %3745 = vmatpush3.bf16.msra.mxu0 %v4356_v63  ;;  %v331_v63 = vpack.c.bf16 %v311_v50, %v310_v49  ;;  %v4808_v8 = vsel %vm4621_vm2, 0, %v398_v54  ;;  %v409_v10 = vrot.slane %v407_v62, 7  ;;  %v317_v38 = vmax.f32 %v253_v6, %v285_v20 }
  0x4d   : > { %716 = vrot.lane.b32.xlu1 %v4755_v56, %s4513_s10  ;;  %3746 = vmatprep.subr.bf16.mxu0 %v4357_v0  ;;  %v312_v0 = vmax.f32 %v248_v40, %v280_v51  ;;  %v623_v25 = vshll.u32 %v4808_v8, 16  ;;  %v4819_v28 = vsel %vm4621_vm2, 0, %v405_v9  ;;  %v287_v40 = vmul.f32 0.1, %v255_v23 }
  0x4e   : > { %v414_v13 = vshrl.u32 %v331_v63, 16  ;;  %v412_v30 = vor.u32 %v410_v12, %v409_v10  ;;  %v417_v32 = vshll.u32 %v331_v63, 16  ;;  %v621_v44 = vshrl.u32 %v4808_v8, 16 }
  0x4f   : > { %v625_v45 = vrot.slane %v623_v25, 1  ;;  %v4825_v46 = vsel %vm4621_vm2, %v402_v60, 0  ;;  %v635_v47 = vshll.u32 %v4819_v28, 16  ;;  %v318_v42 = vmax.f32 %v254_v22, %v286_v39 }
  0x50   : > { %3747 = vmatpush3.bf16.msra.mxu0 %v4358_v1  ;;  %v313_v1 = vmax.f32 %v249_v41, %v281_v52  ;;  %v416_v31 = vrot.slane %v414_v13, 7  ;;  %v628_v41 = vshll.u32 %v4814_v24, 16  ;;  %v4830_v49 = vsel %vm4621_vm2, 0, %v412_v30 }
  0x51   : > { %3748 = vmatprep.subr.bf16.mxu0 %v4359_v3  ;;  %v282_v3 = vmul.f32 0.1, %v250_v57  ;;  %v319_v54 = vmax.f32 %v255_v23, %v287_v40  ;;  %v640_v63 = vshll.u32 %v4825_v46, 16  ;;  %v633_v60 = vshrl.u32 %v4819_v28, 16 }
  0x52   : > { %v332_v14 = vpack.c.bf16 %v313_v1, %v312_v0  ;;  %v419_v50 = vor.u32 %v417_v32, %v416_v31  ;;  %v630_v62 = vrot.slane %v628_v41, 1  ;;  %v626_v0 = vor.u32 %v625_v45, %v621_v44 }
  0x53   : > { %v314_v15 = vmax.f32 %v250_v57, %v282_v3  ;;  %v4836_v1 = vsel %vm4621_vm2, %v409_v10, 0  ;;  %v647_v3 = vshll.u32 %v4830_v49, 16  ;;  %v645_v19 = vshrl.u32 %v4830_v49, 16 }
  0x54   : > { %3749 = vmatpush3.bf16.msra.mxu0 %v4360_v4  ;;  %v283_v4 = vmul.f32 0.1, %v251_v59  ;;  %v421_v34 = vshrl.u32 %v332_v14, 16  ;;  %v424_v51 = vshll.u32 %v332_v14, 16  ;;  %v4841_v5 = vsel %vm4621_vm2, 0, %v419_v50 }
  0x55   : > { %v652_v10 = vshll.u32 %v4836_v1, 16  ;;  %v649_v20 = vrot.slane %v647_v3, 1  ;;  %v4853_v22 = vsel %vm4621_vm2, %v416_v31, 0  ;;  %v659_v23 = vshll.u32 %v4841_v5, 16 }
  0x56   : > { %v315_v17 = vmax.f32 %v251_v59, %v283_v4  ;;  %v423_v57 = vrot.slane %v421_v34, 7  ;;  %v334_v59 = vpack.c.bf16 %v317_v38, %v316_v37  ;;  %v637_v4 = vrot.slane %v635_v47, 1 }
  0x57   : > { %v631_v25 = vsel %vm515_vm3, %v626_v0, %v630_v62  ;;  %v642_v32 = vrot.slane %v640_v63, 1  ;;  %v654_v44 = vrot.slane %v652_v10, 1  ;;  %v664_v45 = vshll.u32 %v4853_v22, 16 }
  0x58   : > { %v333_v36 = vpack.c.bf16 %v315_v17, %v314_v15  ;;  %v426_v13 = vor.u32 %v424_v51, %v423_v57  ;;  %v435_v14 = vshrl.u32 %v334_v59, 16  ;;  %v335_v15 = vpack.c.bf16 %v319_v54, %v318_v42 }
  0x59   : > { %v638_v30 = vor.u32 %v637_v4, %v633_v60  ;;  %v438_v40 = vshll.u32 %v334_v59, 16  ;;  %v650_v47 = vor.u32 %v649_v20, %v645_v19  ;;  %v657_v50 = vshrl.u32 %v4841_v5, 16 }
  0x5a   : > { %v428_v52 = vshrl.u32 %v333_v36, 16  ;;  %v431_v9 = vshll.u32 %v333_v36, 16  ;;  %v4859_v38 = vsel %vm4621_vm2, 0, %v426_v13  ;;  %v437_v39 = vrot.slane %v435_v14, 7 }
  0x5b   : > { %v442_v41 = vshrl.u32 %v335_v15, 16  ;;  %v661_v51 = vrot.slane %v659_v23, 1  ;;  %v643_v59 = vsel %vm515_vm3, %v638_v30, %v642_v32  ;;  %v671_v54 = vshll.u32 %v4859_v38, 16 }
  0x5c   : > { %v430_v6 = vrot.slane %v428_v52, 7  ;;  %v4872_v52 = vsel %vm4621_vm2, %v423_v57, 0  ;;  %v440_v0 = vor.u32 %v438_v40, %v437_v39  ;;  %v445_v3 = vshll.u32 %v335_v15, 16 }
  0x5d   : > { %v444_v60 = vrot.slane %v442_v41, 7  ;;  %v676_v57 = vshll.u32 %v4872_v52, 16  ;;  %v655_v4 = vsel %vm515_vm3, %v650_v47, %v654_v44  ;;  %v669_v14 = vshrl.u32 %v4859_v38, 16 }
  0x5e   : > { %v433_v34 = vor.u32 %v431_v9, %v430_v6  ;;  %v662_v9 = vor.u32 %v661_v51, %v657_v50  ;;  %v673_v10 = vrot.slane %v671_v54, 1  ;;  %v4894_v19 = vsel %vm4621_vm2, %v430_v6, 0 }
  0x5f   : > { %v4902_v20 = vsel %vm4621_vm2, 0, %v440_v0  ;;  %v678_v30 = vrot.slane %v676_v57, 1  ;;  %v688_v6 = vshll.u32 %v4894_v19, 16  ;;  %v4912_v40 = vsel %vm4621_vm2, %v437_v39, 0 }
  0x60   : > { %v4882_v62 = vsel %vm4621_vm2, 0, %v433_v34  ;;  %v695_v41 = vshll.u32 %v4902_v20, 16  ;;  %v700_v51 = vshll.u32 %v4912_v40, 16  ;;  %v4932_v0 = vsel %vm4621_vm2, %v444_v60, 0 }
  0x61   : > { %v683_v13 = vshll.u32 %v4882_v62, 16  ;;  %v681_v34 = vshrl.u32 %v4882_v62, 16  ;;  %v690_v50 = vrot.slane %v688_v6, 1 }
  0x62   : > { %v697_v54 = vrot.slane %v695_v41, 1  ;;  %v4363_v41 = vld [vmem:[%s6641_s1 + $0xc0] sm:$0xff]  }
  0x63   : > { %3846 = vmatprep.subr.bf16.mxu1 %v4363_v41  ;;  %v4366_v41 = vld [vmem:[%s6641_s1 + $0x110] sm:$0xff]  }
  0xa2   : > { %v719_v12 = vpop.permute.xlu0 %718 }
  0xa3   : > { %v4845_v17 = vsel %vm834_vm4, %v4640_v55, %v719_v12  ;;  %v666_v12 = vrot.slane %v664_v45, 1 }
  0xa4   : > { %902 = vrot.lane.b32.xlu0 %v4845_v17, %s4513_s10  ;;  %v723_v37 = vpop.permute.xlu1 %722 }
  0xa5   : > { %v4877_v42 = vsel %vm834_vm4, %v4657_v2, %v723_v37  ;;  %v667_v32 = vsel %vm515_vm3, %v662_v9, %v666_v12  ;;  %v674_v37 = vor.u32 %v673_v10, %v669_v14  ;;  %v702_v9 = vrot.slane %v700_v51, 1  ;;  %v4367_v51 = vld [vmem:[%s6641_s1 + $0x88] sm:$0xff]  }
  0xa6   : > { %v721_v36 = vpop.permute.xlu0 %720 }
  0xa7   : > { %v4863_v31 = vsel %vm834_vm4, %v4651_v61, %v721_v36  ;;  %v685_v36 = vrot.slane %v683_v13, 1  ;;  %v679_v39 = vsel %vm515_vm3, %v674_v37, %v678_v30  ;;  %v4361_v37 = vld [vmem:[%s6641_s1 + $0x100] sm:$0xff]  }
  0xa8   : > { %734 = vrot.lane.b32.xlu0 %v631_v25, %s4513_s10  ;;  %906 = vrot.lane.b32.xlu1 %v4863_v31, %s4513_s10  ;;  %v447_v25 = vor.u32 %v445_v3, %v444_v60  ;;  %v712_v60 = vshll.u32 %v4932_v0, 16 }
  0xa9   : > { %1584 = vmatprep.mubr.bf16.mxu1 %v4863_v31  ;;  %v686_v47 = vor.u32 %v685_v36, %v681_v34  ;;  %4222 = vmatprep.subr.bf16.mxu0 %v4361_v37 }
  0xaa   : > { %v725_v63 = vpop.permute.xlu1 %724  ;;  %v4921_v45 = vsel %vm4621_vm2, 0, %v447_v25  ;;  %v714_v34 = vrot.slane %v712_v60, 1  ;;  %v789_v60 = vrot.slane %v4651_v61, 1 }
  0xab   : > { %v4898_v15 = vsel %vm834_vm4, %v4677_v27, %v725_v63  ;;  %v707_v63 = vshll.u32 %v4921_v45, 16  ;;  %v705_v13 = vshrl.u32 %v4921_v45, 16 }
  0xac   : > { %736 = vrot.lane.b32.xlu0 %v643_v59, %s4513_s10  ;;  %910 = vrot.lane.b32.xlu1 %v4877_v42, %s4513_s10  ;;  %v727_v23 = vpop.permute.xlu0 %726  ;;  %v693_v59 = vshrl.u32 %v4902_v20, 16 }
  0xad   : > { %v4917_v44 = vsel %vm834_vm4, %v4690_v35, %v727_v23  ;;  %v709_v14 = vrot.slane %v707_v63, 1  ;;  %v786_v63 = vrot.slane %v4640_v55, 1  ;;  %v4362_v55 = vld [vmem:[%s6641_s1 + $0x108] sm:$0xff]  }
  0xae   : > { %v698_v12 = vor.u32 %v697_v54, %v693_v59  ;;  %v4369_v59 = vld [vmem:[%s6641_s1 + $0x90] sm:$0xff]   ;;  %v787_v54 = vrot.slane %v4630_v48, 1 }
  0xb0   : > { %738 = vrot.lane.b32.xlu0 %v655_v4, %s4513_s10  ;;  %914 = vrot.lane.b32.xlu1 %v4898_v15, %s4513_s10  ;;  %v691_v4 = vsel %vm515_vm3, %v686_v47, %v690_v50  ;;  %v703_v30 = vsel %vm515_vm3, %v698_v12, %v702_v9  ;;  %v4364_v47 = vld [vmem:[%s6641_s1 + $0x80] sm:$0xff]   ;;  %v4365_v50 = vld [vmem:[%s6641_s1 + $0xc8] sm:$0xff]   ;;  %v6660_v12 = vmov 0 }
  0xb1   : > { %3847 = vmatpush3.bf16.msra.mxu1 %v4364_v47  ;;  %v6661_v12 = vsel %vm4992_vm6, 4294967295, %v6660_v12 }
  0xb2   : > { %3848 = vmatprep.subr.bf16.mxu1 %v4365_v50  ;;  %6662 = vst [vmem:[#allocation7_spill] sm:$0xff] %v6661_v12 }
  0xb4   : > { %740 = vrot.lane.b32.xlu0 %v667_v32, %s4513_s10  ;;  %918 = vrot.lane.b32.xlu1 %v4917_v44, %s4513_s10  ;;  %v710_v32 = vor.u32 %v709_v14, %v705_v13  ;;  %v4371_v13 = vld [vmem:[%s6641_s1 + $0x98] sm:$0xff]   ;;  %v5006_v14 = vsel %vm783_vm5, %v786_v63, %v787_v54  ;;  %v793_v54 = vrot.slane %v4645_v58, 1  ;;  %v792_v63 = vrot.slane %v4657_v2, 1 }
  0xb5   : > { %v729_v3 = vpop.permute.xlu1 %728  ;;  %3849 = vmatpush3.bf16.msra.mxu1 %v4367_v51 }
  0xb6   : > { %v4936_v57 = vsel %vm834_vm4, %v4708_v11, %v729_v3  ;;  %v715_v6 = vsel %vm515_vm3, %v710_v32, %v714_v34  ;;  %v4370_v3 = vld [vmem:[%s6641_s1 + $0xd8] sm:$0xff]  }
  0xb8   : > { %742 = vrot.lane.b32.xlu0 %v679_v39, %s4513_s10  ;;  %922 = vrot.lane.b32.xlu1 %v4936_v57, %s4513_s10  ;;  %v731_v10 = vpop.permute.xlu0 %730  ;;  %v4368_v39 = vld [vmem:[%s6641_s1 + $0xd0] sm:$0xff]  }
  0xb9   : > { %v4946_v23 = vsel %vm834_vm4, %v4718_v21, %v731_v10  ;;  %3850 = vmatprep.subr.bf16.mxu1 %v4368_v39  ;;  %v790_v10 = vrot.slane %v4635_v53, 1  ;;  %v4374_v53 = vld [vmem:[%s6641_s1 + $0xe8] sm:$0xff]  }
  0xba   : > { %3851 = vmatpush3.bf16.msra.mxu1 %v4369_v59  ;;  %v4375_v59 = vld [vmem:[%s6641_s1 + $0xa8] sm:$0xff]  }
  0xbb   : > { %v733_v25 = vpop.permute.xlu1 %732  ;;  %3852 = vmatprep.subr.bf16.mxu1 %v4370_v3  ;;  %v4376_v3 = vld [vmem:[%s6641_s1 + $0xf0] sm:$0xff]  }
  0xbc   : > { %744 = vrot.lane.b32.xlu0 %v691_v4, %s4513_s10  ;;  %926 = vrot.lane.b32.xlu1 %v4946_v23, %s4513_s10  ;;  %v4954_v36 = vsel %vm834_vm4, %v4730_v33, %v733_v25  ;;  %v4372_v25 = vld [vmem:[%s6641_s1 + $0xe0] sm:$0xff]  }
  0xbe   : > { %3853 = vmatpush3.bf16.msra.mxu1 %v4371_v13 }
  0xbf   : > { %v4989_v9 = vpop.permute.xlu1 %716  ;;  %3854 = vmatprep.subr.bf16.mxu1 %v4372_v25 }
  0xc0   : > { %746 = vrot.lane.b32.xlu0 %v703_v30, %s4513_s10  ;;  %930 = vrot.lane.b32.xlu1 %v4954_v36, %s4513_s10  ;;  %6659 = vst [vmem:[#allocation6_spill] sm:$0xff] %v4989_v9  ;;  %v4373_v30 = vld [vmem:[%s6641_s1 + $0xa0] sm:$0xff]  }
  0xc2   : > { %3855 = vmatpush3.bf16.msra.mxu1 %v4373_v30  ;;  %v4379_v30 = vld [vmem:[%s6641_s1 + $0xb8] sm:$0xff]  }
  0xc3   : > { %3856 = vmatprep.subr.bf16.mxu1 %v4374_v53  ;;  %v796_v53 = vrot.slane %v4665_v18, 1  ;;  %v4380_v18 = vld [vmem:[%s6641_s1 + $0x118] sm:$0xff]  }
  0xc4   : > { %748 = vrot.lane.b32.xlu0 %v715_v6, %s4513_s10 }
  0xc6   : > { %3857 = vmatpush3.bf16.msra.mxu1 %v4375_v59 }
  0xc7   : > { %3858 = vmatprep.subr.bf16.mxu1 %v4376_v3 }
 0x116   : > { %v4987_v4 = vpop.permute.xlu0 %902 }
 0x117   : > { %v1001_v48 = vsel %vm834_vm4, %v4755_v56, %v4987_v4 }
 0x118   : > { %1423 = vmatprep.mubr.bf16.mxu0 %v1001_v48  ;;  %v4377_v48 = vld [vmem:[%s6641_s1 + $0xb0] sm:$0xff]  }
 0x119   : > { %3651 = vmatmul.mubr.msk.bf16.vlgmr.msra.gmra.mrb[0].mxu0 %vm4992_vm6, %v4989_v9  ;;  %3859 = vmatpush3.bf16.msra.mxu1 %v4377_v48 }
 0x11a   : > { %v735_v32 = vpop.permute.xlu0 %734  ;;  %v5019_v34 = vpop.permute.xlu1 %906  ;;  %4223 = vmatpush3.bf16.msra.mxu0 %v4361_v37  ;;  %v5037_v37 = vsel %vm783_vm5, %v789_v60, %v790_v10  ;;  %v4378_v60 = vld [vmem:[%s6641_s1 + $0xf8] sm:$0xff]  }
 0x11b   : > { %v5026_v61 = vsel %vm834_vm4, %v4808_v8, %v735_v32  ;;  %v1005_v6 = vsel %vm834_vm4, %v5006_v14, %v5019_v34  ;;  %4224 = vmatprep.subr.bf16.mxu0 %v4362_v55  ;;  %v795_v32 = vrot.slane %v4677_v27, 1  ;;  %3860 = vmatprep.subr.bf16.mxu1 %v4378_v60 }
 0x11c   : > { %934 = vrot.lane.b32.xlu1 %v5026_v61, %s4513_s10  ;;  %1431 = vmatprep.mubr.bf16.mxu0 %v1005_v6 }
 0x11d   : > { %3861 = vmatpush3.bf16.msra.mxu1 %v4379_v30  ;;  %v802_v30 = vrot.slane %v4703_v7, 1  ;;  %v810_v7 = vrot.slane %v4808_v8, 1 }
 0x11e   : > { %v737_v47 = vpop.permute.xlu0 %736  ;;  %v5039_v50 = vpop.permute.xlu1 %910  ;;  %4225 = vmatpush3.bf16.msra.mxu0 %v4362_v55 }
 0x11f   : > { %v5043_v51 = vsel %vm834_vm4, %v4819_v28, %v737_v47  ;;  %v1009_v39 = vsel %vm834_vm4, %v5037_v37, %v5039_v50  ;;  %4226 = vmatprep.subr.bf16.mxu0 %v4366_v41 }
 0x120   : > { %938 = vrot.lane.b32.xlu0 %v5043_v51, %s4513_s10 }
 0x121   : > { %1432 = vmatmul.mubr.bf16.gmra.mrb[4].mxu0 %v4845_v17  ;;  %v5071_v17 = vsel %vm783_vm5, %v792_v63, %v793_v54  ;;  %v798_v54 = vrot.slane %v4690_v35, 1  ;;  %v799_v63 = vrot.slane %v4681_v29, 1 }
 0x122   : > { %v739_v55 = vpop.permute.xlu0 %738  ;;  %1439 = vmatprep.mubr.bf16.mxu0 %v1009_v39  ;;  %4227 = vmatpush3.bf16.msra.mxu0 %v4366_v41  ;;  %v5068_v2 = vpop.permute.xlu1 %914  ;;  %v5100_v39 = vsel %vm783_vm5, %v795_v32, %v796_v53  ;;  %v805_v53 = vrot.slane %v4714_v16, 1  ;;  %v808_v16 = vrot.slane %v4725_v26, 1  ;;  %v816_v26 = vrot.slane %v4830_v49, 1 }
 0x123   : > { %v5064_v58 = vsel %vm834_vm4, %v4830_v49, %v739_v55  ;;  %v1013_v10 = vsel %vm834_vm4, %v5071_v17, %v5068_v2  ;;  %4228 = vmatprep.subr.bf16.mxu0 %v4380_v18  ;;  %v823_v49 = vrot.slane %v4872_v52, 1  ;;  %v829_v52 = vrot.slane %v4912_v40, 1 }
 0x124   : > { %942 = vrot.lane.b32.xlu1 %v5064_v58, %s4513_s10 }
 0x126   : > { %v741_v13 = vpop.permute.xlu0 %740  ;;  %v5097_v47 = vpop.permute.xlu1 %918  ;;  %4229 = vmatpush3.bf16.msra.mxu0 %v4380_v18 }
 0x127   : > { %v5081_v25 = vsel %vm834_vm4, %v4841_v5, %v741_v13  ;;  %v1017_v59 = vsel %vm834_vm4, %v5100_v39, %v5097_v47  ;;  %v5126_v13 = vsel %vm783_vm5, %v798_v54, %v799_v63  ;;  %v813_v54 = vrot.slane %v4819_v28, 1 }
 0x128   : > { %946 = vrot.lane.b32.xlu0 %v5081_v25, %s4513_s10  ;;  %v814_v63 = vrot.slane %v4825_v46, 1  ;;  %v820_v28 = vrot.slane %v4853_v22, 1  ;;  %v828_v22 = vrot.slane %v4902_v20, 1 }
 0x129   : > { %1440 = vmatmul.mubr.bf16.gmra.mrb[8].mxu0 %v4863_v31 }
 0x12a   : > { %v743_v6 = vpop.permute.xlu0 %742  ;;  %1447 = vmatprep.mubr.bf16.mxu0 %v1013_v10  ;;  %v5123_v55 = vpop.permute.xlu1 %922  ;;  %v801_v10 = vrot.slane %v4708_v11, 1 }
 0x12b   : > { %v5093_v41 = vsel %vm834_vm4, %v4859_v38, %v743_v6  ;;  %v1021_v60 = vsel %vm834_vm4, %v5126_v13, %v5123_v55 }
 0x12c   : > { %950 = vrot.lane.b32.xlu1 %v5093_v41, %s4513_s10  ;;  %v5151_v6 = vsel %vm783_vm5, %v801_v10, %v802_v30  ;;  %v825_v10 = vrot.slane %v4882_v62, 1  ;;  %v826_v30 = vrot.slane %v4894_v19, 1 }
 0x12e   : > { %v745_v27 = vpop.permute.xlu0 %744  ;;  %v5146_v32 = vpop.permute.xlu1 %926 }
 0x12f   : > { %v5107_v31 = vsel %vm834_vm4, %v4882_v62, %v745_v27  ;;  %v1025_v11 = vsel %vm834_vm4, %v5151_v6, %v5146_v32  ;;  %v811_v27 = vrot.slane %v4814_v24, 1  ;;  %v832_v62 = vrot.slane %v4932_v0, 1 }
 0x130   : > { %954 = vrot.lane.b32.xlu0 %v5107_v31, %s4513_s10 }
 0x131   : > { %1448 = vmatmul.mubr.bf16.gmra.mrb[12].mxu0 %v4877_v42  ;;  %v5173_v8 = vsel %vm783_vm5, %v810_v7, %v811_v27 }
 0x132   : > { %v747_v3 = vpop.permute.xlu0 %746  ;;  %1455 = vmatprep.mubr.bf16.mxu0 %v1017_v59  ;;  %v817_v59 = vrot.slane %v4836_v1, 1  ;;  %v819_v1 = vrot.slane %v4841_v5, 1 }
 0x133   : > { %v5119_v48 = vsel %vm834_vm4, %v4902_v20, %v747_v3  ;;  %v831_v20 = vrot.slane %v4921_v45, 1 }
 0x134   : > { %958 = vrot.lane.b32.xlu1 %v5119_v48, %s4513_s10  ;;  %v5197_v46 = vsel %vm783_vm5, %v816_v26, %v817_v59  ;;  %v5210_v5 = vsel %vm783_vm5, %v819_v1, %v820_v28 }
 0x135   : > { %v5234_v19 = vsel %vm783_vm5, %v831_v20, %v832_v62 }
 0x136   : > { %v749_v35 = vpop.permute.xlu0 %748 }
 0x137   : > { %v5130_v29 = vsel %vm834_vm4, %v4921_v45, %v749_v35  ;;  %v822_v35 = vrot.slane %v4859_v38, 1 }
 0x138   : > { %904 = vrot.lane.b32.xlu1 %v5006_v14, %s4513_s10  ;;  %962 = vrot.lane.b32.xlu0 %v5130_v29, %s4513_s10  ;;  %v804_v14 = vrot.slane %v4718_v21, 1  ;;  %v807_v21 = vrot.slane %v4730_v33, 1  ;;  %v5178_v33 = vpop.permute.xlu1 %930 }
 0x139   : > { %1456 = vmatmul.mubr.bf16.gmra.mrb[16].mxu0 %v4898_v15  ;;  %v5207_v38 = vsel %vm783_vm5, %v822_v35, %v823_v49 }
 0x13a   : > { %1463 = vmatprep.mubr.bf16.mxu0 %v1021_v60  ;;  %v5166_v18 = vsel %vm783_vm5, %v804_v14, %v805_v53  ;;  %v5176_v24 = vsel %vm783_vm5, %v807_v21, %v808_v16  ;;  %v5200_v60 = vsel %vm783_vm5, %v813_v54, %v814_v63  ;;  %v5222_v14 = vsel %vm783_vm5, %v828_v22, %v829_v52 }
 0x13b   : > { %v1029_v3 = vsel %vm834_vm4, %v5166_v18, %v5178_v33  ;;  %v5225_v53 = vsel %vm783_vm5, %v825_v10, %v826_v30 }
 0x13c   : > { %912 = vrot.lane.b32.xlu1 %v5071_v17, %s4513_s10  ;;  %908 = vrot.lane.b32.xlu0 %v5037_v37, %s4513_s10 }
 0x140   : > { %920 = vrot.lane.b32.xlu1 %v5126_v13, %s4513_s10  ;;  %916 = vrot.lane.b32.xlu0 %v5100_v39, %s4513_s10 }
 0x141   : > { %1464 = vmatmul.mubr.bf16.gmra.mrb[20].mxu0 %v4917_v44 }
 0x142   : > { %1471 = vmatprep.mubr.bf16.mxu0 %v1025_v11 }
 0x144   : > { %928 = vrot.lane.b32.xlu1 %v5166_v18, %s4513_s10  ;;  %924 = vrot.lane.b32.xlu0 %v5151_v6, %s4513_s10 }
 0x148   : > { %936 = vrot.lane.b32.xlu1 %v5173_v8, %s4513_s10  ;;  %932 = vrot.lane.b32.xlu0 %v5176_v24, %s4513_s10 }
 0x149   : > { %1472 = vmatmul.mubr.bf16.gmra.mrb[24].mxu0 %v4936_v57 }
 0x14a   : > { %1479 = vmatprep.mubr.bf16.mxu0 %v1029_v3 }
 0x14c   : > { %944 = vrot.lane.b32.xlu1 %v5197_v46, %s4513_s10  ;;  %940 = vrot.lane.b32.xlu0 %v5200_v60, %s4513_s10 }
 0x150   : > { %952 = vrot.lane.b32.xlu1 %v5207_v38, %s4513_s10  ;;  %948 = vrot.lane.b32.xlu0 %v5210_v5, %s4513_s10 }
 0x151   : > { %1480 = vmatmul.mubr.bf16.gmra.mrb[28].mxu0 %v4946_v23 }
 0x154   : > { %960 = vrot.lane.b32.xlu1 %v5222_v14, %s4513_s10  ;;  %956 = vrot.lane.b32.xlu0 %v5225_v53, %s4513_s10 }
 0x158   : > { %964 = vrot.lane.b32.xlu0 %v5234_v19, %s4513_s10 }
 0x18e   : > { %v5238_v40 = vpop.permute.xlu1 %934 }
 0x18f   : > { %v1033_v45 = vsel %vm834_vm4, %v5176_v24, %v5238_v40 }
 0x190   : > { %1487 = vmatprep.mubr.bf16.mxu0 %v1033_v45 }
 0x191   : > { %1488 = vmatmul.mubr.bf16.gmra.mrb[32].mxu0 %v4954_v36 }
 0x192   : > { %v5244_v0 = vpop.permute.xlu0 %938 }
 0x193   : > { %v1037_v11 = vsel %vm834_vm4, %v5173_v8, %v5244_v0 }
 0x194   : > { %1495 = vmatprep.mubr.bf16.mxu0 %v1037_v11 }
 0x196   : > { %v5249_v7 = vpop.permute.xlu1 %942 }
 0x197   : > { %v1041_v27 = vsel %vm834_vm4, %v5200_v60, %v5249_v7 }
 0x199   : > { %1496 = vmatmul.mubr.bf16.gmra.mrb[36].mxu0 %v5026_v61 }
 0x19a   : > { %1503 = vmatprep.mubr.bf16.mxu0 %v1041_v27  ;;  %v5255_v21 = vpop.permute.xlu0 %946 }
 0x19b   : > { %v1045_v16 = vsel %vm834_vm4, %v5197_v46, %v5255_v21 }
 0x19e   : > { %v5260_v26 = vpop.permute.xlu1 %950 }
 0x19f   : > { %v1049_v63 = vsel %vm834_vm4, %v5210_v5, %v5260_v26 }
 0x1a1   : > { %1504 = vmatmul.mubr.bf16.gmra.mrb[40].mxu0 %v5043_v51 }
 0x1a2   : > { %1511 = vmatprep.mubr.bf16.mxu0 %v1045_v16  ;;  %v5263_v59 = vpop.permute.xlu0 %954 }
 0x1a3   : > { %v1053_v1 = vsel %vm834_vm4, %v5207_v38, %v5263_v59 }
 0x1a6   : > { %v5265_v54 = vpop.permute.xlu1 %958 }
 0x1a9   : > { %1512 = vmatmul.mubr.bf16.gmra.mrb[44].mxu0 %v5064_v58 }
 0x1aa   : > { %v905_v3 = vpop.permute.xlu1 %904  ;;  %v5271_v35 = vpop.permute.xlu0 %962  ;;  %1519 = vmatprep.mubr.bf16.mxu0 %v1049_v63 }
 0x1ab   : > { %v967_v49 = vsel %vm834_vm4, %v4987_v4, %v905_v3  ;;  %v1057_v4 = vsel %vm834_vm4, %v5225_v53, %v5265_v54 }
 0x1ac   : > { %1585 = vmatmul.mubr.bf16.vlgmr.msra.gmra.mrb[0].mxu1 %v967_v49 }
 0x1ad   : > { %1592 = vmatprep.mubr.bf16.mxu1 %v4877_v42 }
 0x1ae   : > { %v909_v28 = vpop.permute.xlu0 %908  ;;  %v913_v52 = vpop.permute.xlu1 %912 }
 0x1af   : > { %v968_v22 = vsel %vm834_vm4, %v5019_v34, %v909_v28  ;;  %v969_v42 = vsel %vm834_vm4, %v5039_v50, %v913_v52  ;;  %v1061_v34 = vsel %vm834_vm4, %v5222_v14, %v5271_v35 }
 0x1b1   : > { %1520 = vmatmul.mubr.bf16.gmra.mrb[48].mxu0 %v5081_v25 }
 0x1b2   : > { %1527 = vmatprep.mubr.bf16.mxu0 %v1053_v1  ;;  %v917_v10 = vpop.permute.xlu0 %916  ;;  %v921_v30 = vpop.permute.xlu1 %920 }
 0x1b4   : > { %1593 = vmatmul.mubr.bf16.gmra.mrb[4].mxu1 %v968_v22 }
 0x1b5   : > { %1600 = vmatprep.mubr.bf16.mxu1 %v4898_v15  ;;  %v970_v15 = vsel %vm834_vm4, %v5068_v2, %v917_v10 }
 0x1b6   : > { %v925_v50 = vpop.permute.xlu0 %924 }
 0x1b9   : > { %1528 = vmatmul.mubr.bf16.gmra.mrb[52].mxu0 %v5093_v41 }
 0x1ba   : > { %1535 = vmatprep.mubr.bf16.mxu0 %v1057_v4  ;;  %v933_v2 = vpop.permute.xlu0 %932 }
 0x1bc   : > { %1601 = vmatmul.mubr.bf16.gmra.mrb[8].mxu1 %v969_v42 }
 0x1bd   : > { %1608 = vmatprep.mubr.bf16.mxu1 %v4917_v44  ;;  %v971_v44 = vsel %vm834_vm4, %v5097_v47, %v921_v30 }
 0x1c1   : > { %1536 = vmatmul.mubr.bf16.gmra.mrb[56].mxu0 %v5107_v31 }
 0x1c2   : > { %1543 = vmatprep.mubr.bf16.mxu0 %v1061_v34 }
 0x1c4   : > { %1609 = vmatmul.mubr.bf16.gmra.mrb[12].mxu1 %v970_v15 }
 0x1c5   : > { %1616 = vmatprep.mubr.bf16.mxu1 %v4936_v57  ;;  %v972_v57 = vsel %vm834_vm4, %v5123_v55, %v925_v50 }
 0x1c9   : > { %1544 = vmatmul.mubr.bf16.gmra.mrb[60].mxu0 %v5119_v48 }
 0x1ca   : > { %4230 = vmatprep.mubr.msk.bf16.mxu0 %vm834_vm4, %v5037_v37  ;;  %v929_v37 = vpop.permute.xlu1 %928 }
 0x1cc   : > { %1617 = vmatmul.mubr.bf16.gmra.mrb[16].mxu1 %v971_v44 }
 0x1cd   : > { %1624 = vmatprep.mubr.bf16.mxu1 %v4946_v23  ;;  %v973_v23 = vsel %vm834_vm4, %v5146_v32, %v929_v37 }
 0x1d1   : > { %4231 = vmatmul.mubr.msk.bf16.vlgmr.msra.gmra.mrb[64].mxu0 %vm834_vm4, %v5071_v17  ;;  %v937_v17 = vpop.permute.xlu1 %936 }
 0x1d2   : > { %4234 = vmatprep.mubr.msk.bf16.mxu0 %vm834_vm4, %v5100_v39 }
 0x1d4   : > { %1625 = vmatmul.mubr.bf16.gmra.mrb[20].mxu1 %v972_v57 }
 0x1d5   : > { %1632 = vmatprep.mubr.bf16.mxu1 %v4954_v36  ;;  %v974_v36 = vsel %vm834_vm4, %v5178_v33, %v933_v2  ;;  %v945_v20 = vpop.permute.xlu1 %944 }
 0x1d9   : > { %4235 = vmatmul.mubr.msk.bf16.gmra.mrb[68].mxu0 %vm834_vm4, %v5126_v13  ;;  %v953_v3 = vpop.permute.xlu1 %952 }
 0x1da   : > { %4238 = vmatprep.mubr.msk.bf16.mxu0 %vm834_vm4, %v5151_v6 }
 0x1dc   : > { %1633 = vmatmul.mubr.bf16.gmra.mrb[24].mxu1 %v973_v23 }
 0x1dd   : > { %1640 = vmatprep.mubr.bf16.mxu1 %v5026_v61  ;;  %v975_v61 = vsel %vm834_vm4, %v5238_v40, %v937_v17 }
 0x1e1   : > { %4239 = vmatmul.mubr.msk.bf16.gmra.mrb[72].mxu0 %vm834_vm4, %v5166_v18 }
 0x1e2   : > { %4242 = vmatprep.mubr.msk.bf16.mxu0 %vm834_vm4, %v5176_v24 }
 0x1e4   : > { %1641 = vmatmul.mubr.bf16.gmra.mrb[28].mxu1 %v974_v36 }
 0x1e5   : > { %1648 = vmatprep.mubr.bf16.mxu1 %v5043_v51  ;;  %v941_v51 = vpop.permute.xlu0 %940 }
 0x1e6   : > { %v976_v18 = vsel %vm834_vm4, %v5244_v0, %v941_v51 }
 0x1e9   : > { %4243 = vmatmul.mubr.msk.bf16.gmra.mrb[76].mxu0 %vm834_vm4, %v5173_v8  ;;  %v949_v11 = vpop.permute.xlu0 %948 }
 0x1ea   : > { %4246 = vmatprep.mubr.msk.bf16.mxu0 %vm834_vm4, %v5200_v60 }
 0x1ec   : > { %1649 = vmatmul.mubr.bf16.gmra.mrb[32].mxu1 %v975_v61  ;;  %v3750_v47 = vpop.f32.mrb[0].mxu0 }
 0x1ed   : > { %1656 = vmatprep.mubr.bf16.mxu1 %v5064_v58  ;;  %v3751_v39 = vpop.f32.mrb[1].mxu0  ;;  %v957_v22 = vpop.permute.xlu0 %956 }
 0x1ee   : > { %v5331_v55 = vadd.f32 %v3751_v39, %v3750_v47  ;;  %v3753_v13 = vpop.f32.mrb[2].mxu0  ;;  %v980_v52 = vsel %vm834_vm4, %v5263_v59, %v957_v22 }
 0x1ef   : > { %v3754_v32 = vpop.f32.mrb[3].mxu0 }
 0x1f0   : > { %v5333_v6 = vadd.f32 %v3754_v32, %v3753_v13 }
 0x1f1   : > { %4247 = vmatmul.mubr.msk.bf16.gmra.mrb[80].mxu0 %vm834_vm4, %v5197_v46  ;;  %v977_v46 = vsel %vm834_vm4, %v5249_v7, %v945_v20  ;;  %v965_v23 = vpop.permute.xlu0 %964 }
 0x1f2   : > { %4250 = vmatprep.mubr.msk.bf16.mxu0 %vm834_vm4, %v5210_v5  ;;  %v982_v36 = vsel %vm834_vm4, %v5271_v35, %v965_v23 }
 0x1f4   : > { %v3756_v8 = vpop.f32.mrb[4].mxu0  ;;  %1657 = vmatmul.mubr.bf16.gmra.mrb[36].mxu1 %v976_v18 }
 0x1f5   : > { %v3757_v58 = vpop.f32.mrb[5].mxu0  ;;  %1664 = vmatprep.mubr.bf16.mxu1 %v5081_v25 }
 0x1f6   : > { %v5342_v24 = vadd.f32 %v3757_v58, %v3756_v8  ;;  %v3759_v33 = vpop.f32.mrb[6].mxu0 }
 0x1f7   : > { %v3760_v60 = vpop.f32.mrb[7].mxu0 }
 0x1f8   : > { %v5344_v62 = vadd.f32 %v3760_v60, %v3759_v33 }
 0x1f9   : > { %4251 = vmatmul.mubr.msk.bf16.gmra.mrb[84].mxu0 %vm834_vm4, %v5207_v38  ;;  %v978_v38 = vsel %vm834_vm4, %v5255_v21, %v949_v11 }
 0x1fa   : > { %4254 = vmatprep.mubr.msk.bf16.mxu0 %vm834_vm4, %v5225_v53 }
 0x1fc   : > { %v3762_v5 = vpop.f32.mrb[8].mxu0  ;;  %1665 = vmatmul.mubr.bf16.gmra.mrb[40].mxu1 %v977_v46 }
 0x1fd   : > { %v3763_v40 = vpop.f32.mrb[9].mxu0  ;;  %1672 = vmatprep.mubr.bf16.mxu1 %v5093_v41 }
 0x1fe   : > { %v5353_v25 = vadd.f32 %v3763_v40, %v3762_v5  ;;  %v3765_v45 = vpop.f32.mrb[10].mxu0 }
 0x1ff   : > { %v3766_v0 = vpop.f32.mrb[11].mxu0 }
 0x200   : > { %v5355_v27 = vadd.f32 %v3766_v0, %v3765_v45 }
 0x201   : > { %4255 = vmatmul.mubr.msk.bf16.gmra.mrb[88].mxu0 %vm834_vm4, %v5222_v14  ;;  %v979_v14 = vsel %vm834_vm4, %v5260_v26, %v953_v3 }
 0x202   : > { %4258 = vmatprep.mubr.msk.bf16.mxu0 %vm834_vm4, %v5234_v19 }
 0x204   : > { %v3768_v53 = vpop.f32.mrb[12].mxu0  ;;  %1673 = vmatmul.mubr.bf16.gmra.mrb[44].mxu1 %v978_v38 }
 0x205   : > { %v3769_v7 = vpop.f32.mrb[13].mxu0  ;;  %1680 = vmatprep.mubr.bf16.mxu1 %v5107_v31 }
 0x206   : > { %v5364_v41 = vadd.f32 %v3769_v7, %v3768_v53  ;;  %v3771_v16 = vpop.f32.mrb[14].mxu0 }
 0x207   : > { %v3772_v63 = vpop.f32.mrb[15].mxu0 }
 0x208   : > { %v5366_v49 = vadd.f32 %v3772_v63, %v3771_v16 }
 0x209   : > { %4259 = vmatmul.mubr.msk.bf16.gmra.mrb[92].mxu0 %vm834_vm4, %v4755_v56 }
 0x20c   : > { %v3774_v19 = vpop.f32.mrb[16].mxu0  ;;  %1681 = vmatmul.mubr.bf16.gmra.mrb[48].mxu1 %v979_v14 }
 0x20d   : > { %v3775_v21 = vpop.f32.mrb[17].mxu0  ;;  %1688 = vmatprep.mubr.bf16.mxu1 %v5119_v48  ;;  %v961_v48 = vpop.permute.xlu1 %960 }
 0x20e   : > { %v5373_v1 = vadd.f32 %v3775_v21, %v3774_v19  ;;  %v3777_v31 = vpop.f32.mrb[18].mxu0  ;;  %v981_v44 = vsel %vm834_vm4, %v5265_v54, %v961_v48 }
 0x20f   : > { %v3778_v28 = vpop.f32.mrb[19].mxu0 }
 0x210   : > { %v5375_v4 = vadd.f32 %v3778_v28, %v3777_v31  ;;  %v5416_v31 = vld [vmem:[%s6642_s2] ss:$0 sm:$0xff] }
 0x214   : > { %v3780_v42 = vpop.f32.mrb[20].mxu0  ;;  %1689 = vmatmul.mubr.bf16.gmra.mrb[52].mxu1 %v980_v52  ;;  %v1426_v52 = vadd.f32 %v5331_v55, %v5416_v31 }
 0x215   : > { %v3781_v34 = vpop.f32.mrb[21].mxu0  ;;  %1696 = vmatprep.mubr.bf16.mxu1 %v5130_v29 }
 0x216   : > { %v5380_v26 = vadd.f32 %v3781_v34, %v3780_v42  ;;  %v3783_v10 = vpop.f32.mrb[22].mxu0 }
 0x217   : > { %v3784_v15 = vpop.f32.mrb[23].mxu0 }
 0x218   : > { %v5382_v30 = vadd.f32 %v3784_v15, %v3783_v10  ;;  %v1429_v15 = vadd.f32 %v5333_v6, %v5416_v31 }
 0x21c   : > { %v3786_v50 = vpop.f32.mrb[24].mxu0  ;;  %1697 = vmatmul.mubr.bf16.gmra.mrb[56].mxu1 %v981_v44 }
 0x21d   : > { %v3787_v57 = vpop.f32.mrb[25].mxu0  ;;  %3653 = vmatprep.mubr.msk.bf16.mxu1 %vm4992_vm6, %v4989_v9 }
 0x21e   : > { %v5389_v59 = vadd.f32 %v3787_v57, %v3786_v50  ;;  %v3789_v29 = vpop.f32.mrb[26].mxu0 }
 0x21f   : > { %v3790_v37 = vpop.f32.mrb[27].mxu0 }
 0x220   : > { %v5391_v2 = vadd.f32 %v3790_v37, %v3789_v29 }
 0x224   : > { %v3792_v17 = vpop.f32.mrb[28].mxu0  ;;  %1705 = vmatmul.mubr.bf16.gmra.mrb[60].mxu1 %v982_v36 }
 0x225   : > { %v3793_v54 = vpop.f32.mrb[29].mxu0 }
 0x226   : > { %v5395_v61 = vadd.f32 %v3793_v54, %v3792_v17  ;;  %v3795_v47 = vpop.f32.mrb[30].mxu0 }
 0x227   : > { %v3796_v39 = vpop.f32.mrb[31].mxu0 }
 0x228   : > { %v5397_v13 = vadd.f32 %v3796_v39, %v3795_v47  ;;  %v1434_v47 = vadd.f32 %v5342_v24, %v5416_v31  ;;  %v1442_v24 = vadd.f32 %v5353_v25, %v5416_v31  ;;  %v4382_v25 = vld [vmem:[%s6643_s3] sm:$0xff]  }
 0x264   : > { %v3798_v32 = vpop.f32.mrb[32].mxu0 }
 0x265   : > { %v3799_v51 = vpop.f32.mrb[33].mxu0 }
 0x266   : > { %v5399_v18 = vadd.f32 %v3799_v51, %v3798_v32  ;;  %v3801_v8 = vpop.f32.mrb[34].mxu0  ;;  %v1437_v51 = vadd.f32 %v5344_v62, %v5416_v31  ;;  %v1445_v62 = vadd.f32 %v5355_v27, %v5416_v31 }
 0x267   : > { %v3802_v58 = vpop.f32.mrb[35].mxu0 }
 0x268   : > { %v5401_v33 = vadd.f32 %v3802_v58, %v3801_v8 }
 0x26c   : > { %v3804_v60 = vpop.f32.mrb[36].mxu0 }
 0x26d   : > { %v3805_v20 = vpop.f32.mrb[37].mxu0 }
 0x26e   : > { %v5403_v35 = vadd.f32 %v3805_v20, %v3804_v60  ;;  %v3807_v46 = vpop.f32.mrb[38].mxu0 }
 0x26f   : > { %v3808_v5 = vpop.f32.mrb[39].mxu0 }
 0x270   : > { %v5405_v40 = vadd.f32 %v3808_v5, %v3807_v46 }
 0x274   : > { %v3810_v45 = vpop.f32.mrb[40].mxu0 }
 0x275   : > { %v3811_v0 = vpop.f32.mrb[41].mxu0 }
 0x276   : > { %v5407_v11 = vadd.f32 %v3811_v0, %v3810_v45  ;;  %v3813_v38 = vpop.f32.mrb[42].mxu0 }
 0x277   : > { %v3814_v53 = vpop.f32.mrb[43].mxu0 }
 0x278   : > { %v5409_v7 = vadd.f32 %v3814_v53, %v3813_v38 }
 0x27c   : > { %v3816_v16 = vpop.f32.mrb[44].mxu0 }
 0x27d   : > { %v3817_v63 = vpop.f32.mrb[45].mxu0 }
 0x27e   : > { %v5411_v3 = vadd.f32 %v3817_v63, %v3816_v16  ;;  %v3819_v14 = vpop.f32.mrb[46].mxu0 }
 0x27f   : > { %v3820_v19 = vpop.f32.mrb[47].mxu0  ;;  %v3862_v21 = vpop.f32.mrb[0].mxu1 }
 0x280   : > { %v5418_v28 = vadd.f32 %v3820_v19, %v3819_v14  ;;  %v3863_v22 = vpop.f32.mrb[1].mxu1 }
 0x281   : > { %v3864_v42 = vadd.f32 %v3863_v22, %v3862_v21  ;;  %v3865_v34 = vpop.f32.mrb[2].mxu1 }
 0x282   : > { %v3866_v10 = vpop.f32.mrb[3].mxu1 }
 0x283   : > { %v3867_v48 = vadd.f32 %v3866_v10, %v3865_v34  ;;  %v5424_v44 = vadd.f32 %v3864_v42, %v1426_v52  ;;  %v4381_v10 = vld [vmem:[%s6643_s3 + $0x40] sm:$0xff]  }
 0x284   : > { %v3822_v50 = vpop.f32.mrb[48].mxu0  ;;  %3978 = vmatprep.subr.bf16.mxu1 %v4381_v10 }
 0x285   : > { %v3823_v57 = vpop.f32.mrb[49].mxu0  ;;  %v5426_v29 = vadd.f32 %v3867_v48, %v1429_v15  ;;  %3979 = vmatpush3.bf16.msra.mxu1 %v4382_v25 }
 0x286   : > { %v5428_v37 = vadd.f32 %v3823_v57, %v3822_v50  ;;  %v3825_v23 = vpop.f32.mrb[50].mxu0 }
 0x287   : > { %v3826_v36 = vpop.f32.mrb[51].mxu0  ;;  %v3868_v17 = vpop.f32.mrb[4].mxu1 }
 0x288   : > { %v5430_v54 = vadd.f32 %v3826_v36, %v3825_v23  ;;  %v3869_v55 = vpop.f32.mrb[5].mxu1  ;;  %v1450_v36 = vadd.f32 %v5364_v41, %v5416_v31 }
 0x289   : > { %v3870_v39 = vadd.f32 %v3869_v55, %v3868_v17  ;;  %v3871_v6 = vpop.f32.mrb[6].mxu1 }
 0x28a   : > { %v3872_v32 = vpop.f32.mrb[7].mxu1 }
 0x28b   : > { %v3873_v8 = vadd.f32 %v3872_v32, %v3871_v6  ;;  %v1595_v58 = vadd.f32 %v3870_v39, %v1434_v47  ;;  %v1453_v39 = vadd.f32 %v5366_v49, %v5416_v31 }
 0x28c   : > { %v3828_v60 = vpop.f32.mrb[52].mxu0 }
 0x28d   : > { %v3829_v20 = vpop.f32.mrb[53].mxu0  ;;  %v1598_v46 = vadd.f32 %v3873_v8, %v1437_v51 }
 0x28e   : > { %v5436_v5 = vadd.f32 %v3829_v20, %v3828_v60  ;;  %v3831_v45 = vpop.f32.mrb[54].mxu0 }
 0x28f   : > { %v3832_v0 = vpop.f32.mrb[55].mxu0  ;;  %v3874_v38 = vpop.f32.mrb[8].mxu1 }
 0x290   : > { %v5438_v53 = vadd.f32 %v3832_v0, %v3831_v45  ;;  %v3875_v16 = vpop.f32.mrb[9].mxu1 }
 0x291   : > { %v3876_v63 = vadd.f32 %v3875_v16, %v3874_v38  ;;  %v3877_v14 = vpop.f32.mrb[10].mxu1 }
 0x292   : > { %v3878_v19 = vpop.f32.mrb[11].mxu1 }
 0x293   : > { %v3879_v21 = vadd.f32 %v3878_v19, %v3877_v14  ;;  %v5444_v22 = vadd.f32 %v3876_v63, %v1442_v24  ;;  %v1458_v24 = vadd.f32 %v5373_v1, %v5416_v31  ;;  %v1461_v19 = vadd.f32 %v5375_v4, %v5416_v31 }
 0x294   : > { %v3834_v52 = vpop.f32.mrb[56].mxu0  ;;  %v5483_v4 = vadd.f32 %v5389_v59, %v5416_v31  ;;  %v5496_v59 = vadd.f32 %v5397_v13, %v5416_v31 }
 0x295   : > { %v3835_v42 = vpop.f32.mrb[57].mxu0  ;;  %v5446_v34 = vadd.f32 %v3879_v21, %v1445_v62 }
 0x296   : > { %v5454_v15 = vadd.f32 %v3835_v42, %v3834_v52  ;;  %v3837_v48 = vpop.f32.mrb[58].mxu0 }
 0x297   : > { %v3838_v50 = vpop.f32.mrb[59].mxu0  ;;  %v3880_v27 = vpop.f32.mrb[12].mxu1 }
 0x298   : > { %v5456_v57 = vadd.f32 %v3838_v50, %v3837_v48  ;;  %v3881_v23 = vpop.f32.mrb[13].mxu1  ;;  %v1466_v48 = vadd.f32 %v5380_v26, %v5416_v31  ;;  %v5491_v26 = vadd.f32 %v5395_v61, %v5416_v31  ;;  %v5508_v61 = vadd.f32 %v5403_v35, %v5416_v31 }
 0x299   : > { %v3882_v17 = vadd.f32 %v3881_v23, %v3880_v27  ;;  %v3883_v55 = vpop.f32.mrb[14].mxu1  ;;  %v1469_v27 = vadd.f32 %v5382_v30, %v5416_v31 }
 0x29a   : > { %v3884_v47 = vpop.f32.mrb[15].mxu1 }
 0x29b   : > { %v3885_v6 = vadd.f32 %v3884_v47, %v3883_v55  ;;  %v1611_v32 = vadd.f32 %v3882_v17, %v1450_v36  ;;  %v5487_v55 = vadd.f32 %v5391_v2, %v5416_v31 }
 0x29c   : > { %v3840_v51 = vpop.f32.mrb[60].mxu0 }
 0x29d   : > { %v3841_v8 = vpop.f32.mrb[61].mxu0  ;;  %v5462_v60 = vadd.f32 %v3885_v6, %v1453_v39 }
 0x29e   : > { %v5464_v20 = vadd.f32 %v3841_v8, %v3840_v51  ;;  %v3843_v45 = vpop.f32.mrb[62].mxu0  ;;  %v5504_v51 = vadd.f32 %v5401_v33, %v5416_v31  ;;  %v5520_v33 = vadd.f32 %v5409_v7, %v5416_v31 }
 0x29f   : > { %v3844_v0 = vpop.f32.mrb[63].mxu0  ;;  %v3886_v38 = vpop.f32.mrb[16].mxu1 }
 0x2a0   : > { %v5466_v16 = vadd.f32 %v3844_v0, %v3843_v45  ;;  %v3887_v41 = vpop.f32.mrb[17].mxu1 }
 0x2a1   : > { %v3888_v63 = vadd.f32 %v3887_v41, %v3886_v38  ;;  %v3889_v14 = vpop.f32.mrb[18].mxu1  ;;  %v5516_v41 = vadd.f32 %v5407_v11, %v5416_v31  ;;  %v5532_v11 = vadd.f32 %v5428_v37, %v5416_v31 }
 0x2a2   : > { %v3890_v49 = vpop.f32.mrb[19].mxu1 }
 0x2a3   : > { %v3891_v62 = vadd.f32 %v3890_v49, %v3889_v14  ;;  %v5472_v21 = vadd.f32 %v3888_v63, %v1458_v24 }
 0x2a4   : > { %v4232_v52 = vpop.f32.mrb[64].mxu0 }
 0x2a5   : > { %v1756_v42 = vadd.f32 %v4232_v52, %v1595_v58  ;;  %v1747_v10 = vpop.f32.mrb[65].mxu0  ;;  %v5474_v25 = vadd.f32 %v3891_v62, %v1461_v19  ;;  %v5528_v52 = vadd.f32 %v5418_v28, %v5416_v31 }
 0x2a6   : > { %v1748_v50 = vadd.f32 %v1747_v10, %v5424_v44  ;;  %v4233_v1 = vpop.f32.mrb[66].mxu0 }
 0x2a7   : > { %v1876_v23 = vmul.f32 0.1, %v1756_v42  ;;  %v1759_v36 = vadd.f32 %v4233_v1, %v1598_v46  ;;  %v3892_v17 = vpop.f32.mrb[20].mxu1  ;;  %v1750_v58 = vpop.f32.mrb[67].mxu0  ;;  %v5500_v46 = vadd.f32 %v5399_v18, %v5416_v31 }
 0x2a8   : > { %v1874_v44 = vmul.f32 0.1, %v1748_v50  ;;  %v1751_v47 = vadd.f32 %v1750_v58, %v5426_v29  ;;  %v3893_v30 = vpop.f32.mrb[21].mxu1  ;;  %v5512_v29 = vadd.f32 %v5405_v40, %v5416_v31  ;;  %v5524_v40 = vadd.f32 %v5411_v3, %v5416_v31 }
 0x2a9   : > { %v1877_v39 = vmul.f32 0.1, %v1759_v36  ;;  %v3894_v6 = vadd.f32 %v3893_v30, %v3892_v17  ;;  %v3895_v2 = vpop.f32.mrb[22].mxu1  ;;  %v1908_v45 = vmax.f32 %v1756_v42, %v1876_v23  ;;  %v5537_v3 = vadd.f32 %v5430_v54, %v5416_v31 }
 0x2aa   : > { %v1875_v13 = vmul.f32 0.1, %v1751_v47  ;;  %v3896_v8 = vpop.f32.mrb[23].mxu1  ;;  %v1906_v35 = vmax.f32 %v1748_v50, %v1874_v44 }
 0x2ab   : > { %v1909_v18 = vmax.f32 %v1759_v36, %v1877_v39  ;;  %v3897_v0 = vadd.f32 %v3896_v8, %v3895_v2  ;;  %v1627_v38 = vadd.f32 %v3894_v6, %v1466_v48 }
 0x2ac   : > { %v1907_v24 = vmax.f32 %v1751_v47, %v1875_v13  ;;  %v4236_v63 = vpop.f32.mrb[68].mxu0 }
 0x2ad   : > { %v1939_v14 = vpack.c.bf16 %v1909_v18, %v1908_v45  ;;  %v1772_v49 = vadd.f32 %v4236_v63, %v1611_v32  ;;  %v1763_v19 = vpop.f32.mrb[69].mxu0  ;;  %v1630_v62 = vadd.f32 %v3897_v0, %v1469_v27 }
 0x2ae   : > { %v1938_v7 = vpack.c.bf16 %v1907_v24, %v1906_v35  ;;  %v1764_v42 = vadd.f32 %v1763_v19, %v5444_v22  ;;  %v4237_v10 = vpop.f32.mrb[70].mxu0 }
 0x2af   : > { %v1962_v48 = vshrl.u32 %v1939_v14, 16  ;;  %v1880_v32 = vmul.f32 0.1, %v1772_v49  ;;  %v1775_v50 = vadd.f32 %v4237_v10, %v5462_v60  ;;  %v3898_v1 = vpop.f32.mrb[24].mxu1  ;;  %v1766_v27 = vpop.f32.mrb[71].mxu0  ;;  %v1965_v28 = vshll.u32 %v1939_v14, 16 }
 0x2b0   : > { %v1955_v23 = vshrl.u32 %v1938_v7, 16  ;;  %v1878_v36 = vmul.f32 0.1, %v1764_v42  ;;  %v1767_v37 = vadd.f32 %v1766_v27, %v5446_v34  ;;  %v3899_v17 = vpop.f32.mrb[25].mxu1  ;;  %v1958_v44 = vshll.u32 %v1938_v7, 16 }
 0x2b1   : > { %v1964_v58 = vrot.slane %v1962_v48, 7  ;;  %v1881_v22 = vmul.f32 0.1, %v1775_v50  ;;  %v3900_v47 = vadd.f32 %v3899_v17, %v3898_v1  ;;  %v3901_v30 = vpop.f32.mrb[26].mxu1  ;;  %v1912_v54 = vmax.f32 %v1772_v49, %v1880_v32 }
 0x2b2   : > { %v1957_v39 = vrot.slane %v1955_v23, 7  ;;  %v1910_v6 = vmax.f32 %v1764_v42, %v1878_v36  ;;  %v1879_v2 = vmul.f32 0.1, %v1767_v37  ;;  %v3902_v13 = vpop.f32.mrb[27].mxu1 }
 0x2b3   : > { %v1967_v8 = vor.u32 %v1965_v28, %v1964_v58  ;;  %v1913_v60 = vmax.f32 %v1775_v50, %v1881_v22  ;;  %v5541_v45 = vadd.f32 %v3902_v13, %v3901_v30  ;;  %v1635_v18 = vadd.f32 %v3900_v47, %v5483_v4 }
 0x2b4   : > { %v1960_v0 = vor.u32 %v1958_v44, %v1957_v39  ;;  %v1911_v35 = vmax.f32 %v1767_v37, %v1879_v2  ;;  %v4240_v34 = vpop.f32.mrb[72].mxu0  ;;  %v5546_v24 = vsel %vm4621_vm2, %v1964_v58, 0  ;;  %v5550_v63 = vsel %vm4621_vm2, %v1957_v39, 0 }
 0x2b5   : > { %v5554_v14 = vsel %vm4621_vm2, 0, %v1967_v8  ;;  %v1941_v49 = vpack.c.bf16 %v1913_v60, %v1912_v54  ;;  %v1788_v19 = vadd.f32 %v4240_v34, %v1627_v38  ;;  %v1779_v7 = vpop.f32.mrb[73].mxu0  ;;  %v2150_v4 = vshll.u32 %v5546_v24, 16 }
 0x2b6   : > { %v5559_v42 = vsel %vm4621_vm2, 0, %v1960_v0  ;;  %v1940_v10 = vpack.c.bf16 %v1911_v35, %v1910_v6  ;;  %v1780_v48 = vadd.f32 %v1779_v7, %v5472_v21  ;;  %v4241_v32 = vpop.f32.mrb[74].mxu0  ;;  %v2143_v50 = vshrl.u32 %v5554_v14, 16 }
 0x2b7   : > { %v1976_v1 = vshrl.u32 %v1941_v49, 16  ;;  %v1979_v27 = vshll.u32 %v1941_v49, 16  ;;  %v1884_v28 = vmul.f32 0.1, %v1788_v19  ;;  %v1791_v23 = vadd.f32 %v4241_v32, %v1630_v62  ;;  %v3904_v36 = vpop.f32.mrb[28].mxu1  ;;  %v1782_v37 = vpop.f32.mrb[75].mxu0 }
 0x2b8   : > { %v1969_v38 = vshrl.u32 %v1940_v10, 16  ;;  %v1972_v17 = vshll.u32 %v1940_v10, 16  ;;  %v1882_v58 = vmul.f32 0.1, %v1780_v48  ;;  %v1783_v44 = vadd.f32 %v1782_v37, %v5474_v25  ;;  %v3905_v22 = vpop.f32.mrb[29].mxu1 }
 0x2b9   : > { %v5564_v47 = vrot.slane %v1976_v1, 7  ;;  %v1916_v30 = vmax.f32 %v1788_v19, %v1884_v28  ;;  %v1885_v39 = vmul.f32 0.1, %v1791_v23  ;;  %v3906_v21 = vadd.f32 %v3905_v22, %v3904_v36  ;;  %v3907_v54 = vpop.f32.mrb[30].mxu1 }
 0x2ba   : > { %v5566_v6 = vrot.slane %v1969_v38, 7  ;;  %v1914_v2 = vmax.f32 %v1780_v48, %v1882_v58  ;;  %v1883_v13 = vmul.f32 0.1, %v1783_v44  ;;  %v3908_v8 = vpop.f32.mrb[31].mxu1  ;;  %v2145_v62 = vshll.u32 %v5554_v14, 16 }
 0x2bb   : > { %v1981_v60 = vor.u32 %v1979_v27, %v5564_v47  ;;  %v1917_v0 = vmax.f32 %v1791_v23, %v1885_v39  ;;  %v3909_v35 = vadd.f32 %v3908_v8, %v3907_v54  ;;  %v1643_v25 = vadd.f32 %v3906_v21, %v5491_v26  ;;  %v4383_v27 = vld [vmem:[%s6643_s3 + $0x48] sm:$0xff]  }
 0x2bc   : > { %v1974_v34 = vor.u32 %v1972_v17, %v5566_v6  ;;  %v1915_v49 = vmax.f32 %v1783_v44, %v1883_v13  ;;  %v4244_v19 = vpop.f32.mrb[76].mxu0  ;;  %v2147_v7 = vrot.slane %v2145_v62, 1  ;;  %v2152_v10 = vrot.slane %v2150_v4, 1  ;;  %3980 = vmatprep.subr.bf16.mxu1 %v4383_v27 }
 0x2bd   : > { %v5574_v32 = vsel %vm4621_vm2, 0, %v1981_v60  ;;  %v1943_v48 = vpack.c.bf16 %v1917_v0, %v1916_v30  ;;  %v1804_v1 = vadd.f32 %v4244_v19, %v1643_v25  ;;  %v1795_v28 = vpop.f32.mrb[77].mxu0  ;;  %v1646_v36 = vadd.f32 %v3909_v35, %v5496_v59  ;;  %v4384_v0 = vld [vmem:[%s6643_s3 + $0x8] sm:$0xff]  }
 0x2be   : > { %v5582_v26 = vsel %vm4621_vm2, 0, %v1974_v34  ;;  %v1942_v23 = vpack.c.bf16 %v1915_v49, %v1914_v2  ;;  %v5584_v37 = vadd.f32 %v1795_v28, %v1635_v18  ;;  %v2148_v4 = vor.u32 %v2147_v7, %v2143_v50  ;;  %v4245_v38 = vpop.f32.mrb[78].mxu0  ;;  %3981 = vmatpush3.bf16.msra.mxu1 %v4384_v0 }
 0x2bf   : > { %v1990_v17 = vshrl.u32 %v1943_v48, 16  ;;  %v1993_v58 = vshll.u32 %v1943_v48, 16  ;;  %v1888_v44 = vmul.f32 0.1, %v1804_v1  ;;  %v1807_v22 = vadd.f32 %v4245_v38, %v1646_v36  ;;  %v3910_v30 = vpop.f32.mrb[32].mxu1  ;;  %v1798_v39 = vpop.f32.mrb[79].mxu0 }
 0x2c0   : > { %v1983_v59 = vshrl.u32 %v1942_v23, 16  ;;  %v1986_v21 = vshll.u32 %v1942_v23, 16  ;;  %v1886_v54 = vmul.f32 0.1, %v5584_v37  ;;  %v2153_v13 = vsel %vm515_vm3, %v2148_v4, %v2152_v10  ;;  %v3911_v8 = vpop.f32.mrb[33].mxu1 }
 0x2c1   : > { %v5588_v62 = vrot.slane %v1990_v17, 7  ;;  %v1920_v18 = vmax.f32 %v1804_v1, %v1888_v44  ;;  %2324 = vrot.lane.b32.xlu0 %v2153_v13, %s4513_s10  ;;  %v1889_v50 = vmul.f32 0.1, %v1807_v22  ;;  %v2131_v2 = vshrl.u32 %v5559_v42, 16  ;;  %v3913_v60 = vpop.f32.mrb[34].mxu1 }
 0x2c2   : > { %v5595_v35 = vrot.slane %v1983_v59, 7  ;;  %v1918_v25 = vmax.f32 %v5584_v37, %v1886_v54  ;;  %v2133_v34 = vshll.u32 %v5559_v42, 16  ;;  %v2138_v49 = vshll.u32 %v5550_v63, 16  ;;  %v3914_v19 = vpop.f32.mrb[35].mxu1 }
 0x2c3   : > { %v1995_v7 = vor.u32 %v1993_v58, %v5588_v62  ;;  %v1921_v10 = vmax.f32 %v1807_v22, %v1889_v50  ;;  %v1638_v48 = vadd.f32 %v5541_v45, %v5487_v55  ;;  %v3912_v1 = vadd.f32 %v3911_v8, %v3910_v30 }
 0x2c4   : > { %v1988_v28 = vor.u32 %v1986_v21, %v5595_v35  ;;  %v2135_v36 = vrot.slane %v2133_v34, 1  ;;  %v2140_v27 = vrot.slane %v2138_v49, 1  ;;  %v3915_v23 = vadd.f32 %v3914_v19, %v3913_v60  ;;  %v4248_v4 = vpop.f32.mrb[80].mxu0 }
 0x2c5   : > { %v5606_v37 = vsel %vm4621_vm2, 0, %v1995_v7  ;;  %v1945_v38 = vpack.c.bf16 %v1921_v10, %v1920_v18  ;;  %v1799_v17 = vadd.f32 %v1798_v39, %v1638_v48  ;;  %v1651_v58 = vadd.f32 %v3912_v1, %v5500_v46  ;;  %v1811_v44 = vpop.f32.mrb[81].mxu0 }
 0x2c6   : > { %v5611_v55 = vsel %vm4621_vm2, 0, %v1988_v28  ;;  %v2136_v45 = vor.u32 %v2135_v36, %v2131_v2  ;;  %v5616_v22 = vsel %vm4621_vm2, %v5564_v47, 0  ;;  %v2167_v30 = vshrl.u32 %v5574_v32, 16  ;;  %v5619_v59 = vpop.f32.mrb[82].mxu0 }
 0x2c7   : > { %v2004_v21 = vshrl.u32 %v1945_v38, 16  ;;  %v2007_v54 = vshll.u32 %v1945_v38, 16  ;;  %v1887_v39 = vmul.f32 0.1, %v1799_v17  ;;  %v5621_v13 = vadd.f32 %v1811_v44, %v1651_v58  ;;  %v3916_v46 = vpop.f32.mrb[36].mxu1  ;;  %v1814_v8 = vpop.f32.mrb[83].mxu0 }
 0x2c8   : > { %v2141_v18 = vsel %vm515_vm3, %v2136_v45, %v2140_v27  ;;  %v2169_v50 = vshll.u32 %v5574_v32, 16  ;;  %v2174_v2 = vshll.u32 %v5616_v22, 16  ;;  %v5629_v47 = vsel %vm4621_vm2, %v5566_v6, 0  ;;  %v3917_v60 = vpop.f32.mrb[37].mxu1 }
 0x2c9   : > { %v5631_v0 = vrot.slane %v2004_v21, 7  ;;  %2322 = vrot.lane.b32.xlu1 %v2141_v18, %s4513_s10  ;;  %v1919_v34 = vmax.f32 %v1799_v17, %v1887_v39  ;;  %v1890_v49 = vmul.f32 0.1, %v5621_v13  ;;  %v2155_v19 = vshrl.u32 %v5582_v26, 16  ;;  %v3919_v7 = vpop.f32.mrb[38].mxu1 }
 0x2ca   : > { %v2171_v10 = vrot.slane %v2169_v50, 1  ;;  %v2176_v48 = vrot.slane %v2174_v2, 1  ;;  %v2157_v1 = vshll.u32 %v5582_v26, 16  ;;  %v2162_v28 = vshll.u32 %v5629_v47, 16  ;;  %v3920_v36 = vpop.f32.mrb[39].mxu1 }
 0x2cb   : > { %v2009_v6 = vor.u32 %v2007_v54, %v5631_v0  ;;  %v1944_v27 = vpack.c.bf16 %v1919_v34, %v1918_v25  ;;  %v1922_v38 = vmax.f32 %v5621_v13, %v1890_v49  ;;  %v1654_v58 = vadd.f32 %v3915_v23, %v5504_v51  ;;  %v4385_v13 = vld [vmem:[%s6643_s3 + $0x50] sm:$0xff]  }
 0x2cc   : > { %v2172_v17 = vor.u32 %v2171_v10, %v2167_v30  ;;  %v2159_v44 = vrot.slane %v2157_v1, 1  ;;  %v2164_v45 = vrot.slane %v2162_v28, 1  ;;  %v3918_v21 = vadd.f32 %v3917_v60, %v3916_v46  ;;  %v5641_v39 = vpop.f32.mrb[84].mxu0  ;;  %3982 = vmatprep.subr.bf16.mxu1 %v4385_v13 }
 0x2cd   : > { %v5645_v18 = vsel %vm4621_vm2, 0, %v2009_v6  ;;  %v1997_v50 = vshrl.u32 %v1944_v27, 16  ;;  %v2000_v2 = vshll.u32 %v1944_v27, 16  ;;  %v1815_v12 = vadd.f32 %v1814_v8, %v1654_v58  ;;  %v5647_v9 = vpop.f32.mrb[85].mxu0 }
 0x2ce   : > { %v2177_v25 = vsel %vm515_vm3, %v2172_v17, %v2176_v48  ;;  %v2160_v54 = vor.u32 %v2159_v44, %v2155_v19  ;;  %v1659_v51 = vadd.f32 %v3918_v21, %v5508_v61  ;;  %v3921_v23 = vadd.f32 %v3920_v36, %v3919_v7  ;;  %v5651_v30 = vpop.f32.mrb[86].mxu0 }
 0x2cf   : > { %v5656_v46 = vrot.slane %v1997_v50, 7  ;;  %2328 = vrot.lane.b32.xlu0 %v2177_v25, %s4513_s10  ;;  %v1891_v60 = vmul.f32 0.1, %v1815_v12  ;;  %v5662_v8 = vsel %vm4621_vm2, %v5588_v62, 0  ;;  %v2191_v34 = vshrl.u32 %v5606_v37, 16  ;;  %v3922_v61 = vpop.f32.mrb[40].mxu1 }
 0x2d0   : > { %v2165_v49 = vsel %vm515_vm3, %v2160_v54, %v2164_v45  ;;  %v1820_v19 = vadd.f32 %v4248_v4, %v1659_v51  ;;  %v1662_v7 = vadd.f32 %v3921_v23, %v5512_v29  ;;  %v2193_v10 = vshll.u32 %v5606_v37, 16  ;;  %v3923_v48 = vpop.f32.mrb[41].mxu1  ;;  %v1830_v1 = vpop.f32.mrb[87].mxu0  ;;  %v4386_v45 = vld [vmem:[%s6643_s3 + $0x10] sm:$0xff]  }
 0x2d1   : > { %v2002_v28 = vor.u32 %v2000_v2, %v5656_v46  ;;  %2326 = vrot.lane.b32.xlu1 %v2165_v49, %s4513_s10  ;;  %v1923_v36 = vmax.f32 %v1815_v12, %v1891_v60  ;;  %v2198_v62 = vshll.u32 %v5662_v8, 16  ;;  %v5674_v6 = vsel %vm4621_vm2, %v5595_v35, 0  ;;  %v3925_v4 = vpop.f32.mrb[42].mxu1  ;;  %3983 = vmatpush3.bf16.msra.mxu1 %v4386_v45 }
 0x2d2   : > { %v1892_v27 = vmul.f32 0.1, %v1820_v19  ;;  %v1823_v29 = vadd.f32 %v5619_v59, %v1662_v7  ;;  %v2195_v58 = vrot.slane %v2193_v10, 1  ;;  %v2179_v17 = vshrl.u32 %v5611_v55, 16  ;;  %v3926_v44 = vpop.f32.mrb[43].mxu1 }
 0x2d3   : > { %v5683_v12 = vsel %vm4621_vm2, 0, %v2002_v28  ;;  %v1946_v21 = vpack.c.bf16 %v1923_v36, %v1922_v38  ;;  %v2200_v50 = vrot.slane %v2198_v62, 1  ;;  %v2181_v35 = vshll.u32 %v5611_v55, 16 }
 0x2d4   : > { %v1924_v2 = vmax.f32 %v1820_v19, %v1892_v27  ;;  %v1893_v25 = vmul.f32 0.1, %v1823_v29  ;;  %v2196_v54 = vor.u32 %v2195_v58, %v2191_v34  ;;  %v2186_v59 = vshll.u32 %v5674_v6, 16  ;;  %v5687_v51 = vpop.f32.mrb[88].mxu0 }
 0x2d5   : > { %v2011_v23 = vshrl.u32 %v1946_v21, 16  ;;  %v2014_v13 = vshll.u32 %v1946_v21, 16  ;;  %v2183_v60 = vrot.slane %v2181_v35, 1  ;;  %v3924_v49 = vadd.f32 %v3923_v48, %v3922_v61  ;;  %v5689_v7 = vpop.f32.mrb[89].mxu0 }
 0x2d6   : > { %v1925_v10 = vmax.f32 %v1823_v29, %v1893_v25  ;;  %v2201_v38 = vsel %vm515_vm3, %v2196_v54, %v2200_v50  ;;  %v2188_v28 = vrot.slane %v2186_v59, 1  ;;  %v3927_v36 = vadd.f32 %v3926_v44, %v3925_v4  ;;  %v5692_v62 = vpop.f32.mrb[90].mxu0 }
 0x2d7   : > { %v2013_v19 = vrot.slane %v2011_v23, 7  ;;  %2332 = vrot.lane.b32.xlu0 %v2201_v38, %s4513_s10  ;;  %v2184_v34 = vor.u32 %v2183_v60, %v2179_v17  ;;  %v1667_v27 = vadd.f32 %v3924_v49, %v5516_v41  ;;  %v5699_v58 = vsel %vm4621_vm2, %v5631_v0, 0  ;;  %v3928_v61 = vpop.f32.mrb[44].mxu1  ;;  %v5701_v48 = vpop.f32.mrb[91].mxu0 }
 0x2d8   : > { %6663 = vst [vmem:[#allocation8_spill] sm:$0xff] %v5699_v58  ;;  %v5703_v29 = vpack.c.bf16 %v1925_v10, %v1924_v2  ;;  %v2215_v4 = vshrl.u32 %v5645_v18, 16  ;;  %v2217_v44 = vshll.u32 %v5645_v18, 16  ;;  %v2222_v45 = vshll.u32 %v5699_v58, 16  ;;  %v3929_v21 = vpop.f32.mrb[45].mxu1 }
 0x2d9   : > { %v2016_v17 = vor.u32 %v2014_v13, %v2013_v19  ;;  %v2189_v41 = vsel %vm515_vm3, %v2184_v34, %v2188_v28  ;;  %v1828_v50 = vadd.f32 %v5647_v9, %v1667_v27  ;;  %v1670_v0 = vadd.f32 %v3927_v36, %v5520_v33  ;;  %v3931_v35 = vpop.f32.mrb[46].mxu1 }
 0x2da   : > { %v2021_v25 = vshll.u32 %v5703_v29, 16  ;;  %2330 = vrot.lane.b32.xlu1 %v2189_v41, %s4513_s10  ;;  %v2219_v2 = vrot.slane %v2217_v44, 1  ;;  %v2224_v54 = vrot.slane %v2222_v45, 1  ;;  %v5716_v59 = vsel %vm4621_vm2, %v5656_v46, 0  ;;  %v3932_v23 = vpop.f32.mrb[47].mxu1 }
 0x2db   : > { %v5720_v13 = vsel %vm4621_vm2, 0, %v2016_v17  ;;  %v1894_v9 = vmul.f32 0.1, %v1828_v50  ;;  %v1831_v60 = vadd.f32 %v1830_v1, %v1670_v0  ;;  %v2203_v33 = vshrl.u32 %v5683_v12, 16 }
 0x2dc   : > { %v2220_v49 = vor.u32 %v2219_v2, %v2215_v4  ;;  %v2205_v10 = vshll.u32 %v5683_v12, 16  ;;  %v2210_v38 = vshll.u32 %v5716_v59, 16  ;;  %v3930_v28 = vadd.f32 %v3929_v21, %v3928_v61  ;;  %v5725_v36 = vpop.f32.mrb[92].mxu0 }
 0x2dd   : > { %v1926_v34 = vmax.f32 %v1828_v50, %v1894_v9  ;;  %v1895_v46 = vmul.f32 0.1, %v1831_v60  ;;  %v3933_v27 = vadd.f32 %v3932_v23, %v3931_v35  ;;  %v5729_v44 = vsel %vm4621_vm2, %v2013_v19, 0  ;;  %v5731_v45 = vpop.f32.mrb[93].mxu0 }
 0x2de   : > { %6664 = vst [vmem:[#allocation9_spill] sm:$0xff] %v5729_v44  ;;  %v2225_v1 = vsel %vm515_vm3, %v2220_v49, %v2224_v54  ;;  %v2207_v17 = vrot.slane %v2205_v10, 1  ;;  %v2212_v4 = vrot.slane %v2210_v38, 1  ;;  %v1675_v41 = vadd.f32 %v3930_v28, %v5524_v40  ;;  %v5735_v0 = vpop.f32.mrb[94].mxu0  ;;  %v4387_v54 = vld [vmem:[%s6643_s3 + $0x58] sm:$0xff]  }
 0x2df   : > { %2336 = vrot.lane.b32.xlu0 %v2225_v1, %s4513_s10  ;;  %v1927_v61 = vmax.f32 %v1831_v60, %v1895_v46  ;;  %v1678_v21 = vadd.f32 %v3933_v27, %v5528_v52  ;;  %v2227_v50 = vshrl.u32 %v5720_v13, 16  ;;  %v2229_v19 = vshll.u32 %v5720_v13, 16  ;;  %v3934_v35 = vpop.f32.mrb[48].mxu1  ;;  %v5741_v2 = vpop.f32.mrb[95].mxu0  ;;  %3984 = vmatprep.subr.bf16.mxu1 %v4387_v54 }
 0x2e0   : > { %v2208_v23 = vor.u32 %v2207_v17, %v2203_v33  ;;  %v1836_v40 = vadd.f32 %v5641_v39, %v1675_v41  ;;  %v2234_v9 = vshll.u32 %v5729_v44, 16  ;;  %v3935_v49 = vpop.f32.mrb[49].mxu1  ;;  %v2018_v60 = vshrl.u32 %v5703_v29, 16 }
 0x2e1   : > { %v1948_v52 = vpack.c.bf16 %v1927_v61, %v1926_v34  ;;  %v1839_v10 = vadd.f32 %v5651_v30, %v1678_v21  ;;  %v2231_v38 = vrot.slane %v2229_v19, 1  ;;  %v3936_v28 = vadd.f32 %v3935_v49, %v3934_v35  ;;  %v3937_v46 = vpop.f32.mrb[50].mxu1  ;;  %v4388_v30 = vld [vmem:[%s6643_s3 + $0x18] sm:$0xff]  }
 0x2e2   : > { %v2213_v27 = vsel %vm515_vm3, %v2208_v23, %v2212_v4  ;;  %v1896_v1 = vmul.f32 0.1, %v1836_v40  ;;  %v2236_v56 = vrot.slane %v2234_v9, 1  ;;  %v3938_v58 = vpop.f32.mrb[51].mxu1  ;;  %v2020_v33 = vrot.slane %v2018_v60, 7  ;;  %3985 = vmatpush3.bf16.msra.mxu1 %v4388_v30 }
 0x2e3   : > { %v2025_v17 = vshrl.u32 %v1948_v52, 16  ;;  %v2028_v39 = vshll.u32 %v1948_v52, 16  ;;  %2334 = vrot.lane.b32.xlu1 %v2213_v27, %s4513_s10  ;;  %v1897_v41 = vmul.f32 0.1, %v1839_v10  ;;  %v2232_v44 = vor.u32 %v2231_v38, %v2227_v50 }
 0x2e4   : > { %v1928_v29 = vmax.f32 %v1836_v40, %v1896_v1  ;;  %v3939_v34 = vadd.f32 %v3938_v58, %v3937_v46  ;;  %v1683_v61 = vadd.f32 %v3936_v28, %v5532_v11  ;;  %v2023_v21 = vor.u32 %v2021_v25, %v2020_v33 }
 0x2e5   : > { %v2027_v4 = vrot.slane %v2025_v17, 7  ;;  %v1929_v19 = vmax.f32 %v1839_v10, %v1897_v41  ;;  %v2237_v35 = vsel %vm515_vm3, %v2232_v44, %v2236_v56  ;;  %v5759_v54 = vsel %vm4621_vm2, %v2020_v33, 0 }
 0x2e6   : > { %2338 = vrot.lane.b32.xlu0 %v2237_v35, %s4513_s10  ;;  %v1844_v50 = vadd.f32 %v5689_v7, %v1683_v61  ;;  %v5765_v23 = vsel %vm4621_vm2, 0, %v2023_v21  ;;  %v2246_v11 = vshll.u32 %v5759_v54, 16  ;;  %v1686_v58 = vadd.f32 %v3939_v34, %v5537_v3 }
 0x2e7   : > { %v1530_v56 = vadd.f32 %v5436_v5, %v5416_v31  ;;  %v2030_v25 = vor.u32 %v2028_v39, %v2027_v4  ;;  %v1949_v44 = vpack.c.bf16 %v1929_v19, %v1928_v29  ;;  %v2241_v40 = vshll.u32 %v5765_v23, 16  ;;  %v3940_v9 = vpop.f32.mrb[52].mxu1 }
 0x2e8   : > { %v1533_v49 = vadd.f32 %v5438_v53, %v5416_v31  ;;  %v1898_v7 = vmul.f32 0.1, %v1844_v50  ;;  %v1847_v60 = vadd.f32 %v5701_v48, %v1686_v58  ;;  %v3941_v52 = vpop.f32.mrb[53].mxu1  ;;  %v5777_v10 = vsel %vm4621_vm2, %v2027_v4, 0 }
 0x2e9   : > { %v5781_v3 = vsel %vm4621_vm2, 0, %v2030_v25  ;;  %v2239_v5 = vshrl.u32 %v5765_v23, 16  ;;  %v2243_v38 = vrot.slane %v2241_v40, 1  ;;  %v3942_v28 = vadd.f32 %v3941_v52, %v3940_v9  ;;  %v3943_v46 = vpop.f32.mrb[54].mxu1 }
 0x2ea   : > { %v1930_v27 = vmax.f32 %v1844_v50, %v1898_v7  ;;  %v2248_v1 = vrot.slane %v2246_v11, 1  ;;  %v1899_v53 = vmul.f32 0.1, %v1847_v60  ;;  %v3944_v33 = vpop.f32.mrb[55].mxu1  ;;  %v2253_v48 = vshll.u32 %v5781_v3, 16 }
 0x2eb   : > { %v2244_v17 = vor.u32 %v2243_v38, %v2239_v5  ;;  %v1691_v39 = vadd.f32 %v3942_v28, %v1530_v56  ;;  %v3945_v41 = vadd.f32 %v3944_v33, %v3943_v46  ;;  %v2258_v30 = vshll.u32 %v5777_v10, 16 }
 0x2ec   : > { %v1931_v29 = vmax.f32 %v1847_v60, %v1899_v53  ;;  %v2251_v34 = vshrl.u32 %v5781_v3, 16  ;;  %v2255_v61 = vrot.slane %v2253_v48, 1  ;;  %v2032_v21 = vshrl.u32 %v1949_v44, 16  ;;  %v4389_v60 = vld [vmem:[%s6643_s3 + $0x60] sm:$0xff]  }
 0x2ed   : > { %v2035_v4 = vshll.u32 %v1949_v44, 16  ;;  %v2249_v19 = vsel %vm515_vm3, %v2244_v17, %v2248_v1  ;;  %v1852_v35 = vadd.f32 %v5687_v51, %v1691_v39  ;;  %v1694_v50 = vadd.f32 %v3945_v41, %v1533_v49  ;;  %3986 = vmatprep.subr.bf16.mxu1 %v4389_v60 }
 0x2ee   : > { %2340 = vrot.lane.b32.xlu0 %v2249_v19, %s4513_s10  ;;  %v1950_v11 = vpack.c.bf16 %v1931_v29, %v1930_v27  ;;  %v2256_v58 = vor.u32 %v2255_v61, %v2251_v34  ;;  %v2260_v25 = vrot.slane %v2258_v30, 1  ;;  %v2034_v56 = vrot.slane %v2032_v21, 7  ;;  %v4390_v30 = vld [vmem:[%s6643_s3 + $0x20] sm:$0xff]  }
 0x2ef   : > { %v1900_v40 = vmul.f32 0.1, %v1852_v35  ;;  %v1855_v9 = vadd.f32 %v5692_v62, %v1694_v50  ;;  %v3946_v7 = vpop.f32.mrb[56].mxu1  ;;  %v1538_v44 = vadd.f32 %v5454_v15, %v5416_v31  ;;  %v1541_v38 = vadd.f32 %v5456_v57, %v5416_v31  ;;  %3987 = vmatpush3.bf16.msra.mxu1 %v4390_v30 }
 0x2f0   : > { %v2039_v52 = vshrl.u32 %v1950_v11, 16  ;;  %v2261_v51 = vsel %vm515_vm3, %v2256_v58, %v2260_v25  ;;  %v3947_v49 = vpop.f32.mrb[57].mxu1  ;;  %v2037_v5 = vor.u32 %v2035_v4, %v2034_v56  ;;  %v5801_v62 = vsel %vm4621_vm2, %v2034_v56, 0 }
 0x2f1   : > { %v1901_v28 = vmul.f32 0.1, %v1855_v9  ;;  %v3948_v46 = vadd.f32 %v3947_v49, %v3946_v7  ;;  %v3949_v27 = vpop.f32.mrb[58].mxu1  ;;  %v2042_v53 = vshll.u32 %v1950_v11, 16  ;;  %v1932_v33 = vmax.f32 %v1852_v35, %v1900_v40 }
 0x2f2   : > { %v2041_v1 = vrot.slane %v2039_v52, 7  ;;  %2342 = vrot.lane.b32.xlu0 %v2261_v51, %s4513_s10  ;;  %v3950_v15 = vpop.f32.mrb[59].mxu1  ;;  %v5806_v48 = vsel %vm4621_vm2, 0, %v2037_v5  ;;  %v2270_v41 = vshll.u32 %v5801_v62, 16  ;;  %v1546_v58 = vadd.f32 %v5464_v20, %v5416_v31 }
 0x2f3   : > { %v1933_v17 = vmax.f32 %v1855_v9, %v1901_v28  ;;  %v3951_v57 = vadd.f32 %v3950_v15, %v3949_v27  ;;  %v1699_v39 = vadd.f32 %v3948_v46, %v1538_v44  ;;  %v2265_v34 = vshll.u32 %v5806_v48, 16 }
 0x2f4   : > { %v2044_v29 = vor.u32 %v2042_v53, %v2041_v1  ;;  %v5816_v19 = vsel %vm4621_vm2, %v2041_v1, 0  ;;  %v2263_v50 = vshrl.u32 %v5806_v48, 16  ;;  %v2272_v56 = vrot.slane %v2270_v41, 1 }
 0x2f5   : > { %v1951_v61 = vpack.c.bf16 %v1933_v17, %v1932_v33  ;;  %v1860_v21 = vadd.f32 %v5731_v45, %v1699_v39  ;;  %v1702_v4 = vadd.f32 %v3951_v57, %v1541_v38  ;;  %v2267_v11 = vrot.slane %v2265_v34, 1 }
 0x2f6   : > { %v5820_v35 = vsel %vm4621_vm2, 0, %v2044_v29  ;;  %v2282_v44 = vshll.u32 %v5816_v19, 16  ;;  %v1549_v51 = vadd.f32 %v5466_v16, %v5416_v31 }
 0x2f7   : > { %v1902_v25 = vmul.f32 0.1, %v1860_v21  ;;  %v1863_v45 = vadd.f32 %v5741_v2, %v1702_v4  ;;  %v3952_v40 = vpop.f32.mrb[60].mxu1  ;;  %v2268_v9 = vor.u32 %v2267_v11, %v2263_v50  ;;  %v2277_v60 = vshll.u32 %v5820_v35, 16 }
 0x2f8   : > { %v3953_v7 = vpop.f32.mrb[61].mxu1  ;;  %v2046_v52 = vshrl.u32 %v1951_v61, 16  ;;  %v2049_v49 = vshll.u32 %v1951_v61, 16  ;;  %v2275_v2 = vshrl.u32 %v5820_v35, 16  ;;  %v2284_v39 = vrot.slane %v2282_v44, 1 }
 0x2f9   : > { %v1903_v5 = vmul.f32 0.1, %v1863_v45  ;;  %v3954_v38 = vadd.f32 %v3953_v7, %v3952_v40  ;;  %v3955_v28 = vpop.f32.mrb[62].mxu1  ;;  %v2273_v20 = vsel %vm515_vm3, %v2268_v9, %v2272_v56  ;;  %v2279_v27 = vrot.slane %v2277_v60, 1 }
 0x2fa   : > { %v3956_v46 = vpop.f32.mrb[63].mxu1  ;;  %v2048_v1 = vrot.slane %v2046_v52, 7  ;;  %v1934_v53 = vmax.f32 %v1860_v21, %v1902_v25  ;;  %2344 = vrot.lane.b32.xlu0 %v2273_v20, %s4513_s10  ;;  %v4392_v52 = vld [vmem:[%s6643_s3 + $0x28] sm:$0xff]  }
 0x2fb   : > { %v1935_v33 = vmax.f32 %v1863_v45, %v1903_v5  ;;  %v1707_v15 = vadd.f32 %v3954_v38, %v1546_v58  ;;  %v3957_v17 = vadd.f32 %v3956_v46, %v3955_v28  ;;  %v2280_v57 = vor.u32 %v2279_v27, %v2275_v2 }
 0x2fc   : > { %v2051_v31 = vor.u32 %v2049_v49, %v2048_v1  ;;  %v5836_v29 = vsel %vm4621_vm2, %v2048_v1, 0 }
 0x2fd   : > { %v1952_v16 = vpack.c.bf16 %v1935_v33, %v1934_v53  ;;  %v1868_v41 = vadd.f32 %v5725_v36, %v1707_v15  ;;  %v1710_v30 = vadd.f32 %v3957_v17, %v1549_v51  ;;  %v2285_v34 = vsel %vm515_vm3, %v2280_v57, %v2284_v39  ;;  %v4391_v36 = vld [vmem:[%s6643_s3 + $0x68] sm:$0xff]  }
 0x2fe   : > { %v5841_v61 = vsel %vm4621_vm2, 0, %v2051_v31  ;;  %2346 = vrot.lane.b32.xlu0 %v2285_v34, %s4513_s10  ;;  %v2294_v58 = vshll.u32 %v5836_v29, 16  ;;  %3988 = vmatprep.subr.bf16.mxu1 %v4391_v36  ;;  %v4393_v31 = vld [vmem:[%s6643_s3 + $0x70] sm:$0xff]  }
 0x2ff   : > { %v2053_v21 = vshrl.u32 %v1952_v16, 16  ;;  %v1904_v4 = vmul.f32 0.1, %v1868_v41  ;;  %v1871_v50 = vadd.f32 %v5735_v0, %v1710_v30  ;;  %v2289_v11 = vshll.u32 %v5841_v61, 16  ;;  %3989 = vmatpush3.bf16.msra.mxu1 %v4392_v52  ;;  %v4402_v52 = vld [vmem:[%s6643_s3 + $0xd0] sm:$0xff]  }
 0x300   : > { %v2056_v56 = vshll.u32 %v1952_v16, 16  ;;  %v2287_v40 = vshrl.u32 %v5841_v61, 16  ;;  %v2296_v49 = vrot.slane %v2294_v58, 1  ;;  %v4394_v16 = vld [vmem:[%s6643_s3 + $0x30] sm:$0xff]   ;;  %3990 = vmatprep.subr.bf16.mxu1 %v4393_v31 }
 0x301   : > { %v2055_v25 = vrot.slane %v2053_v21, 7  ;;  %v1905_v45 = vmul.f32 0.1, %v1871_v50  ;;  %v2291_v9 = vrot.slane %v2289_v11, 1  ;;  %v1936_v60 = vmax.f32 %v1868_v41, %v1904_v4  ;;  %v4411_v31 = vld [vmem:[%s6643_s3 + $0xb0] sm:$0xff]  }
 0x303   : > { %v2058_v7 = vor.u32 %v2056_v56, %v2055_v25  ;;  %v1937_v0 = vmax.f32 %v1871_v50, %v1905_v45  ;;  %v5853_v44 = vsel %vm4621_vm2, %v2055_v25, 0  ;;  %v2292_v51 = vor.u32 %v2291_v9, %v2287_v40  ;;  %3991 = vmatpush3.bf16.msra.mxu1 %v4394_v16  ;;  %v4396_v25 = vld [vmem:[%s6643_s3 + $0x38] sm:$0xff]   ;;  %v4397_v56 = vld [vmem:[%s6643_s3 + $0xc0] sm:$0xff]  }
 0x304   : > { %v2306_v46 = vshll.u32 %v5853_v44, 16  ;;  %3992 = vmatprep.subr.bf16.mxu1 %v4395_v43  ;;  %v4398_v45 = vld [vmem:[%s6643_s3 + $0x80] sm:$0xff]   ;;  %4090 = vmatprep.subr.bf16.mxu0 %v4397_v56 }
 0x305   : > { %v5860_v5 = vsel %vm4621_vm2, 0, %v2058_v7  ;;  %v1953_v38 = vpack.c.bf16 %v1937_v0, %v1936_v60  ;;  %v2297_v28 = vsel %vm515_vm3, %v2292_v51, %v2296_v49  ;;  %4091 = vmatpush3.bf16.msra.mxu0 %v4398_v45  ;;  %v5903_v40 = vld [vmem:[%s6643_s3 + $0x100] sm:$0xff]   ;;  %v4400_v60 = vld [vmem:[%s6643_s3 + $0xc8] sm:$0xff]   ;;  %v4403_v51 = vld [vmem:[%s6643_s3 + $0x90] sm:$0xff]   ;;  %v2386_v45 = vrot.slane %v5559_v42, 1 }
 0x306   : > { %v2301_v20 = vshll.u32 %v5860_v5, 16  ;;  %2348 = vrot.lane.b32.xlu0 %v2297_v28, %s4513_s10  ;;  %v2299_v27 = vshrl.u32 %v5860_v5, 16  ;;  %v2308_v17 = vrot.slane %v2306_v46, 1  ;;  %v4401_v0 = vld [vmem:[%s6643_s3 + $0x88] sm:$0xff]   ;;  %4092 = vmatprep.subr.bf16.mxu0 %v4400_v60  ;;  %v4406_v46 = vld [vmem:[%s6643_s3 + $0xe0] sm:$0xff]  }
 0x307   : > { %v2060_v2 = vshrl.u32 %v1953_v38, 16  ;;  %v2063_v53 = vshll.u32 %v1953_v38, 16  ;;  %3993 = vmatpush3.bf16.msra.mxu1 %v4396_v25  ;;  %v4404_v38 = vld [vmem:[%s6643_s3 + $0xd8] sm:$0xff]  }
 0x308   : > { %v2303_v1 = vrot.slane %v2301_v20, 1  ;;  %4262 = vmatprep.subr.bf16.mxu1 %v5903_v40  ;;  %v4405_v20 = vld [vmem:[%s6643_s3 + $0x98] sm:$0xff]  }
 0x309   : > { %v2062_v33 = vrot.slane %v2060_v2, 7  ;;  %4093 = vmatpush3.bf16.msra.mxu0 %v4401_v0  ;;  %v4407_v2 = vld [vmem:[%s6643_s3 + $0xa0] sm:$0xff]   ;;  %v2389_v0 = vrot.slane %v5554_v14, 1 }
 0x30a   : > { %v2304_v15 = vor.u32 %v2303_v1, %v2299_v27  ;;  %4094 = vmatprep.subr.bf16.mxu0 %v4402_v52  ;;  %v2390_v52 = vrot.slane %v5546_v24, 1 }
 0x30b   : > { %v2065_v57 = vor.u32 %v2063_v53, %v2062_v33  ;;  %v5869_v39 = vsel %vm4621_vm2, %v2062_v33, 0  ;;  %v4408_v53 = vld [vmem:[%s6643_s3 + $0xe8] sm:$0xff]  }
 0x30c   : > { %v2309_v41 = vsel %vm515_vm3, %v2304_v15, %v2308_v17  ;;  %v2318_v21 = vshll.u32 %v5869_v39, 16  ;;  %v4409_v33 = vld [vmem:[%s6643_s3 + $0xa8] sm:$0xff]  }
 0x30d   : > { %2350 = vrot.lane.b32.xlu0 %v2309_v41, %s4513_s10  ;;  %v5881_v30 = vsel %vm4621_vm2, 0, %v2065_v57  ;;  %4095 = vmatpush3.bf16.msra.mxu0 %v4403_v51  ;;  %v4410_v57 = vld [vmem:[%s6643_s3 + $0xf0] sm:$0xff]  }
 0x30e   : > { %v2313_v34 = vshll.u32 %v5881_v30, 16  ;;  %v2311_v4 = vshrl.u32 %v5881_v30, 16  ;;  %v2320_v11 = vrot.slane %v2318_v21, 1  ;;  %4096 = vmatprep.subr.bf16.mxu0 %v4404_v38  ;;  %v4413_v21 = vld [vmem:[%s6643_s3 + $0xb8] sm:$0xff]  }
 0x310   : > { %v2315_v50 = vrot.slane %v2313_v34, 1  ;;  %v4412_v34 = vld [vmem:[%s6643_s3 + $0xf8] sm:$0xff]  }
 0x311   : > { %4097 = vmatpush3.bf16.msra.mxu0 %v4405_v20 }
 0x312   : > { %v2316_v36 = vor.u32 %v2315_v50, %v2311_v4  ;;  %4098 = vmatprep.subr.bf16.mxu0 %v4406_v46  ;;  %v2395_v46 = vrot.slane %v5574_v32, 1 }
 0x314   : > { %v2321_v58 = vsel %vm515_vm3, %v2316_v36, %v2320_v11 }
 0x315   : > { %2352 = vrot.lane.b32.xlu0 %v2321_v58, %s4513_s10  ;;  %4099 = vmatpush3.bf16.msra.mxu0 %v4407_v2  ;;  %v2398_v2 = vrot.slane %v5611_v55, 1 }
 0x316   : > { %4100 = vmatprep.subr.bf16.mxu0 %v4408_v53 }
 0x319   : > { %4101 = vmatpush3.bf16.msra.mxu0 %v4409_v33  ;;  %v2401_v33 = vrot.slane %v5606_v37, 1 }
 0x31a   : > { %4102 = vmatprep.subr.bf16.mxu0 %v4410_v57  ;;  %v2404_v57 = vrot.slane %v5683_v12, 1 }
 0x31d   : > { %4103 = vmatpush3.bf16.msra.mxu0 %v4411_v31  ;;  %v2405_v31 = vrot.slane %v5716_v59, 1 }
 0x31e   : > { %4104 = vmatprep.subr.bf16.mxu0 %v4412_v34 }
 0x321   : > { %4105 = vmatpush3.bf16.msra.mxu0 %v4413_v21 }
 0x333   : > { %v2325_v9 = vpop.permute.xlu0 %2324 }
 0x334   : > { %v5908_v7 = vsel %vm834_vm4, %v5554_v14, %v2325_v9  ;;  %v2387_v9 = vrot.slane %v5550_v63, 1  ;;  %v2392_v63 = vrot.slane %v5582_v26, 1  ;;  %v2393_v14 = vrot.slane %v5629_v47, 1 }
 0x335   : > { %3176 = vmatprep.mubr.bf16.mxu0 %v5908_v7 }
 0x336   : > { %v6006_v60 = vsel %vm783_vm5, %v2386_v45, %v2387_v9  ;;  %v6030_v20 = vsel %vm783_vm5, %v2392_v63, %v2393_v14  ;;  %v2416_v45 = vrot.slane %v5781_v3, 1  ;;  %v2417_v9 = vrot.slane %v5777_v10, 1 }
 0x337   : > { %v2428_v10 = vrot.slane %v5860_v5, 1 }
 0x33b   : > { %v2323_v49 = vpop.permute.xlu1 %2322 }
 0x33c   : > { %v5928_v28 = vsel %vm834_vm4, %v5559_v42, %v2323_v49  ;;  %v6017_v49 = vsel %vm783_vm5, %v2389_v0, %v2390_v52  ;;  %v6105_v52 = vsel %vm783_vm5, %v2416_v45, %v2417_v9 }
 0x33d   : > { %2498 = vrot.lane.b32.xlu1 %v5928_v28, %s4513_s10 }
 0x341   : > { %2502 = vrot.lane.b32.xlu1 %v5908_v7, %s4513_s10  ;;  %v2329_v15 = vpop.permute.xlu0 %2328 }
 0x342   : > { %v5957_v17 = vsel %vm834_vm4, %v5574_v32, %v2329_v15 }
 0x343   : > { %v2327_v27 = vpop.permute.xlu1 %2326 }
 0x344   : > { %v5945_v1 = vsel %vm834_vm4, %v5582_v26, %v2327_v27  ;;  %v2396_v26 = vrot.slane %v5616_v22, 1  ;;  %v2399_v27 = vrot.slane %v5674_v6, 1 }
 0x345   : > { %2506 = vrot.lane.b32.xlu1 %v5945_v1, %s4513_s10 }
 0x346   : > { %v6039_v47 = vsel %vm783_vm5, %v2395_v46, %v2396_v26  ;;  %v6046_v32 = vsel %vm783_vm5, %v2398_v2, %v2399_v27  ;;  %v2425_v27 = vrot.slane %v5841_v61, 1 }
 0x349   : > { %2510 = vrot.lane.b32.xlu1 %v5957_v17, %s4513_s10  ;;  %v2333_v4 = vpop.permute.xlu0 %2332 }
 0x34a   : > { %v5981_v50 = vsel %vm834_vm4, %v5606_v37, %v2333_v4 }
 0x34c   : > { %v2331_v16 = vpop.permute.xlu1 %2330 }
 0x34d   : > { %v5969_v41 = vsel %vm834_vm4, %v5611_v55, %v2331_v16  ;;  %v2402_v55 = vrot.slane %v5662_v8, 1  ;;  %v6072_v8 = vsel %vm783_vm5, %v2404_v57, %v2405_v31  ;;  %v2407_v16 = vrot.slane %v5645_v18, 1 }
 0x34e   : > { %2514 = vrot.lane.b32.xlu1 %v5969_v41, %s4513_s10 }
 0x34f   : > { %v6059_v6 = vsel %vm783_vm5, %v2401_v33, %v2402_v55  ;;  %v6667_v55 = vld [vmem:[#allocation5_spill] sm:$0xff] }
 0x351   : > { %v2337_v36 = vpop.permute.xlu0 %2336 }
 0x352   : > { %2518 = vrot.lane.b32.xlu1 %v5981_v50, %s4513_s10  ;;  %v5997_v56 = vsel %vm834_vm4, %v5645_v18, %v2337_v36  ;;  %v2410_v36 = vrot.slane %v5720_v13, 1  ;;  %v6666_v18 = vld [vmem:[#allocation9_spill] sm:$0xff] }
 0x353   : > { %v2411_v59 = vrot.slane %v6666_v18, 1 }
 0x355   : > { %v2335_v11 = vpop.permute.xlu1 %2334 }
 0x356   : > { %v5987_v58 = vsel %vm834_vm4, %v5683_v12, %v2335_v11  ;;  %v6665_v12 = vld [vmem:[#allocation8_spill] sm:$0xff] }
 0x357   : > { %2522 = vrot.lane.b32.xlu1 %v5987_v58, %s4513_s10  ;;  %v2408_v34 = vrot.slane %v6665_v12, 1 }
 0x358   : > { %v2339_v43 = vpop.permute.xlu0 %2338 }
 0x359   : > { %v5993_v25 = vsel %vm834_vm4, %v5720_v13, %v2339_v43  ;;  %v6079_v4 = vsel %vm783_vm5, %v2407_v16, %v2408_v34  ;;  %v6092_v43 = vsel %vm783_vm5, %v2410_v36, %v2411_v59  ;;  %v4415_v16 = vld [vmem:[%s6643_s3 + $0x110] sm:$0xff]   ;;  %v4416_v34 = vld [vmem:[%s6643_s3 + $0x118] sm:$0xff]  }
 0x35a   : > { %2530 = vrot.lane.b32.xlu0 %v5993_v25, %s4513_s10 }
 0x35b   : > { %2526 = vrot.lane.b32.xlu1 %v5997_v56, %s4513_s10 }
 0x35f   : > { %2500 = vrot.lane.b32.xlu1 %v6006_v60, %s4513_s10 }
 0x360   : > { %v2341_v51 = vpop.permute.xlu0 %2340 }
 0x361   : > { %v6014_v42 = vsel %vm834_vm4, %v5765_v23, %v2341_v51  ;;  %v2422_v51 = vrot.slane %v5820_v35, 1 }
 0x362   : > { %2534 = vrot.lane.b32.xlu0 %v6014_v42, %s4513_s10 }
 0x363   : > { %2504 = vrot.lane.b32.xlu1 %v6017_v49, %s4513_s10 }
 0x364   : > { %v2343_v38 = vpop.permute.xlu0 %2342 }
 0x365   : > { %v6027_v24 = vsel %vm834_vm4, %v5781_v3, %v2343_v38  ;;  %v2423_v3 = vrot.slane %v5816_v19, 1  ;;  %v2429_v38 = vrot.slane %v5853_v44, 1  ;;  %v2419_v44 = vrot.slane %v5806_v48, 1 }
 0x366   : > { %2538 = vrot.lane.b32.xlu0 %v6027_v24, %s4513_s10 }
 0x367   : > { %2508 = vrot.lane.b32.xlu1 %v6030_v20, %s4513_s10  ;;  %v6112_v63 = vsel %vm783_vm5, %v2422_v51, %v2423_v3  ;;  %v6126_v19 = vsel %vm783_vm5, %v2428_v10, %v2429_v38 }
 0x36b   : > { %2512 = vrot.lane.b32.xlu1 %v6039_v47, %s4513_s10 }
 0x36c   : > { %v2345_v53 = vpop.permute.xlu0 %2344 }
 0x36d   : > { %v6051_v15 = vsel %vm834_vm4, %v5806_v48, %v2345_v53  ;;  %v2431_v48 = vrot.slane %v5881_v30, 1 }
 0x36e   : > { %2542 = vrot.lane.b32.xlu0 %v6051_v15, %s4513_s10 }
 0x36f   : > { %2516 = vrot.lane.b32.xlu1 %v6046_v32, %s4513_s10 }
 0x370   : > { %v2347_v22 = vpop.permute.xlu0 %2346 }
 0x371   : > { %v6064_v37 = vsel %vm834_vm4, %v5820_v35, %v2347_v22  ;;  %v2413_v35 = vrot.slane %v5765_v23, 1  ;;  %v2420_v23 = vrot.slane %v5801_v62, 1  ;;  %v2432_v62 = vrot.slane %v5869_v39, 1  ;;  %v4414_v22 = vld [vmem:[%s6643_s3 + $0x108] sm:$0xff]  }
 0x372   : > { %2546 = vrot.lane.b32.xlu0 %v6064_v37, %s4513_s10 }
 0x373   : > { %2520 = vrot.lane.b32.xlu1 %v6059_v6, %s4513_s10  ;;  %v6139_v2 = vsel %vm783_vm5, %v2419_v44, %v2420_v23  ;;  %v6153_v33 = vsel %vm783_vm5, %v2431_v48, %v2432_v62 }
 0x377   : > { %2524 = vrot.lane.b32.xlu1 %v6072_v8, %s4513_s10 }
 0x378   : > { %v2349_v21 = vpop.permute.xlu0 %2348 }
 0x379   : > { %v6084_v11 = vsel %vm834_vm4, %v5841_v61, %v2349_v21 }
 0x37a   : > { %2550 = vrot.lane.b32.xlu0 %v6084_v11, %s4513_s10 }
 0x37b   : > { %2528 = vrot.lane.b32.xlu1 %v6079_v4, %s4513_s10 }
 0x37f   : > { %2532 = vrot.lane.b32.xlu1 %v6092_v43, %s4513_s10  ;;  %v2351_v13 = vpop.permute.xlu0 %2350 }
 0x380   : > { %v6100_v0 = vsel %vm834_vm4, %v5860_v5, %v2351_v13  ;;  %v2414_v5 = vrot.slane %v5759_v54, 1  ;;  %v2426_v54 = vrot.slane %v5836_v29, 1 }
 0x381   : > { %2554 = vrot.lane.b32.xlu0 %v6100_v0, %s4513_s10 }
 0x382   : > { %v6132_v26 = vsel %vm783_vm5, %v2413_v35, %v2414_v5  ;;  %v6146_v53 = vsel %vm783_vm5, %v2425_v27, %v2426_v54 }
 0x383   : > { %2540 = vrot.lane.b32.xlu1 %v6105_v52, %s4513_s10 }
 0x387   : > { %2548 = vrot.lane.b32.xlu1 %v6112_v63, %s4513_s10  ;;  %v2353_v14 = vpop.permute.xlu0 %2352 }
 0x388   : > { %v6120_v46 = vsel %vm834_vm4, %v5881_v30, %v2353_v14  ;;  %v6668_v30 = vld [vmem:[#allocation6_spill] sm:$0xff] }
 0x389   : > { %2558 = vrot.lane.b32.xlu0 %v6120_v46, %s4513_s10 }
 0x38b   : > { %2556 = vrot.lane.b32.xlu1 %v6126_v19, %s4513_s10 }
 0x38d   : > { %2536 = vrot.lane.b32.xlu0 %v6132_v26, %s4513_s10 }
 0x391   : > { %2544 = vrot.lane.b32.xlu0 %v6139_v2, %s4513_s10 }
 0x395   : > { %2552 = vrot.lane.b32.xlu0 %v6146_v53, %s4513_s10 }
 0x399   : > { %2560 = vrot.lane.b32.xlu0 %v6153_v33, %s4513_s10  ;;  %s4515_s10 = smov [#allocation2]  }
 0x39a   : > { %s4453_s13 = sshll.u32 %s4515_s10, 4  ;;  %s4454_s13 = int_to_ptr.vmem [resolvable:$false] %s4453_s13 }
 0x39b   : > { %s4455_s14 = scalar_lea.vmem %s4454_s13, 8192  ;;  %p4456_p0 = scmp.lt.s32.totalorder %s6588_s6, %s4454_s13 }
 0x39c   : > { %p4457_p1 = scmp.lt.s32.totalorder %s4455_s14, %s4449_s12 }
 0x39e   : > { %p4458_p2 = por %p4457_p1, %p4456_p0 }
 0x3a0   : > { %p4459_p3 = pnand %p4458_p2, %p4452_p13 }
 0x3af   : > { %v2499_v61 = vpop.permute.xlu1 %2498 }
 0x3b0   : > { %v2595_v29 = vsel %vm834_vm4, %v6667_v55, %v2499_v61 }
 0x3b1   : > { %3015 = vmatprep.mubr.bf16.mxu1 %v2595_v29 }
 0x3b2   : > { %3708 = vmatmul.mubr.msk.bf16.vlgmr.msra.gmra.mrb[64].mxu1 %vm4992_vm6, %v6668_v30 }
 0x3b3   : > { %4263 = vmatpush3.bf16.msra.mxu1 %v5903_v40  ;;  %v2503_v39 = vpop.permute.xlu1 %2502 }
 0x3b4   : > { %v2599_v31 = vsel %vm834_vm4, %v6006_v60, %v2503_v39  ;;  %4264 = vmatprep.subr.bf16.mxu1 %v4414_v22 }
 0x3b5   : > { %3023 = vmatprep.mubr.bf16.mxu1 %v2599_v31 }
 0x3b7   : > { %v2507_v12 = vpop.permute.xlu1 %2506  ;;  %4265 = vmatpush3.bf16.msra.mxu1 %v4414_v22 }
 0x3b8   : > { %4266 = vmatprep.subr.bf16.mxu1 %v4415_v16  ;;  %v2603_v40 = vsel %vm834_vm4, %v6017_v49, %v2507_v12 }
 0x3ba   : > { %3024 = vmatmul.mubr.bf16.gmra.mrb[68].mxu1 %v5928_v28 }
 0x3bb   : > { %3031 = vmatprep.mubr.bf16.mxu1 %v2603_v40  ;;  %v2511_v60 = vpop.permute.xlu1 %2510  ;;  %4267 = vmatpush3.bf16.msra.mxu1 %v4415_v16 }
 0x3bc   : > { %4268 = vmatprep.subr.bf16.mxu1 %v4416_v34  ;;  %v2607_v36 = vsel %vm834_vm4, %v6030_v20, %v2511_v60 }
 0x3bf   : > { %4269 = vmatpush3.bf16.msra.mxu1 %v4416_v34 }
 0x3c0   : > { %v2515_v21 = vpop.permute.xlu1 %2514 }
 0x3c1   : > { %v2611_v28 = vsel %vm834_vm4, %v6039_v47, %v2515_v21 }
 0x3c2   : > { %3032 = vmatmul.mubr.bf16.gmra.mrb[72].mxu1 %v5908_v7 }
 0x3c3   : > { %3039 = vmatprep.mubr.bf16.mxu1 %v2607_v36 }
 0x3c4   : > { %v2519_v18 = vpop.permute.xlu1 %2518 }
 0x3c5   : > { %v2615_v7 = vsel %vm834_vm4, %v6046_v32, %v2519_v18 }
 0x3c9   : > { %v2523_v59 = vpop.permute.xlu1 %2522 }
 0x3ca   : > { %3040 = vmatmul.mubr.bf16.gmra.mrb[76].mxu1 %v5945_v1  ;;  %v2619_v10 = vsel %vm834_vm4, %v6059_v6, %v2523_v59 }
 0x3cb   : > { %3047 = vmatprep.mubr.bf16.mxu1 %v2611_v28 }
 0x3cc   : > { %v2531_v35 = vpop.permute.xlu0 %2530 }
 0x3cd   : > { %v2527_v45 = vpop.permute.xlu1 %2526 }
 0x3d1   : > { %v2501_v13 = vpop.permute.xlu1 %2500 }
 0x3d2   : > { %v2562_v9 = vsel %vm834_vm4, %v2499_v61, %v2501_v13  ;;  %3048 = vmatmul.mubr.bf16.gmra.mrb[80].mxu1 %v5957_v17 }
 0x3d3   : > { %3177 = vmatmul.mubr.bf16.vlgmr.msra.gmra.mrb[96].mxu0 %v2562_v9  ;;  %3055 = vmatprep.mubr.bf16.mxu1 %v2615_v7 }
 0x3d4   : > { %3184 = vmatprep.mubr.bf16.mxu0 %v5945_v1  ;;  %v2623_v1 = vsel %vm834_vm4, %v6072_v8, %v2527_v45  ;;  %v2535_v23 = vpop.permute.xlu0 %2534 }
 0x3d5   : > { %v2505_v51 = vpop.permute.xlu1 %2504 }
 0x3d6   : > { %v2563_v3 = vsel %vm834_vm4, %v2503_v39, %v2505_v51 }
 0x3d8   : > { %v2539_v48 = vpop.permute.xlu0 %2538 }
 0x3d9   : > { %v2509_v14 = vpop.permute.xlu1 %2508 }
 0x3da   : > { %3056 = vmatmul.mubr.bf16.gmra.mrb[84].mxu1 %v5969_v41  ;;  %v2564_v38 = vsel %vm834_vm4, %v2507_v12, %v2509_v14 }
 0x3db   : > { %3185 = vmatmul.mubr.bf16.gmra.mrb[100].mxu0 %v2563_v3  ;;  %3063 = vmatprep.mubr.bf16.mxu1 %v2619_v10 }
 0x3dc   : > { %3192 = vmatprep.mubr.bf16.mxu0 %v5957_v17  ;;  %v2627_v17 = vsel %vm834_vm4, %v6079_v4, %v2531_v35 }
 0x3dd   : > { %v2513_v5 = vpop.permute.xlu1 %2512 }
 0x3de   : > { %v2565_v44 = vsel %vm834_vm4, %v2511_v60, %v2513_v5 }
 0x3e0   : > { %v2543_v29 = vpop.permute.xlu0 %2542 }
 0x3e1   : > { %v2517_v27 = vpop.permute.xlu1 %2516 }
 0x3e2   : > { %3064 = vmatmul.mubr.bf16.gmra.mrb[88].mxu1 %v5981_v50  ;;  %v2566_v54 = vsel %vm834_vm4, %v2515_v21, %v2517_v27 }
 0x3e3   : > { %3193 = vmatmul.mubr.bf16.gmra.mrb[104].mxu0 %v2564_v38  ;;  %3071 = vmatprep.mubr.bf16.mxu1 %v2623_v1 }
 0x3e4   : > { %3200 = vmatprep.mubr.bf16.mxu0 %v5969_v41  ;;  %v2631_v41 = vsel %vm834_vm4, %v6092_v43, %v2535_v23  ;;  %v2547_v31 = vpop.permute.xlu0 %2546 }
 0x3e5   : > { %v2521_v62 = vpop.permute.xlu1 %2520 }
 0x3e6   : > { %v2567_v61 = vsel %vm834_vm4, %v2519_v18, %v2521_v62 }
 0x3e9   : > { %v2525_v22 = vpop.permute.xlu1 %2524 }
 0x3ea   : > { %3072 = vmatmul.mubr.bf16.gmra.mrb[92].mxu1 %v5987_v58  ;;  %v2568_v39 = vsel %vm834_vm4, %v2523_v59, %v2525_v22 }
 0x3eb   : > { %3201 = vmatmul.mubr.bf16.gmra.mrb[108].mxu0 %v2565_v44  ;;  %3079 = vmatprep.mubr.bf16.mxu1 %v2627_v17  ;;  %v6285_v44 = vld [vmem:[%s6644_s4] ss:$0 sm:$0xff] }
 0x3ec   : > { %3208 = vmatprep.mubr.bf16.mxu0 %v5981_v50  ;;  %v2635_v50 = vsel %vm834_vm4, %v6132_v26, %v2539_v48  ;;  %v2551_v12 = vpop.permute.xlu0 %2550 }
 0x3ed   : > { %v2529_v16 = vpop.permute.xlu1 %2528 }
 0x3ee   : > { %v2569_v34 = vsel %vm834_vm4, %v2527_v45, %v2529_v16 }
 0x3f1   : > { %v2533_v60 = vpop.permute.xlu1 %2532 }
 0x3f2   : > { %3080 = vmatmul.mubr.bf16.gmra.mrb[96].mxu1 %v5997_v56  ;;  %v2570_v36 = vsel %vm834_vm4, %v2531_v35, %v2533_v60 }
 0x3f3   : > { %3209 = vmatmul.mubr.bf16.gmra.mrb[112].mxu0 %v2566_v54  ;;  %3087 = vmatprep.mubr.bf16.mxu1 %v2631_v41  ;;  %v2555_v40 = vpop.permute.xlu0 %2554 }
 0x3f4   : > { %3216 = vmatprep.mubr.bf16.mxu0 %v5987_v58  ;;  %v2639_v58 = vsel %vm834_vm4, %v6105_v52, %v2543_v29 }
 0x3f5   : > { %v2541_v28 = vpop.permute.xlu1 %2540 }
 0x3f6   : > { %v2572_v45 = vsel %vm834_vm4, %v2539_v48, %v2541_v28 }
 0x3fa   : > { %3088 = vmatmul.mubr.bf16.gmra.mrb[100].mxu1 %v5993_v25 }
 0x3fb   : > { %3217 = vmatmul.mubr.bf16.gmra.mrb[116].mxu0 %v2567_v61  ;;  %3095 = vmatprep.mubr.bf16.mxu1 %v2635_v50  ;;  %v2559_v21 = vpop.permute.xlu0 %2558 }
 0x3fc   : > { %3224 = vmatprep.mubr.bf16.mxu0 %v5997_v56  ;;  %v2643_v56 = vsel %vm834_vm4, %v6139_v2, %v2547_v31 }
 0x3ff   : > { %v2537_v18 = vpop.permute.xlu0 %2536 }
 0x400   : > { %v2571_v59 = vsel %vm834_vm4, %v2535_v23, %v2537_v18 }
 0x402   : > { %3096 = vmatmul.mubr.bf16.gmra.mrb[104].mxu1 %v6014_v42 }
 0x403   : > { %3225 = vmatmul.mubr.bf16.gmra.mrb[120].mxu0 %v2568_v39  ;;  %3103 = vmatprep.mubr.bf16.mxu1 %v2639_v58  ;;  %v2545_v13 = vpop.permute.xlu0 %2544 }
 0x404   : > { %3232 = vmatprep.mubr.bf16.mxu0 %v5993_v25  ;;  %v2647_v25 = vsel %vm834_vm4, %v6112_v63, %v2551_v12  ;;  %v2573_v9 = vsel %vm834_vm4, %v2543_v29, %v2545_v13 }
 0x40a   : > { %3104 = vmatmul.mubr.bf16.gmra.mrb[108].mxu1 %v6027_v24 }
 0x40b   : > { %3233 = vmatmul.mubr.bf16.gmra.mrb[124].mxu0 %v2569_v34  ;;  %3111 = vmatprep.mubr.bf16.mxu1 %v2643_v56 }
 0x40c   : > { %3240 = vmatprep.mubr.bf16.mxu0 %v6014_v42  ;;  %v2651_v42 = vsel %vm834_vm4, %v6146_v53, %v2555_v40 }
 0x412   : > { %3112 = vmatmul.mubr.bf16.gmra.mrb[112].mxu1 %v6051_v15 }
 0x413   : > { %3241 = vmatmul.mubr.bf16.gmra.mrb[128].mxu0 %v2570_v36  ;;  %3119 = vmatprep.mubr.bf16.mxu1 %v2647_v25 }
 0x414   : > { %3248 = vmatprep.mubr.bf16.mxu0 %v6027_v24  ;;  %v2655_v24 = vsel %vm834_vm4, %v6126_v19, %v2559_v21 }
 0x41a   : > { %3120 = vmatmul.mubr.bf16.gmra.mrb[116].mxu1 %v6064_v37 }
 0x41b   : > { %3249 = vmatmul.mubr.bf16.gmra.mrb[132].mxu0 %v2571_v59  ;;  %3127 = vmatprep.mubr.bf16.mxu1 %v2651_v42 }
 0x41c   : > { %3256 = vmatprep.mubr.bf16.mxu0 %v6051_v15  ;;  %v2549_v15 = vpop.permute.xlu1 %2548 }
 0x41d   : > { %v2574_v7 = vsel %vm834_vm4, %v2547_v31, %v2549_v15 }
 0x422   : > { %3128 = vmatmul.mubr.bf16.gmra.mrb[120].mxu1 %v6084_v11 }
 0x423   : > { %3257 = vmatmul.mubr.bf16.gmra.mrb[136].mxu0 %v2572_v45  ;;  %3135 = vmatprep.mubr.bf16.mxu1 %v2655_v24 }
 0x424   : > { %3264 = vmatprep.mubr.bf16.mxu0 %v6064_v37  ;;  %v2553_v37 = vpop.permute.xlu0 %2552 }
 0x425   : > { %v2575_v51 = vsel %vm834_vm4, %v2551_v12, %v2553_v37 }
 0x42a   : > { %3136 = vmatmul.mubr.bf16.gmra.mrb[124].mxu1 %v6100_v0 }
 0x42b   : > { %3265 = vmatmul.mubr.bf16.gmra.mrb[140].mxu0 %v2573_v9  ;;  %4270 = vmatprep.mubr.msk.bf16.mxu1 %vm834_vm4, %v6017_v49  ;;  %v2557_v49 = vpop.permute.xlu1 %2556 }
 0x42c   : > { %3272 = vmatprep.mubr.bf16.mxu0 %v6084_v11 }
 0x432   : > { %4271 = vmatmul.mubr.msk.bf16.vlgmr.msra.gmra.mrb[128].mxu1 %vm834_vm4, %v6030_v20  ;;  %v2576_v20 = vsel %vm834_vm4, %v2555_v40, %v2557_v49 }
 0x433   : > { %3273 = vmatmul.mubr.bf16.gmra.mrb[144].mxu0 %v2574_v7  ;;  %4274 = vmatprep.mubr.msk.bf16.mxu1 %vm834_vm4, %v6039_v47  ;;  %v2561_v47 = vpop.permute.xlu0 %2560 }
 0x434   : > { %3280 = vmatprep.mubr.bf16.mxu0 %v6100_v0 }
 0x43a   : > { %4275 = vmatmul.mubr.msk.bf16.gmra.mrb[132].mxu1 %vm834_vm4, %v6046_v32  ;;  %v2577_v32 = vsel %vm834_vm4, %v2559_v21, %v2561_v47 }
 0x43b   : > { %3281 = vmatmul.mubr.bf16.gmra.mrb[148].mxu0 %v2575_v51  ;;  %4278 = vmatprep.mubr.msk.bf16.mxu1 %vm834_vm4, %v6059_v6 }
 0x43c   : > { %3288 = vmatprep.mubr.bf16.mxu0 %v6120_v46 }
 0x442   : > { %4279 = vmatmul.mubr.msk.bf16.gmra.mrb[136].mxu1 %vm834_vm4, %v6072_v8 }
 0x443   : > { %3289 = vmatmul.mubr.bf16.gmra.mrb[152].mxu0 %v2576_v20  ;;  %4282 = vmatprep.mubr.msk.bf16.mxu1 %vm834_vm4, %v6079_v4 }
 0x444   : > { %3710 = vmatprep.mubr.msk.bf16.mxu0 %vm4992_vm6, %v6668_v30 }
 0x44a   : > { %4283 = vmatmul.mubr.msk.bf16.gmra.mrb[140].mxu1 %vm834_vm4, %v6092_v43 }
 0x44b   : > { %3297 = vmatmul.mubr.bf16.gmra.mrb[156].mxu0 %v2577_v32  ;;  %4286 = vmatprep.mubr.msk.bf16.mxu1 %vm834_vm4, %v6132_v26 }
 0x452   : > { %4287 = vmatmul.mubr.msk.bf16.gmra.mrb[144].mxu1 %vm834_vm4, %v6105_v52 }
 0x453   : > { %4290 = vmatprep.mubr.msk.bf16.mxu1 %vm834_vm4, %v6139_v2 }
 0x45a   : > { %4291 = vmatmul.mubr.msk.bf16.gmra.mrb[148].mxu1 %vm834_vm4, %v6112_v63 }
 0x45b   : > { %4294 = vmatprep.mubr.msk.bf16.mxu1 %vm834_vm4, %v6146_v53 }
 0x462   : > { %4295 = vmatmul.mubr.msk.bf16.gmra.mrb[152].mxu1 %vm834_vm4, %v6126_v19 }
 0x463   : > { %4298 = vmatprep.mubr.msk.bf16.mxu1 %vm834_vm4, %v6153_v33 }
 0x46a   : > { %4299 = vmatmul.mubr.msk.bf16.gmra.mrb[156].mxu1 %vm834_vm4, %v6667_v55 }
 0x485   : > { %v3994_v6 = vpop.f32.mrb[64].mxu1 }
 0x486   : > { %v3995_v8 = vpop.f32.mrb[65].mxu1 }
 0x487   : > { %v3996_v4 = vadd.f32 %v3995_v8, %v3994_v6  ;;  %v3997_v11 = vpop.f32.mrb[66].mxu1 }
 0x488   : > { %v3998_v43 = vpop.f32.mrb[67].mxu1 }
 0x489   : > { %v3999_v0 = vadd.f32 %v3998_v43, %v3997_v11  ;;  %v3018_v62 = vadd.f32 %v3996_v4, %v6285_v44 }
 0x48b   : > { %v3021_v58 = vadd.f32 %v3999_v0, %v6285_v44 }
 0x48d   : > { %v4000_v52 = vpop.f32.mrb[68].mxu1 }
 0x48e   : > { %v4001_v63 = vpop.f32.mrb[69].mxu1 }
 0x48f   : > { %v4002_v46 = vadd.f32 %v4001_v63, %v4000_v52  ;;  %v4003_v26 = vpop.f32.mrb[70].mxu1 }
 0x490   : > { %v4004_v2 = vpop.f32.mrb[71].mxu1 }
 0x491   : > { %v4005_v53 = vadd.f32 %v4004_v2, %v4003_v26  ;;  %v3026_v25 = vadd.f32 %v4002_v46, %v6285_v44 }
 0x493   : > { %v3029_v24 = vadd.f32 %v4005_v53, %v6285_v44 }
 0x495   : > { %v4006_v30 = vpop.f32.mrb[72].mxu1 }
 0x496   : > { %v4007_v19 = vpop.f32.mrb[73].mxu1 }
 0x497   : > { %v4008_v57 = vadd.f32 %v4007_v19, %v4006_v30  ;;  %v4009_v3 = vpop.f32.mrb[74].mxu1 }
 0x498   : > { %v4010_v33 = vpop.f32.mrb[75].mxu1 }
 0x499   : > { %v4011_v10 = vadd.f32 %v4010_v33, %v4009_v3  ;;  %v3034_v32 = vadd.f32 %v4008_v57, %v6285_v44 }
 0x49b   : > { %v3037_v0 = vadd.f32 %v4011_v10, %v6285_v44 }
 0x49d   : > { %v4012_v14 = vpop.f32.mrb[76].mxu1 }
 0x49e   : > { %v4013_v55 = vpop.f32.mrb[77].mxu1 }
 0x49f   : > { %v4014_v38 = vadd.f32 %v4013_v55, %v4012_v14  ;;  %v4015_v1 = vpop.f32.mrb[78].mxu1 }
 0x4a0   : > { %v4016_v35 = vpop.f32.mrb[79].mxu1 }
 0x4a1   : > { %v4017_v5 = vadd.f32 %v4016_v35, %v4015_v1  ;;  %v3042_v3 = vadd.f32 %v4014_v38, %v6285_v44 }
 0x4a3   : > { %v3045_v10 = vadd.f32 %v4017_v5, %v6285_v44 }
 0x4a5   : > { %v4018_v17 = vpop.f32.mrb[80].mxu1 }
 0x4a6   : > { %v4106_v23 = vpop.f32.mrb[96].mxu0  ;;  %v4019_v27 = vpop.f32.mrb[81].mxu1 }
 0x4a7   : > { %v4107_v54 = vpop.f32.mrb[97].mxu0  ;;  %v6287_v41 = vadd.f32 %v4019_v27, %v4018_v17  ;;  %v4021_v48 = vpop.f32.mrb[82].mxu1 }
 0x4a8   : > { %v4108_v61 = vadd.f32 %v4107_v54, %v4106_v23  ;;  %v4109_v50 = vpop.f32.mrb[98].mxu0  ;;  %v4022_v29 = vpop.f32.mrb[83].mxu1 }
 0x4a9   : > { %v4110_v22 = vpop.f32.mrb[99].mxu0  ;;  %v6290_v39 = vadd.f32 %v4022_v29, %v4021_v48  ;;  %v3050_v29 = vadd.f32 %v6287_v41, %v6285_v44 }
 0x4aa   : > { %v4111_v31 = vadd.f32 %v4110_v22, %v4109_v50  ;;  %v6293_v16 = vadd.f32 %v4108_v61, %v3018_v62 }
 0x4ac   : > { %v6295_v12 = vadd.f32 %v4111_v31, %v3021_v58 }
 0x4ad   : > { %v4024_v34 = vpop.f32.mrb[84].mxu1 }
 0x4ae   : > { %v4112_v56 = vpop.f32.mrb[100].mxu0  ;;  %v4025_v40 = vpop.f32.mrb[85].mxu1 }
 0x4af   : > { %v4113_v60 = vpop.f32.mrb[101].mxu0  ;;  %v6297_v21 = vadd.f32 %v4025_v40, %v4024_v34  ;;  %v4027_v36 = vpop.f32.mrb[86].mxu1 }
 0x4b0   : > { %v4114_v18 = vadd.f32 %v4113_v60, %v4112_v56  ;;  %v4115_v59 = vpop.f32.mrb[102].mxu0  ;;  %v4028_v42 = vpop.f32.mrb[87].mxu1  ;;  %v3053_v56 = vadd.f32 %v6290_v39, %v6285_v44 }
 0x4b1   : > { %v4116_v28 = vpop.f32.mrb[103].mxu0  ;;  %v6300_v45 = vadd.f32 %v4028_v42, %v4027_v36 }
 0x4b2   : > { %v4117_v13 = vadd.f32 %v4116_v28, %v4115_v59  ;;  %v6303_v9 = vadd.f32 %v4114_v18, %v3026_v25 }
 0x4b4   : > { %v6305_v15 = vadd.f32 %v4117_v13, %v3029_v24  ;;  %v3058_v24 = vadd.f32 %v6297_v21, %v6285_v44 }
 0x4b5   : > { %v4030_v7 = vpop.f32.mrb[88].mxu1 }
 0x4b6   : > { %v4118_v37 = vpop.f32.mrb[104].mxu0  ;;  %v4031_v51 = vpop.f32.mrb[89].mxu1 }
 0x4b7   : > { %v4119_v49 = vpop.f32.mrb[105].mxu0  ;;  %v6307_v20 = vadd.f32 %v4031_v51, %v4030_v7  ;;  %v4033_v47 = vpop.f32.mrb[90].mxu1 }
 0x4b8   : > { %v4120_v6 = vadd.f32 %v4119_v49, %v4118_v37  ;;  %v4121_v8 = vpop.f32.mrb[106].mxu0  ;;  %v4034_v4 = vpop.f32.mrb[91].mxu1  ;;  %v3061_v49 = vadd.f32 %v6300_v45, %v6285_v44 }
 0x4b9   : > { %v4122_v11 = vpop.f32.mrb[107].mxu0  ;;  %v6310_v43 = vadd.f32 %v4034_v4, %v4033_v47 }
 0x4ba   : > { %v4123_v52 = vadd.f32 %v4122_v11, %v4121_v8  ;;  %v6313_v63 = vadd.f32 %v4120_v6, %v3034_v32 }
 0x4bc   : > { %v6315_v46 = vadd.f32 %v4123_v52, %v3037_v0 }
 0x4bd   : > { %v4036_v26 = vpop.f32.mrb[92].mxu1 }
 0x4be   : > { %v4124_v2 = vpop.f32.mrb[108].mxu0  ;;  %v4037_v53 = vpop.f32.mrb[93].mxu1 }
 0x4bf   : > { %v4125_v30 = vpop.f32.mrb[109].mxu0  ;;  %v6317_v19 = vadd.f32 %v4037_v53, %v4036_v26  ;;  %v4039_v57 = vpop.f32.mrb[94].mxu1  ;;  %v3066_v26 = vadd.f32 %v6307_v20, %v6285_v44 }
 0x4c0   : > { %v4126_v33 = vadd.f32 %v4125_v30, %v4124_v2  ;;  %v4127_v14 = vpop.f32.mrb[110].mxu0  ;;  %v4040_v55 = vpop.f32.mrb[95].mxu1 }
 0x4c1   : > { %v4128_v1 = vpop.f32.mrb[111].mxu0  ;;  %v6320_v35 = vadd.f32 %v4040_v55, %v4039_v57 }
 0x4c2   : > { %v4129_v17 = vadd.f32 %v4128_v1, %v4127_v14  ;;  %v6323_v23 = vadd.f32 %v4126_v33, %v3042_v3  ;;  %v3069_v3 = vadd.f32 %v6310_v43, %v6285_v44 }
 0x4c4   : > { %v6325_v27 = vadd.f32 %v4129_v17, %v3045_v10 }
 0x4c5   : > { %v4042_v54 = vpop.f32.mrb[96].mxu1 }
 0x4c6   : > { %v4130_v48 = vpop.f32.mrb[112].mxu0  ;;  %v4043_v62 = vpop.f32.mrb[97].mxu1 }
 0x4c7   : > { %v4131_v61 = vpop.f32.mrb[113].mxu0  ;;  %v6327_v50 = vadd.f32 %v4043_v62, %v4042_v54  ;;  %v4045_v38 = vpop.f32.mrb[98].mxu1  ;;  %v3074_v62 = vadd.f32 %v6317_v19, %v6285_v44 }
 0x4c8   : > { %v4132_v22 = vadd.f32 %v4131_v61, %v4130_v48  ;;  %v4133_v58 = vpop.f32.mrb[114].mxu0  ;;  %v4046_v31 = vpop.f32.mrb[99].mxu1 }
 0x4c9   : > { %v4134_v34 = vpop.f32.mrb[115].mxu0  ;;  %v6331_v5 = vadd.f32 %v4046_v31, %v4045_v38 }
 0x4ca   : > { %v4135_v40 = vadd.f32 %v4134_v34, %v4133_v58  ;;  %v6335_v60 = vadd.f32 %v4132_v22, %v3050_v29  ;;  %v3077_v58 = vadd.f32 %v6320_v35, %v6285_v44 }
 0x4cc   : > { %v6337_v36 = vadd.f32 %v4135_v40, %v3053_v56 }
 0x4cd   : > { %v4048_v25 = vpop.f32.mrb[100].mxu1 }
 0x4ce   : > { %v4136_v18 = vpop.f32.mrb[116].mxu0  ;;  %v4049_v59 = vpop.f32.mrb[101].mxu1 }
 0x4cf   : > { %v4137_v42 = vpop.f32.mrb[117].mxu0  ;;  %v6339_v28 = vadd.f32 %v4049_v59, %v4048_v25  ;;  %v4051_v41 = vpop.f32.mrb[102].mxu1 }
 0x4d0   : > { %v4138_v13 = vadd.f32 %v4137_v42, %v4136_v18  ;;  %v4139_v7 = vpop.f32.mrb[118].mxu0  ;;  %v4052_v37 = vpop.f32.mrb[103].mxu1 }
 0x4d1   : > { %v4140_v51 = vpop.f32.mrb[119].mxu0  ;;  %v6343_v39 = vadd.f32 %v4052_v37, %v4051_v41  ;;  %v3082_v41 = vadd.f32 %v6327_v50, %v6285_v44 }
 0x4d2   : > { %v4141_v47 = vadd.f32 %v4140_v51, %v4139_v7  ;;  %v6347_v32 = vadd.f32 %v4138_v13, %v3058_v24  ;;  %v3085_v51 = vadd.f32 %v6331_v5, %v6285_v44 }
 0x4d4   : > { %v6349_v6 = vadd.f32 %v4141_v47, %v3061_v49 }
 0x4d5   : > { %v4054_v8 = vpop.f32.mrb[104].mxu1 }
 0x4d6   : > { %v4142_v4 = vpop.f32.mrb[120].mxu0  ;;  %v4055_v11 = vpop.f32.mrb[105].mxu1 }
 0x4d7   : > { %v4143_v0 = vpop.f32.mrb[121].mxu0  ;;  %v6351_v52 = vadd.f32 %v4055_v11, %v4054_v8  ;;  %v4057_v21 = vpop.f32.mrb[106].mxu1 }
 0x4d8   : > { %v4144_v2 = vadd.f32 %v4143_v0, %v4142_v4  ;;  %v4145_v53 = vpop.f32.mrb[122].mxu0  ;;  %v4058_v30 = vpop.f32.mrb[107].mxu1 }
 0x4d9   : > { %v4146_v57 = vpop.f32.mrb[123].mxu0  ;;  %v6355_v45 = vadd.f32 %v4058_v30, %v4057_v21 }
 0x4da   : > { %v4147_v33 = vadd.f32 %v4146_v57, %v4145_v53  ;;  %v6359_v14 = vadd.f32 %v4144_v2, %v3066_v26  ;;  %v3090_v2 = vadd.f32 %v6339_v28, %v6285_v44 }
 0x4dc   : > { %v6361_v55 = vadd.f32 %v4147_v33, %v3069_v3  ;;  %v3093_v33 = vadd.f32 %v6343_v39, %v6285_v44 }
 0x4dd   : > { %v4060_v1 = vpop.f32.mrb[108].mxu1 }
 0x4de   : > { %v4148_v10 = vpop.f32.mrb[124].mxu0  ;;  %v4061_v17 = vpop.f32.mrb[109].mxu1 }
 0x4df   : > { %v4149_v54 = vpop.f32.mrb[125].mxu0  ;;  %v6363_v48 = vadd.f32 %v4061_v17, %v4060_v1  ;;  %v4063_v20 = vpop.f32.mrb[110].mxu1 }
 0x4e0   : > { %v4150_v61 = vadd.f32 %v4149_v54, %v4148_v10  ;;  %v4151_v38 = vpop.f32.mrb[126].mxu0  ;;  %v4064_v29 = vpop.f32.mrb[111].mxu1 }
 0x4e1   : > { %v4152_v22 = vpop.f32.mrb[127].mxu0  ;;  %v6367_v43 = vadd.f32 %v4064_v29, %v4063_v20  ;;  %v3098_v29 = vadd.f32 %v6351_v52, %v6285_v44 }
 0x4e2   : > { %v4153_v31 = vadd.f32 %v4152_v22, %v4151_v38  ;;  %v6371_v34 = vadd.f32 %v4150_v61, %v3074_v62 }
 0x4e4   : > { %v6373_v56 = vadd.f32 %v4153_v31, %v3077_v58 }
 0x4e5   : > { %v4066_v40 = vpop.f32.mrb[112].mxu1 }
 0x4e6   : > { %v4154_v25 = vpop.f32.mrb[128].mxu0  ;;  %v4067_v18 = vpop.f32.mrb[113].mxu1 }
 0x4e7   : > { %v4155_v59 = vpop.f32.mrb[129].mxu0  ;;  %v6375_v42 = vadd.f32 %v4067_v18, %v4066_v40  ;;  %v4069_v19 = vpop.f32.mrb[114].mxu1 }
 0x4e8   : > { %v4156_v24 = vadd.f32 %v4155_v59, %v4154_v25  ;;  %v4157_v13 = vpop.f32.mrb[130].mxu0  ;;  %v4070_v7 = vpop.f32.mrb[115].mxu1  ;;  %v3101_v25 = vadd.f32 %v6355_v45, %v6285_v44 }
 0x4e9   : > { %v4158_v37 = vpop.f32.mrb[131].mxu0  ;;  %v6379_v35 = vadd.f32 %v4070_v7, %v4069_v19 }
 0x4ea   : > { %v4159_v49 = vadd.f32 %v4158_v37, %v4157_v13  ;;  %v6383_v47 = vadd.f32 %v4156_v24, %v3082_v41 }
 0x4ec   : > { %v6385_v8 = vadd.f32 %v4159_v49, %v3085_v51  ;;  %v3106_v51 = vadd.f32 %v6363_v48, %v6285_v44 }
 0x4ed   : > { %v4072_v4 = vpop.f32.mrb[116].mxu1 }
 0x4ee   : > { %v4160_v11 = vpop.f32.mrb[132].mxu0  ;;  %v4073_v0 = vpop.f32.mrb[117].mxu1 }
 0x4ef   : > { %v4161_v21 = vpop.f32.mrb[133].mxu0  ;;  %v6387_v26 = vadd.f32 %v4073_v0, %v4072_v4  ;;  %v4075_v50 = vpop.f32.mrb[118].mxu1 }
 0x4f0   : > { %v4162_v53 = vadd.f32 %v4161_v21, %v4160_v11  ;;  %v4163_v30 = vpop.f32.mrb[134].mxu0  ;;  %v4076_v57 = vpop.f32.mrb[119].mxu1  ;;  %v3109_v21 = vadd.f32 %v6367_v43, %v6285_v44  ;;  %v3114_v43 = vadd.f32 %v6375_v42, %v6285_v44 }
 0x4f1   : > { %v4164_v3 = vpop.f32.mrb[135].mxu0  ;;  %v6391_v5 = vadd.f32 %v4076_v57, %v4075_v50 }
 0x4f2   : > { %v4165_v1 = vadd.f32 %v4164_v3, %v4163_v30  ;;  %v6395_v10 = vadd.f32 %v4162_v53, %v3090_v2 }
 0x4f4   : > { %v6397_v17 = vadd.f32 %v4165_v1, %v3093_v33 }
 0x4f5   : > { %v4078_v54 = vpop.f32.mrb[120].mxu1 }
 0x4f6   : > { %v4166_v20 = vpop.f32.mrb[136].mxu0  ;;  %v4079_v62 = vpop.f32.mrb[121].mxu1 }
 0x4f7   : > { %v4167_v61 = vpop.f32.mrb[137].mxu0  ;;  %v6399_v38 = vadd.f32 %v4079_v62, %v4078_v54  ;;  %v4081_v28 = vpop.f32.mrb[122].mxu1  ;;  %v4417_v62 = vld [vmem:[%s4601_s9 + $0x10] sm:$0xff] }
 0x4f8   : > { %v4168_v22 = vadd.f32 %v4167_v61, %v4166_v20  ;;  %v4169_v58 = vpop.f32.mrb[138].mxu0  ;;  %v4082_v31 = vpop.f32.mrb[123].mxu1 }
 0x4f9   : > { %v4170_v40 = vpop.f32.mrb[139].mxu0  ;;  %v6403_v39 = vadd.f32 %v4082_v31, %v4081_v28 }
 0x4fa   : > { %v4171_v18 = vadd.f32 %v4170_v40, %v4169_v58  ;;  %v6407_v59 = vadd.f32 %v4168_v22, %v3098_v29  ;;  %v4418_v58 = vld [vmem:[%s4601_s9] sm:$0xff] }
 0x4fc   : > { %v6409_v19 = vadd.f32 %v4171_v18, %v3101_v25  ;;  %v4419_v25 = vld [vmem:[%s4601_s9 + $0x18] sm:$0xff] }
 0x4fd   : > { %v4084_v41 = vpop.f32.mrb[124].mxu1 }
 0x4fe   : > { %v4172_v24 = vpop.f32.mrb[140].mxu0  ;;  %v4085_v13 = vpop.f32.mrb[125].mxu1 }
 0x4ff   : > { %v4173_v52 = vpop.f32.mrb[141].mxu0  ;;  %v6411_v7 = vadd.f32 %v4085_v13, %v4084_v41  ;;  %v4087_v37 = vpop.f32.mrb[126].mxu1 }
 0x500   : > { %v4174_v49 = vadd.f32 %v4173_v52, %v4172_v24  ;;  %v4175_v4 = vpop.f32.mrb[142].mxu0  ;;  %v4088_v45 = vpop.f32.mrb[127].mxu1 }
 0x501   : > { %v4176_v11 = vpop.f32.mrb[143].mxu0  ;;  %v6415_v0 = vadd.f32 %v4088_v45, %v4087_v37  ;;  %v3122_v45 = vadd.f32 %v6387_v26, %v6285_v44 }
 0x502   : > { %v4177_v50 = vadd.f32 %v4176_v11, %v4175_v4  ;;  %v6420_v2 = vadd.f32 %v4174_v49, %v3106_v51 }
 0x504   : > { %v6424_v53 = vadd.f32 %v4177_v50, %v3109_v21  ;;  %v4421_v21 = vld [vmem:[%s4601_s9 + $0x30] sm:$0xff] }
 0x505   : > { %v4272_v48 = vpop.f32.mrb[128].mxu1 }
 0x506   : > { %v4178_v30 = vpop.f32.mrb[144].mxu0  ;;  %v3348_v57 = vadd.f32 %v4272_v48, %v6303_v9  ;;  %v3339_v3 = vpop.f32.mrb[129].mxu1 }
 0x507   : > { %v4179_v33 = vpop.f32.mrb[145].mxu0  ;;  %v3340_v1 = vadd.f32 %v3339_v3, %v6293_v16  ;;  %v4273_v54 = vpop.f32.mrb[130].mxu1  ;;  %v3117_v16 = vadd.f32 %v6379_v35, %v6285_v44 }
 0x508   : > { %v4180_v20 = vadd.f32 %v4179_v33, %v4178_v30  ;;  %v3468_v61 = vadd.f32 %v4417_v62, %v3348_v57  ;;  %v4181_v28 = vpop.f32.mrb[146].mxu0  ;;  %v3351_v29 = vadd.f32 %v4273_v54, %v6305_v15  ;;  %v3342_v22 = vpop.f32.mrb[131].mxu1  ;;  %v4422_v57 = vld [vmem:[%s4601_s9 + $0x20] sm:$0xff]  ;;  %v4423_v54 = vld [vmem:[%s4601_s9 + $0x38] sm:$0xff] }
 0x509   : > { %v3466_v31 = vadd.f32 %v4418_v58, %v3340_v1  ;;  %v4182_v9 = vpop.f32.mrb[147].mxu0  ;;  %v3343_v40 = vadd.f32 %v3342_v22, %v6295_v12  ;;  %v4420_v12 = vld [vmem:[%s4601_s9 + $0x8] sm:$0xff]  ;;  %v3125_v1 = vadd.f32 %v6391_v5, %v6285_v44 }
 0x50a   : > { %3500 = vst.msk [vmem:[%s6436_s26 + $0x10] sm:$0xff] %vm834_vm4, %v3468_v61  ;;  %v4183_v42 = vadd.f32 %v4182_v9, %v4181_v28  ;;  %v3469_v15 = vadd.f32 %v4419_v25, %v3351_v29  ;;  %v6441_v18 = vadd.f32 %v4180_v20, %v3114_v43  ;;  %v3130_v9 = vadd.f32 %v6399_v38, %v6285_v44 }
 0x50b   : > { %3498 = vst.msk [vmem:[%s6436_s26] sm:$0xff] %vm834_vm4, %v3466_v31  ;;  %v3467_v41 = vadd.f32 %v4420_v12, %v3343_v40  ;;  %v4426_v12 = vld [vmem:[%s4601_s9 + $0x40] sm:$0xff] }
 0x50c   : > { %3501 = vst.msk [vmem:[%s6436_s26 + $0x18] sm:$0xff] %vm834_vm4, %v3469_v15  ;;  %v6448_v35 = vadd.f32 %v4183_v42, %v3117_v16  ;;  %v4425_v16 = vld [vmem:[%s4601_s9 + $0x50] sm:$0xff] }
 0x50d   : > { %3499 = vst.msk [vmem:[%s6436_s26 + $0x8] sm:$0xff] %vm834_vm4, %v3467_v41  ;;  %v4276_v24 = vpop.f32.mrb[132].mxu1 }
 0x50e   : > { %v4184_v13 = vpop.f32.mrb[148].mxu0  ;;  %v3364_v52 = vadd.f32 %v4276_v24, %v6323_v23  ;;  %v3355_v37 = vpop.f32.mrb[133].mxu1 }
 0x50f   : > { %v4185_v51 = vpop.f32.mrb[149].mxu0  ;;  %v3356_v49 = vadd.f32 %v3355_v37, %v6313_v63  ;;  %v4277_v4 = vpop.f32.mrb[134].mxu1 }
 0x510   : > { %v4186_v11 = vadd.f32 %v4185_v51, %v4184_v13  ;;  %v3472_v50 = vadd.f32 %v4421_v21, %v3364_v52  ;;  %v4187_v48 = vpop.f32.mrb[150].mxu0  ;;  %v3367_v30 = vadd.f32 %v4277_v4, %v6325_v27  ;;  %v3358_v23 = vpop.f32.mrb[135].mxu1  ;;  %v4424_v27 = vld [vmem:[%s4601_s9 + $0x28] sm:$0xff]  ;;  %v3133_v13 = vadd.f32 %v6403_v39, %v6285_v44  ;;  %v4427_v52 = vld [vmem:[%s4601_s9 + $0x58] sm:$0xff] }
 0x511   : > { %v3470_v3 = vadd.f32 %v4422_v57, %v3356_v49  ;;  %v4188_v33 = vpop.f32.mrb[151].mxu0  ;;  %v3359_v63 = vadd.f32 %v3358_v23, %v6315_v46  ;;  %v4429_v57 = vld [vmem:[%s4601_s9 + $0x70] sm:$0xff] }
 0x512   : > { %3504 = vst.msk [vmem:[%s6436_s26 + $0x30] sm:$0xff] %vm834_vm4, %v3472_v50  ;;  %v4189_v26 = vadd.f32 %v4188_v33, %v4187_v48  ;;  %v3473_v43 = vadd.f32 %v4423_v54, %v3367_v30  ;;  %v6465_v20 = vadd.f32 %v4186_v11, %v3122_v45  ;;  %v3138_v30 = vadd.f32 %v6411_v7, %v6285_v44 }
 0x513   : > { %3502 = vst.msk [vmem:[%s6436_s26 + $0x20] sm:$0xff] %vm834_vm4, %v3470_v3  ;;  %v3471_v62 = vadd.f32 %v4424_v27, %v3359_v63  ;;  %v4431_v27 = vld [vmem:[%s4601_s9 + $0x78] sm:$0xff] }
 0x514   : > { %3505 = vst.msk [vmem:[%s6436_s26 + $0x38] sm:$0xff] %vm834_vm4, %v3473_v43  ;;  %v6472_v61 = vadd.f32 %v4189_v26, %v3125_v1  ;;  %v4430_v1 = vld [vmem:[%s4601_s9 + $0x60] sm:$0xff]  ;;  %v3141_v43 = vadd.f32 %v6415_v0, %v6285_v44 }
 0x515   : > { %3503 = vst.msk [vmem:[%s6436_s26 + $0x28] sm:$0xff] %vm834_vm4, %v3471_v62  ;;  %v4280_v46 = vpop.f32.mrb[136].mxu1 }
 0x516   : > { %v4190_v5 = vpop.f32.mrb[152].mxu0  ;;  %v3380_v28 = vadd.f32 %v4280_v46, %v6347_v32  ;;  %v3371_v29 = vpop.f32.mrb[137].mxu1 }
 0x517   : > { %v4191_v22 = vpop.f32.mrb[153].mxu0  ;;  %v3372_v58 = vadd.f32 %v3371_v29, %v6335_v60  ;;  %v4281_v31 = vpop.f32.mrb[138].mxu1 }
 0x518   : > { %v4192_v40 = vadd.f32 %v4191_v22, %v4190_v5  ;;  %v3476_v42 = vadd.f32 %v4425_v16, %v3380_v28  ;;  %v4193_v25 = vpop.f32.mrb[154].mxu0  ;;  %v3383_v15 = vadd.f32 %v4281_v31, %v6349_v6  ;;  %v3374_v32 = vpop.f32.mrb[139].mxu1  ;;  %v4428_v6 = vld [vmem:[%s4601_s9 + $0x48] sm:$0xff]  ;;  %v4434_v16 = vld [vmem:[%s4601_s9 + $0x80] sm:$0xff] }
 0x519   : > { %v3474_v41 = vadd.f32 %v4426_v12, %v3372_v58  ;;  %v4194_v24 = vpop.f32.mrb[155].mxu0  ;;  %v3375_v60 = vadd.f32 %v3374_v32, %v6337_v36  ;;  %v4433_v58 = vld [vmem:[%s4601_s9 + $0x90] sm:$0xff] }
 0x51a   : > { %3508 = vst.msk [vmem:[%s6436_s26 + $0x50] sm:$0xff] %vm834_vm4, %v3476_v42  ;;  %v4195_v38 = vadd.f32 %v4194_v24, %v4193_v25  ;;  %v3477_v37 = vadd.f32 %v4427_v52, %v3383_v15  ;;  %v6489_v51 = vadd.f32 %v4192_v40, %v3130_v9  ;;  %v4435_v15 = vld [vmem:[%s4601_s9 + $0x98] sm:$0xff] }
 0x51b   : > { %3506 = vst.msk [vmem:[%s6436_s26 + $0x40] sm:$0xff] %vm834_vm4, %v3474_v41  ;;  %v3475_v49 = vadd.f32 %v4428_v6, %v3375_v60  ;;  %v4437_v60 = vld [vmem:[%s4601_s9 + $0xb0] sm:$0xff] }
 0x51c   : > { %3509 = vst.msk [vmem:[%s6436_s26 + $0x58] sm:$0xff] %vm834_vm4, %v3477_v37  ;;  %v6496_v4 = vadd.f32 %v4195_v38, %v3133_v13  ;;  %v4438_v37 = vld [vmem:[%s4601_s9 + $0xa0] sm:$0xff] }
 0x51d   : > { %3507 = vst.msk [vmem:[%s6436_s26 + $0x48] sm:$0xff] %vm834_vm4, %v3475_v49  ;;  %v4284_v36 = vpop.f32.mrb[140].mxu1 }
 0x51e   : > { %v4196_v39 = vpop.f32.mrb[156].mxu0  ;;  %v3396_v45 = vadd.f32 %v4284_v36, %v6371_v34  ;;  %v3387_v11 = vpop.f32.mrb[141].mxu1  ;;  %v4439_v36 = vld [vmem:[%s4601_s9 + $0xb8] sm:$0xff] }
 0x51f   : > { %v4197_v21 = vpop.f32.mrb[157].mxu0  ;;  %v3388_v50 = vadd.f32 %v3387_v11, %v6359_v14  ;;  %v4285_v48 = vpop.f32.mrb[142].mxu1 }
 0x520   : > { %v4198_v23 = vadd.f32 %v4197_v21, %v4196_v39  ;;  %v3480_v3 = vadd.f32 %v4429_v57, %v3396_v45  ;;  %v4199_v33 = vpop.f32.mrb[158].mxu0  ;;  %v3399_v63 = vadd.f32 %v4285_v48, %v6373_v56  ;;  %v3390_v34 = vpop.f32.mrb[143].mxu1  ;;  %v4432_v56 = vld [vmem:[%s4601_s9 + $0x68] sm:$0xff]  ;;  %v4442_v57 = vld [vmem:[%s4601_s9 + $0xc0] sm:$0xff] }
 0x521   : > { %v3478_v26 = vadd.f32 %v4430_v1, %v3388_v50  ;;  %v4200_v54 = vpop.f32.mrb[159].mxu0  ;;  %v3391_v14 = vadd.f32 %v3390_v34, %v6361_v55  ;;  %v4441_v50 = vld [vmem:[%s4601_s9 + $0xd0] sm:$0xff] }
 0x522   : > { %3512 = vst.msk [vmem:[%s6436_s26 + $0x70] sm:$0xff] %vm834_vm4, %v3480_v3  ;;  %v4201_v7 = vadd.f32 %v4200_v54, %v4199_v33  ;;  %v3481_v62 = vadd.f32 %v4431_v27, %v3399_v63  ;;  %v6513_v46 = vadd.f32 %v4198_v23, %v3138_v30 }
 0x523   : > { %3510 = vst.msk [vmem:[%s6436_s26 + $0x60] sm:$0xff] %vm834_vm4, %v3478_v26  ;;  %v3479_v5 = vadd.f32 %v4432_v56, %v3391_v14  ;;  %v4445_v14 = vld [vmem:[%s4601_s9 + $0xf0] sm:$0xff] }
 0x524   : > { %3513 = vst.msk [vmem:[%s6436_s26 + $0x78] sm:$0xff] %vm834_vm4, %v3481_v62  ;;  %v6520_v55 = vadd.f32 %v4201_v7, %v3141_v43  ;;  %v4446_v62 = vld [vmem:[%s4601_s9 + $0xe0] sm:$0xff] }
 0x525   : > { %3511 = vst.msk [vmem:[%s6436_s26 + $0x68] sm:$0xff] %vm834_vm4, %v3479_v5  ;;  %v4288_v44 = vpop.f32.mrb[144].mxu1 }
 0x526   : > { %v3412_v0 = vadd.f32 %v4288_v44, %v6395_v10  ;;  %v3403_v28 = vpop.f32.mrb[145].mxu1 }
 0x527   : > { %v3404_v29 = vadd.f32 %v3403_v28, %v6383_v47  ;;  %v4289_v22 = vpop.f32.mrb[146].mxu1  ;;  %v4436_v47 = vld [vmem:[%s4601_s9 + $0x88] sm:$0xff] }
 0x528   : > { %v3484_v31 = vadd.f32 %v4433_v58, %v3412_v0  ;;  %v3415_v9 = vadd.f32 %v4289_v22, %v6397_v17  ;;  %v3406_v40 = vpop.f32.mrb[147].mxu1 }
 0x529   : > { %v3482_v42 = vadd.f32 %v4434_v16, %v3404_v29  ;;  %v3407_v25 = vadd.f32 %v3406_v40, %v6385_v8 }
 0x52a   : > { %3516 = vst.msk [vmem:[%s6436_s26 + $0x90] sm:$0xff] %vm834_vm4, %v3484_v31  ;;  %v3485_v10 = vadd.f32 %v4435_v15, %v3415_v9 }
 0x52b   : > { %3514 = vst.msk [vmem:[%s6436_s26 + $0x80] sm:$0xff] %vm834_vm4, %v3482_v42  ;;  %v3483_v32 = vadd.f32 %v4436_v47, %v3407_v25 }
 0x52c   : > { %3517 = vst.msk [vmem:[%s6436_s26 + $0x98] sm:$0xff] %vm834_vm4, %v3485_v10 }
 0x52d   : > { %3515 = vst.msk [vmem:[%s6436_s26 + $0x88] sm:$0xff] %vm834_vm4, %v3483_v32  ;;  %v4292_v17 = vpop.f32.mrb[148].mxu1 }
 0x52e   : > { %v3428_v8 = vadd.f32 %v4292_v17, %v6420_v2  ;;  %v3419_v12 = vpop.f32.mrb[149].mxu1 }
 0x52f   : > { %v3420_v41 = vadd.f32 %v3419_v12, %v6407_v59  ;;  %v4293_v24 = vpop.f32.mrb[150].mxu1  ;;  %v4440_v59 = vld [vmem:[%s4601_s9 + $0xa8] sm:$0xff] }
 0x530   : > { %v3488_v13 = vadd.f32 %v4437_v60, %v3428_v8  ;;  %v3431_v38 = vadd.f32 %v4293_v24, %v6424_v53  ;;  %v3422_v52 = vpop.f32.mrb[151].mxu1 }
 0x531   : > { %v3486_v6 = vadd.f32 %v4438_v37, %v3420_v41  ;;  %v3423_v49 = vadd.f32 %v3422_v52, %v6409_v19 }
 0x532   : > { %3520 = vst.msk [vmem:[%s6436_s26 + $0xb0] sm:$0xff] %vm834_vm4, %v3488_v13  ;;  %v3489_v2 = vadd.f32 %v4439_v36, %v3431_v38 }
 0x533   : > { %3518 = vst.msk [vmem:[%s6436_s26 + $0xa0] sm:$0xff] %vm834_vm4, %v3486_v6  ;;  %v3487_v39 = vadd.f32 %v4440_v59, %v3423_v49 }
 0x534   : > { %3521 = vst.msk [vmem:[%s6436_s26 + $0xb8] sm:$0xff] %vm834_vm4, %v3489_v2 }
 0x535   : > { %3519 = vst.msk [vmem:[%s6436_s26 + $0xa8] sm:$0xff] %vm834_vm4, %v3487_v39  ;;  %v4296_v53 = vpop.f32.mrb[152].mxu1 }
 0x536   : > { %v3444_v19 = vadd.f32 %v4296_v53, %v6465_v20  ;;  %v3435_v45 = vpop.f32.mrb[153].mxu1  ;;  %v4443_v20 = vld [vmem:[%s4601_s9 + $0xd8] sm:$0xff] }
 0x537   : > { %v3436_v11 = vadd.f32 %v3435_v45, %v6441_v18  ;;  %v4297_v21 = vpop.f32.mrb[154].mxu1  ;;  %v4444_v18 = vld [vmem:[%s4601_s9 + $0xc8] sm:$0xff] }
 0x538   : > { %v3492_v48 = vadd.f32 %v4441_v50, %v3444_v19  ;;  %v3447_v30 = vadd.f32 %v4297_v21, %v6472_v61  ;;  %v3438_v23 = vpop.f32.mrb[155].mxu1 }
 0x539   : > { %v3490_v3 = vadd.f32 %v4442_v57, %v3436_v11  ;;  %v3439_v33 = vadd.f32 %v3438_v23, %v6448_v35 }
 0x53a   : > { %3524 = vst.msk [vmem:[%s6436_s26 + $0xd0] sm:$0xff] %vm834_vm4, %v3492_v48  ;;  %v3493_v63 = vadd.f32 %v4443_v20, %v3447_v30 }
 0x53b   : > { %3522 = vst.msk [vmem:[%s6436_s26 + $0xc0] sm:$0xff] %vm834_vm4, %v3490_v3  ;;  %v3491_v34 = vadd.f32 %v4444_v18, %v3439_v33 }
 0x53c   : > { %3525 = vst.msk [vmem:[%s6436_s26 + $0xd8] sm:$0xff] %vm834_vm4, %v3493_v63 }
 0x53d   : > { %3523 = vst.msk [vmem:[%s6436_s26 + $0xc8] sm:$0xff] %vm834_vm4, %v3491_v34  ;;  %v4300_v61 = vpop.f32.mrb[156].mxu1 }
 0x53e   : > { %v3460_v1 = vadd.f32 %v4300_v61, %v6513_v46  ;;  %v3451_v35 = vpop.f32.mrb[157].mxu1 }
 0x53f   : > { %v3452_v26 = vadd.f32 %v3451_v35, %v6489_v51  ;;  %v4301_v54 = vpop.f32.mrb[158].mxu1  ;;  %v4447_v51 = vld [vmem:[%s4601_s9 + $0xf8] sm:$0xff] }
 0x540   : > { %v3496_v43 = vadd.f32 %v4445_v14, %v3460_v1  ;;  %v3463_v7 = vadd.f32 %v4301_v54, %v6520_v55  ;;  %v3454_v27 = vpop.f32.mrb[159].mxu1  ;;  %v4448_v55 = vld [vmem:[%s4601_s9 + $0xe8] sm:$0xff] }
 0x541   : > { %v3494_v56 = vadd.f32 %v4446_v62, %v3452_v26  ;;  %v3455_v46 = vadd.f32 %v3454_v27, %v6496_v4 }
 0x542   : > { %3528 = vst.msk [vmem:[%s6436_s26 + $0xf0] sm:$0xff] %vm834_vm4, %v3496_v43  ;;  %v3497_v5 = vadd.f32 %v4447_v51, %v3463_v7 }
 0x543   : > { %3526 = vst.msk [vmem:[%s6436_s26 + $0xe0] sm:$0xff] %vm834_vm4, %v3494_v56  ;;  %v3495_v44 = vadd.f32 %v4448_v55, %v3455_v46 }
 0x544   : > { %3529 = vst.msk [vmem:[%s6436_s26 + $0xf8] sm:$0xff] %vm834_vm4, %v3497_v5 }
 0x545   : > { %3527 = vst.msk [vmem:[%s6436_s26 + $0xe8] sm:$0xff] %vm834_vm4, %v3495_v44 }
 0x546   : > { %4462 = shalt.err (!%p4459_p3)
}
 0x547   : > { %s4463_s9 = scalar_lea.hbm %s6586_s8, 4096  ;;  %s4467_s17 = scalar_lea.hbm %s6645_s5, 8192 }
 0x548   : > { %p4464_p4 = scmp.ne.s32.totalorder %s6586_s8, %s4463_s9  ;;  %p4468_p9 = scmp.lt.u32.totalorder %s6586_s8, %s6645_s5 }
 0x549   : > { %p4469_p10 = scmp.lt.u32.totalorder %s4467_s17, %s4463_s9  ;;  %p4471_p12 = scmp.lt.u32.totalorder %s4463_s9, %s6586_s8 }
 0x54a   : > { %p4465_p7 = pnand %p4464_p4, %p4586_p5 }
 0x54b   : > { %p4470_p11 = por %p4469_p10, %p4468_p9 }
 0x54c   : > { %p4466_p8 = pneg %p4465_p7 }
 0x54d   : > { %p4472_p13 = por %p4471_p12, %p4470_p11 }
 0x54f   : > { %p4473_p0 = pnand %p4472_p13, %p4466_p8 }
 0x551   : > { %4476 = shalt.err (!%p4473_p0)
}
 0x552   : > { %s4516_s26 = smov 128   ;;  %s4517_s30 = smov 8  }
 0x553   : > { %4302 = dma.vmem_to_hbm [thread:$0]  (%p4586_p5), %s6588_s6, 4096, %s6586_s8, %s6599_s11, %s4516_s26, %s4516_s26, %s4517_s30  }
 0x554 PF: > { %p4308_p1 = scmp.ge.s32.totalorder %s4511_s21, 2  ;;  %s3559_s7 = sand.u32 1, %s4499_s18  }
 0x555   : > { %s3560_s22 = scalar_lea.sflag [#allocation3], %s3559_s7 }
 0x556   : > { %p4305_p2 = pnand %p4308_p1, %p4590_p6 }
 0x558   : > { %4494 = dma.done.wait (!%p4305_p2), %s3560_s22, 4096  }
 0x559   : > { %4496 = vsyncadd (!%p4305_p2), %s3560_s22, 4294963200  ;;  %p15_p3 = scmp.ge.s32.totalorder %s4573_s24, 4   ;;  %s6670_s18 = smov %s4503_s19 }
 0x55a   : > { %s6671_s19 = smov %s4507_s20  ;;  %s6672_s20 = smov %s4584_s27 }
 0x55b   : > { %s6673_s21 = smov %s4573_s24  ;;  %17 = sbr.rel (!%p15_p3) target bundleno = 3 (0x3), region = 75 }
 0x562   :  { %3565 = vsyncpa [#allocation3], 1 }
 0x563   :  { %3567 = vsyncpa [#allocation3 + $0x1], 1 }

</bundles_post_ra>
